<compile_context>
chip_gen: v6e
topology: v6e:2x2x1
jax: 0.10.0
libtpu: 0.0.40
codegen_flags: <defaults>
</compile_context>

<pallas_src>
import functools

import numpy as np

import jax
import jax.numpy as jnp
from jax import lax
from jax.experimental import pallas as pl
from jax.experimental.pallas import tpu as pltpu


# ---------------------------------------------------------------------------
# Fused kernel: 3x [reflect-pad 3x3 conv -> +bias -> ReLU -> BN affine]  ->  fc1.
# One grid step = one fc output tile of width tn; the (cheap) conv chain is recomputed
# per tile so the grid axis stays "parallel" (megacore-safe).
# Activation layout: rows = (height-)padded y, cols = x*C + c.
# ---------------------------------------------------------------------------
def _fused_kernel(H, W, NB, NBpad,
                  x_ref, w1_ref, w2_ref, w3_ref, caff_ref, fcw_ref, faff_ref,
                  o_ref, pA, pB, pC, p3):
    Hp = H + 2
    C3 = W * 8

    def affine(acc, li):
        wc = acc.shape[1]
        b = caff_ref[3 * li + 0:3 * li + 1, 0:wc]
        sc = caff_ref[3 * li + 1:3 * li + 2, 0:wc]
        sh = caff_ref[3 * li + 2:3 * li + 3, 0:wc]
        # Conv -> +bias -> ReLU -> folded eval-BatchNorm affine (affine not folded into the
        # conv weights because the ReLU sits between them).
        return jnp.maximum(acc + b, 0.0) * sc + sh

    def conv(pin_ref, w_ref):
        # 3x3 conv as 3 vertically-shifted MXU matmuls; horizontal taps and the
        # width-direction ReflectionPad(1) are folded into the block weights.
        acc = jnp.dot(pin_ref[0:H, :], w_ref[0],
                      preferred_element_type=jnp.float32)
        acc = acc + jnp.dot(pin_ref[1:1 + H, :], w_ref[1],
                            preferred_element_type=jnp.float32)
        acc = acc + jnp.dot(pin_ref[2:2 + H, :], w_ref[2],
                            preferred_element_type=jnp.float32)
        return acc

    def repad(y, pout_ref):
        # Height-direction ReflectionPad(1) for the next conv.  Reflect rows are taken from
        # the VALUE `y`, not the freshly written ref (no same-ref RAW ordering hazard).
        pout_ref[1:H + 1, :] = y
        pout_ref[0:1, :] = y[1:2, :]                 # padded row -1 <- row 1
        pout_ref[Hp - 1:Hp, :] = y[H - 2:H - 1, :]   # padded row H  <- row H-2

    # fc-LHS staging buffer: p3[y, n, :] = conv3 output of image n at row y.
    # Zero so the padded batch rows NB..NBpad-1 stay deterministic (sliced off in the wrapper).
    p3[...] = jnp.zeros((H, NBpad, C3), jnp.float32)

    for n in range(NB):                               # static unroll over images (both branches)
        repad(x_ref[n], pA)                           # in-kernel input height reflect pad
        a1 = affine(conv(pA, w1_ref), 0)              # conv1: 1 -> 4   (H, W*4)
        repad(a1, pB)
        a2 = affine(conv(pB, w2_ref), 1)              # conv2: 4 -> 8   (H, W*8)
        repad(a2, pC)
        a3 = affine(conv(pC, w3_ref), 2)              # conv3: 8 -> 8   (H, W*8)
        p3[:, n:n + 1, :] = a3[:, None, :]            # transpose-store: images become sublanes

    # fc1: out = relu(flat @ Wfc + b) * scale + shift, with fc K ordered (y, x, c) on the host,
    # contraction decomposed over y -> each LHS tile p3[y] is an aligned (NBpad, W*8) block
    # (no flatten transpose anywhere), bf16 x bf16 MXU with f32 accumulation.
    tn = o_ref.shape[1]
    acc = jnp.zeros((NBpad, tn), jnp.float32)
    for y in range(H):                                # static unroll, H matmuls
        acc = acc + jnp.dot(p3[y].astype(jnp.bfloat16), fcw_ref[y],
                            preferred_element_type=jnp.float32)
    b, sc, sh = faff_ref[0:1, :], faff_ref[1:2, :], faff_ref[2:3, :]
    o_ref[...] = (jnp.maximum(acc + b, 0.0) * sc + sh).astype(o_ref.dtype)


def fused_forward(x, w1, w2, w3, caff, fcw, faff, *, tn=256):
    """x: (NB, H, W) f32 (Cin=1 images, both branches) -> (NBpad, Npad) f32 fc output."""
    NB, H, W = x.shape
    Hw, C3, Npad = fcw.shape
    assert Hw == H and C3 == W * 8 and Npad % tn == 0
    NBpad = ((NB + 7) // 8) * 8                       # pad fc M to a full sublane group

    kernel = functools.partial(_fused_kernel, H, W, NB, NBpad)
    return pl.pallas_call(
        kernel,
        out_shape=jax.ShapeDtypeStruct((NBpad, Npad), jnp.float32),
        grid=(Npad // tn,),
        in_specs=[
            pl.BlockSpec((NB, H, W), lambda j: (0, 0, 0)),
            pl.BlockSpec(w1.shape, lambda j: (0, 0, 0)),
            pl.BlockSpec(w2.shape, lambda j: (0, 0, 0)),
            pl.BlockSpec(w3.shape, lambda j: (0, 0, 0)),
            pl.BlockSpec(caff.shape, lambda j: (0, 0)),
            pl.BlockSpec((H, C3, tn), lambda j: (0, 0, j)),
            pl.BlockSpec((3, tn), lambda j: (0, j)),
        ],
        out_specs=pl.BlockSpec((NBpad, tn), lambda j: (0, j)),
        scratch_shapes=[
            pltpu.VMEM((H + 2, W), jnp.float32),          # padded input (per-image, reused)
            pltpu.VMEM((H + 2, W * 4), jnp.float32),      # padded conv1 activation
            pltpu.VMEM((H + 2, W * 8), jnp.float32),      # padded conv2 activation
            pltpu.VMEM((H, NBpad, W * 8), jnp.float32),   # fc LHS staging (y, image, x*c)
        ],
        compiler_params=pltpu.CompilerParams(
            dimension_semantics=("parallel",)),
    )(x, w1, w2, w3, caff, fcw, faff)


# ---------------------------------------------------------------------------
# Parameter packing (glue, runs once on host)
# ---------------------------------------------------------------------------
def fold_bn(gamma, beta, mean, var, eps=1e-5):
    scale = gamma / jnp.sqrt(var + eps)
    shift = beta - mean * scale
    return scale, shift


def build_shift_weights(w_hwio, W):
    """Fold the 3x3 taps + width-direction ReflectionPad(1) of a conv into three
    (W*Cin, W*Cout) block matrices, one per vertical tap dy.

    NOTE: weight layout here is HWIO; real PyTorch Conv2d weights (OIHW) must be
    permuted to (kH, kW, Cin, Cout) before calling this.
    """
    kh, kw, cin, cout = w_hwio.shape
    w_np = np.asarray(w_hwio, dtype=np.float32)
    wb = np.zeros((3, W * cin, W * cout), np.float32)
    for dy in range(3):
        for dx in range(3):
            for x in range(W):
                q = x + dx - 1
                if q < 0:
                    q = -q                     # reflect: -1 -> 1
                elif q > W - 1:
                    q = 2 * (W - 1) - q        # reflect:  W -> W-2
                wb[dy, q * cin:(q + 1) * cin, x * cout:(x + 1) * cout] += w_np[dy, dx]
    return jnp.asarray(wb)


def make_params(key, H=16, W=16, fc_out=500, fc_out_pad=512):
    ks = jax.random.split(key, 12)

    def conv_block(kw, kb, kbn, cin, cout):
        w = jax.random.normal(kw, (3, 3, cin, cout), jnp.float32) * 0.1
        b = jax.random.normal(kb, (cout,), jnp.float32) * 0.05
        kk = jax.random.split(kbn, 4)
        gamma = 1.0 + 0.1 * jax.random.normal(kk[0], (cout,), jnp.float32)
        beta = 0.1 * jax.random.normal(kk[1], (cout,), jnp.float32)
        mean = 0.1 * jax.random.normal(kk[2], (cout,), jnp.float32)
        var = jnp.abs(jax.random.normal(kk[3], (cout,), jnp.float32)) + 0.5
        scale, shift = fold_bn(gamma, beta, mean, var)
        return w, b, scale, shift

    convs = [conv_block(ks[0], ks[1], ks[2], 1, 4),
             conv_block(ks[3], ks[4], ks[5], 4, 8),
             conv_block(ks[6], ks[7], ks[8], 8, 8)]

    fc_in = 8 * H * W
    w_fc = jax.random.normal(ks[9], (fc_in, fc_out), jnp.float32) / jnp.sqrt(float(fc_in))
    b_fc = jax.random.normal(ks[10], (fc_out,), jnp.float32) * 0.05
    kk = jax.random.split(ks[11], 4)
    gamma = 1.0 + 0.1 * jax.random.normal(kk[0], (fc_out,), jnp.float32)
    beta = 0.1 * jax.random.normal(kk[1], (fc_out,), jnp.float32)
    mean = 0.1 * jax.random.normal(kk[2], (fc_out,), jnp.float32)
    var = jnp.abs(jax.random.normal(kk[3], (fc_out,), jnp.float32)) + 0.5
    sc_fc, sh_fc = fold_bn(gamma, beta, mean, var)

    # Packed, kernel-ready forms ------------------------------------------
    affw = W * 8                                  # 128 lanes for W=16
    aff_rows = []
    for (w, b, scale, shift) in convs:
        for v in (b, scale, shift):
            t = jnp.tile(v, W)                    # per-(x, c) layout: col = x*Cout + c
            aff_rows.append(jnp.pad(t, (0, affw - t.shape[0])))
    conv_affine = jnp.stack(aff_rows, axis=0).astype(jnp.float32)       # (9, 128)

    # fc weight: reorder rows from PyTorch flatten order (c, y, x) to the kernel's natural
    # (y, x, c) order (deletes the wrapper-side NCHW transpose), pad N 500->512, store bf16.
    pad_n = fc_out_pad - fc_out
    w_perm = w_fc.reshape(8, H, W, fc_out)                              # (c, y, x, o)
    w_perm = jnp.transpose(w_perm, (1, 2, 0, 3)).reshape(H, W * 8, fc_out)   # (y, x*8+c, o)
    fc_w = jnp.pad(w_perm, ((0, 0), (0, 0), (0, pad_n))).astype(jnp.bfloat16)  # (H, 128, 512)
    fc_affine = jnp.stack([jnp.pad(b_fc, (0, pad_n)),
                           jnp.pad(sc_fc, (0, pad_n)),
                           jnp.pad(sh_fc, (0, pad_n))], axis=0).astype(jnp.float32)

    params = {
        "w1": build_shift_weights(convs[0][0], W),
        "w2": build_shift_weights(convs[1][0], W),
        "w3": build_shift_weights(convs[2][0], W),
        "conv_affine": conv_affine,
        "fc_w": fc_w,
        "fc_affine": fc_affine,
    }
    raw = {"conv": convs, "fc": (w_fc, b_fc, sc_fc, sh_fc)}
    return params, raw


# ---------------------------------------------------------------------------
# Forward pass (both Siamese branches batched through one fused kernel)
# ---------------------------------------------------------------------------
def network_forward(params, input1, input2, *, fc_out=500, tn=256):
    n1 = input1.shape[0]
    x = jnp.concatenate([input1, input2], axis=0).astype(jnp.float32)   # (2N, 1, H, W) NCHW
    nb = x.shape[0]
    x2d = x[:, 0, :, :]                                                 # (2N, H, W) (Cin = 1)

    out = fused_forward(x2d, params["w1"], params["w2"], params["w3"],
                        params["conv_affine"], params["fc_w"], params["fc_affine"],
                        tn=tn)                                          # (NBpad, 512)
    out = out[:nb, :fc_out]                                             # (2N, 500)
    return out[:n1], out[n1:]


# ---------------------------------------------------------------------------
# Pure-JAX reference (for correctness cross-check)
# ---------------------------------------------------------------------------
def reference_forward(raw, x_nchw):
    x = jnp.transpose(x_nchw, (0, 2, 3, 1)).astype(jnp.float32)         # NHWC
    for (w, b, scale, shift) in raw["conv"]:
        xp = jnp.pad(x, ((0, 0), (1, 1), (1, 1), (0, 0)), mode="reflect")
        y = lax.conv_general_dilated(
            xp, w, window_strides=(1, 1), padding="VALID",
            dimension_numbers=("NHWC", "HWIO", "NHWC"),
            precision=lax.Precision.HIGHEST)
        x = jnp.maximum(y + b, 0.0) * scale + shift
    n = x.shape[0]
    flat = jnp.transpose(x, (0, 3, 1, 2)).reshape(n, -1)                # PyTorch (c, y, x) flatten
    w, b, scale, shift = raw["fc"]
    acc = jnp.matmul(flat, w, precision=lax.Precision.HIGHEST)
    return jnp.maximum(acc + b, 0.0) * scale + shift


# ---------------------------------------------------------------------------
if __name__ == "__main__":
    key = jax.random.PRNGKey(0)
    k_p, k_x1, k_x2 = jax.random.split(key, 3)

    # Small shapes: batch=2, 1 input channel, 16x16 spatial
    # (the original module implies 100x100; fc1 input dim scales as 8*H*W).
    N, H, W = 2, 16, 16
    params, raw = make_params(k_p, H=H, W=W)

    input1 = jax.random.normal(k_x1, (N, 1, H, W), jnp.float32)   # NCHW
    input2 = jax.random.normal(k_x2, (N, 1, H, W), jnp.float32)   # NCHW

    fwd = jax.jit(network_forward)
    out1, out2 = fwd(params, input1, input2)
    jax.block_until_ready((out1, out2))

    assert out1.shape == (N, 500) and out2.shape == (N, 500)
    assert jnp.all(jnp.isfinite(out1)) and jnp.all(jnp.isfinite(out2))

    # Cross-check against the pure-JAX reference (bf16 fc1 path => loose tolerance).
    ref1 = reference_forward(raw, input1)
    ref2 = reference_forward(raw, input2)
    assert jnp.allclose(out1, ref1, rtol=5e-2, atol=5e-2)
    assert jnp.allclose(out2, ref2, rtol=5e-2, atol=5e-2)

    print("KERNEL_OK")
</pallas_src>

<mosaic_0001>
module attributes {stable_mosaic.version = 11 : i64} {
  func.func @_fused_kernel(%arg0: i32, %arg1: memref<4x16x16xf32, #tpu.memory_space<vmem>>, %arg2: memref<3x16x64xf32, #tpu.memory_space<vmem>>, %arg3: memref<3x64x128xf32, #tpu.memory_space<vmem>>, %arg4: memref<3x128x128xf32, #tpu.memory_space<vmem>>, %arg5: memref<9x128xf32, #tpu.memory_space<vmem>>, %arg6: memref<16x128x256xbf16, #tpu.memory_space<vmem>>, %arg7: memref<3x256xf32, #tpu.memory_space<vmem>>, %arg8: memref<8x256xf32, #tpu.memory_space<vmem>>, %arg9: memref<18x16xf32, #tpu.memory_space<vmem>>, %arg10: memref<18x64xf32, #tpu.memory_space<vmem>>, %arg11: memref<18x128xf32, #tpu.memory_space<vmem>>, %arg12: memref<16x8x128xf32, #tpu.memory_space<vmem>>) attributes {dimension_semantics = [#tpu.dimension_semantics<parallel>], iteration_bounds = array<i64: 2>, scalar_prefetch = 0 : i64, scratch_operands = 4 : i64, tpu.core_type = #tpu.core_type<tc>, window_params = [{pipeline_mode = #tpu.pipeline_mode<synchronous>, transform_indices = @transform_0, window_bounds = array<i64: 4, 16, 16>}, {pipeline_mode = #tpu.pipeline_mode<synchronous>, transform_indices = @transform_1, window_bounds = array<i64: 3, 16, 64>}, {pipeline_mode = #tpu.pipeline_mode<synchronous>, transform_indices = @transform_2, window_bounds = array<i64: 3, 64, 128>}, {pipeline_mode = #tpu.pipeline_mode<synchronous>, transform_indices = @transform_3, window_bounds = array<i64: 3, 128, 128>}, {pipeline_mode = #tpu.pipeline_mode<synchronous>, transform_indices = @transform_4, window_bounds = array<i64: 9, 128>}, {transform_indices = @transform_5, window_bounds = array<i64: 16, 128, 256>}, {transform_indices = @transform_6, window_bounds = array<i64: 3, 256>}, {transform_indices = @transform_7, window_bounds = array<i64: 8, 256>}]} {
    %cst = arith.constant 0.000000e+00 : f32
    %0 = vector.broadcast %cst : f32 to vector<16x8x128xf32>
    %c0 = arith.constant 0 : index
    %c0_0 = arith.constant 0 : index
    %c0_1 = arith.constant 0 : index
    %1 = vector.load %arg12[%c0, %c0_0, %c0_1] : memref<16x8x128xf32, #tpu.memory_space<vmem>>, vector<16x8x128xf32>
    tpu.vector_store %arg12[%c0, %c0_0, %c0_1], %0 {strides = array<i32>} : memref<16x8x128xf32, #tpu.memory_space<vmem>>, vector<16x8x128xf32>,
    %c0_2 = arith.constant 0 : index
    %c0_3 = arith.constant 0 : index
    %c0_4 = arith.constant 0 : index
    %2 = vector.load %arg1[%c0_2, %c0_3, %c0_4] : memref<4x16x16xf32, #tpu.memory_space<vmem>>, vector<1x16x16xf32>
    %3 = vector.shape_cast %2 : vector<1x16x16xf32> to vector<16x16xf32>
    %c1 = arith.constant 1 : index
    %c0_5 = arith.constant 0 : index
    %4 = vector.load %arg9[%c1, %c0_5] : memref<18x16xf32, #tpu.memory_space<vmem>>, vector<16x16xf32>
    tpu.vector_store %arg9[%c1, %c0_5], %3 {strides = array<i32>} : memref<18x16xf32, #tpu.memory_space<vmem>>, vector<16x16xf32>,
    %5 = vector.extract_strided_slice %3 {offsets = [1, 0], sizes = [1, 16], strides = [1, 1]} : vector<16x16xf32> to vector<1x16xf32>
    %c0_6 = arith.constant 0 : index
    %c0_7 = arith.constant 0 : index
    %6 = vector.load %arg9[%c0_6, %c0_7] : memref<18x16xf32, #tpu.memory_space<vmem>>, vector<1x16xf32>
    tpu.vector_store %arg9[%c0_6, %c0_7], %5 {strides = array<i32>} : memref<18x16xf32, #tpu.memory_space<vmem>>, vector<1x16xf32>,
    %7 = vector.extract_strided_slice %3 {offsets = [14, 0], sizes = [1, 16], strides = [1, 1]} : vector<16x16xf32> to vector<1x16xf32>
    %c17 = arith.constant 17 : index
    %c0_8 = arith.constant 0 : index
    %8 = vector.load %arg9[%c17, %c0_8] : memref<18x16xf32, #tpu.memory_space<vmem>>, vector<1x16xf32>
    tpu.vector_store %arg9[%c17, %c0_8], %7 {strides = array<i32>} : memref<18x16xf32, #tpu.memory_space<vmem>>, vector<1x16xf32>,
    %c0_9 = arith.constant 0 : index
    %c0_10 = arith.constant 0 : index
    %9 = vector.load %arg9[%c0_9, %c0_10] : memref<18x16xf32, #tpu.memory_space<vmem>>, vector<16x16xf32>
    %c0_11 = arith.constant 0 : index
    %c0_12 = arith.constant 0 : index
    %c0_13 = arith.constant 0 : index
    %10 = vector.load %arg2[%c0_11, %c0_12, %c0_13] : memref<3x16x64xf32, #tpu.memory_space<vmem>>, vector<1x16x64xf32>
    %11 = vector.shape_cast %10 : vector<1x16x64xf32> to vector<16x64xf32>
    %cst_14 = arith.constant dense<0.000000e+00> : vector<16x64xf32>
    %12 = tpu.matmul %9, %11, %cst_14 {dimension_numbers = #tpu.dot_dimension_numbers<[1], [0], [0], [1], [0, 0, 1, 1], [], []>} : vector<16x16xf32>, vector<16x64xf32>, vector<16x64xf32> -> vector<16x64xf32>
    %c1_15 = arith.constant 1 : index
    %c0_16 = arith.constant 0 : index
    %13 = vector.load %arg9[%c1_15, %c0_16] : memref<18x16xf32, #tpu.memory_space<vmem>>, vector<16x16xf32>
    %c1_17 = arith.constant 1 : index
    %c0_18 = arith.constant 0 : index
    %c0_19 = arith.constant 0 : index
    %14 = vector.load %arg2[%c1_17, %c0_18, %c0_19] : memref<3x16x64xf32, #tpu.memory_space<vmem>>, vector<1x16x64xf32>
    %15 = vector.shape_cast %14 : vector<1x16x64xf32> to vector<16x64xf32>
    %cst_20 = arith.constant dense<0.000000e+00> : vector<16x64xf32>
    %16 = tpu.matmul %13, %15, %cst_20 {dimension_numbers = #tpu.dot_dimension_numbers<[1], [0], [0], [1], [0, 0, 1, 1], [], []>} : vector<16x16xf32>, vector<16x64xf32>, vector<16x64xf32> -> vector<16x64xf32>
    %17 = arith.addf %12, %16 : vector<16x64xf32>
    %c2 = arith.constant 2 : index
    %c0_21 = arith.constant 0 : index
    %18 = vector.load %arg9[%c2, %c0_21] : memref<18x16xf32, #tpu.memory_space<vmem>>, vector<16x16xf32>
    %c2_22 = arith.constant 2 : index
    %c0_23 = arith.constant 0 : index
    %c0_24 = arith.constant 0 : index
    %19 = vector.load %arg2[%c2_22, %c0_23, %c0_24] : memref<3x16x64xf32, #tpu.memory_space<vmem>>, vector<1x16x64xf32>
    %20 = vector.shape_cast %19 : vector<1x16x64xf32> to vector<16x64xf32>
    %cst_25 = arith.constant dense<0.000000e+00> : vector<16x64xf32>
    %21 = tpu.matmul %18, %20, %cst_25 {dimension_numbers = #tpu.dot_dimension_numbers<[1], [0], [0], [1], [0, 0, 1, 1], [], []>} : vector<16x16xf32>, vector<16x64xf32>, vector<16x64xf32> -> vector<16x64xf32>
    %22 = arith.addf %17, %21 : vector<16x64xf32>
    %c0_26 = arith.constant 0 : index
    %c0_27 = arith.constant 0 : index
    %23 = vector.load %arg5[%c0_26, %c0_27] : memref<9x128xf32, #tpu.memory_space<vmem>>, vector<1x64xf32>
    %c1_28 = arith.constant 1 : index
    %c0_29 = arith.constant 0 : index
    %24 = vector.load %arg5[%c1_28, %c0_29] : memref<9x128xf32, #tpu.memory_space<vmem>>, vector<1x64xf32>
    %c2_30 = arith.constant 2 : index
    %c0_31 = arith.constant 0 : index
    %25 = vector.load %arg5[%c2_30, %c0_31] : memref<9x128xf32, #tpu.memory_space<vmem>>, vector<1x64xf32>
    %26 = vector.broadcast %23 : vector<1x64xf32> to vector<16x64xf32>
    %27 = arith.addf %22, %26 : vector<16x64xf32>
    %cst_32 = arith.constant 0.000000e+00 : f32
    %28 = vector.broadcast %cst_32 : f32 to vector<16x64xf32>
    %29 = arith.maximumf %27, %28 : vector<16x64xf32>
    %30 = vector.broadcast %24 : vector<1x64xf32> to vector<16x64xf32>
    %31 = arith.mulf %29, %30 : vector<16x64xf32>
    %32 = vector.broadcast %25 : vector<1x64xf32> to vector<16x64xf32>
    %33 = arith.addf %31, %32 : vector<16x64xf32>
    %c1_33 = arith.constant 1 : index
    %c0_34 = arith.constant 0 : index
    %34 = vector.load %arg10[%c1_33, %c0_34] : memref<18x64xf32, #tpu.memory_space<vmem>>, vector<16x64xf32>
    tpu.vector_store %arg10[%c1_33, %c0_34], %33 {strides = array<i32>} : memref<18x64xf32, #tpu.memory_space<vmem>>, vector<16x64xf32>,
    %35 = vector.extract_strided_slice %33 {offsets = [1, 0], sizes = [1, 64], strides = [1, 1]} : vector<16x64xf32> to vector<1x64xf32>
    %c0_35 = arith.constant 0 : index
    %c0_36 = arith.constant 0 : index
    %36 = vector.load %arg10[%c0_35, %c0_36] : memref<18x64xf32, #tpu.memory_space<vmem>>, vector<1x64xf32>
    tpu.vector_store %arg10[%c0_35, %c0_36], %35 {strides = array<i32>} : memref<18x64xf32, #tpu.memory_space<vmem>>, vector<1x64xf32>,
    %37 = vector.extract_strided_slice %33 {offsets = [14, 0], sizes = [1, 64], strides = [1, 1]} : vector<16x64xf32> to vector<1x64xf32>
    %c17_37 = arith.constant 17 : index
    %c0_38 = arith.constant 0 : index
    %38 = vector.load %arg10[%c17_37, %c0_38] : memref<18x64xf32, #tpu.memory_space<vmem>>, vector<1x64xf32>
    tpu.vector_store %arg10[%c17_37, %c0_38], %37 {strides = array<i32>} : memref<18x64xf32, #tpu.memory_space<vmem>>, vector<1x64xf32>,
    %c0_39 = arith.constant 0 : index
    %c0_40 = arith.constant 0 : index
    %39 = vector.load %arg10[%c0_39, %c0_40] : memref<18x64xf32, #tpu.memory_space<vmem>>, vector<16x64xf32>
    %c0_41 = arith.constant 0 : index
    %c0_42 = arith.constant 0 : index
    %c0_43 = arith.constant 0 : index
    %40 = vector.load %arg3[%c0_41, %c0_42, %c0_43] : memref<3x64x128xf32, #tpu.memory_space<vmem>>, vector<1x64x128xf32>
    %41 = vector.shape_cast %40 : vector<1x64x128xf32> to vector<64x128xf32>
    %cst_44 = arith.constant dense<0.000000e+00> : vector<16x128xf32>
    %42 = tpu.matmul %39, %41, %cst_44 {dimension_numbers = #tpu.dot_dimension_numbers<[1], [0], [0], [1], [0, 0, 1, 1], [], []>} : vector<16x64xf32>, vector<64x128xf32>, vector<16x128xf32> -> vector<16x128xf32>
    %c1_45 = arith.constant 1 : index
    %c0_46 = arith.constant 0 : index
    %43 = vector.load %arg10[%c1_45, %c0_46] : memref<18x64xf32, #tpu.memory_space<vmem>>, vector<16x64xf32>
    %c1_47 = arith.constant 1 : index
    %c0_48 = arith.constant 0 : index
    %c0_49 = arith.constant 0 : index
    %44 = vector.load %arg3[%c1_47, %c0_48, %c0_49] : memref<3x64x128xf32, #tpu.memory_space<vmem>>, vector<1x64x128xf32>
    %45 = vector.shape_cast %44 : vector<1x64x128xf32> to vector<64x128xf32>
    %cst_50 = arith.constant dense<0.000000e+00> : vector<16x128xf32>
    %46 = tpu.matmul %43, %45, %cst_50 {dimension_numbers = #tpu.dot_dimension_numbers<[1], [0], [0], [1], [0, 0, 1, 1], [], []>} : vector<16x64xf32>, vector<64x128xf32>, vector<16x128xf32> -> vector<16x128xf32>
    %47 = arith.addf %42, %46 : vector<16x128xf32>
    %c2_51 = arith.constant 2 : index
    %c0_52 = arith.constant 0 : index
    %48 = vector.load %arg10[%c2_51, %c0_52] : memref<18x64xf32, #tpu.memory_space<vmem>>, vector<16x64xf32>
    %c2_53 = arith.constant 2 : index
    %c0_54 = arith.constant 0 : index
    %c0_55 = arith.constant 0 : index
    %49 = vector.load %arg3[%c2_53, %c0_54, %c0_55] : memref<3x64x128xf32, #tpu.memory_space<vmem>>, vector<1x64x128xf32>
    %50 = vector.shape_cast %49 : vector<1x64x128xf32> to vector<64x128xf32>
    %cst_56 = arith.constant dense<0.000000e+00> : vector<16x128xf32>
    %51 = tpu.matmul %48, %50, %cst_56 {dimension_numbers = #tpu.dot_dimension_numbers<[1], [0], [0], [1], [0, 0, 1, 1], [], []>} : vector<16x64xf32>, vector<64x128xf32>, vector<16x128xf32> -> vector<16x128xf32>
    %52 = arith.addf %47, %51 : vector<16x128xf32>
    %c3 = arith.constant 3 : index
    %c0_57 = arith.constant 0 : index
    %53 = vector.load %arg5[%c3, %c0_57] : memref<9x128xf32, #tpu.memory_space<vmem>>, vector<1x128xf32>
    %c4 = arith.constant 4 : index
    %c0_58 = arith.constant 0 : index
    %54 = vector.load %arg5[%c4, %c0_58] : memref<9x128xf32, #tpu.memory_space<vmem>>, vector<1x128xf32>
    %c5 = arith.constant 5 : index
    %c0_59 = arith.constant 0 : index
    %55 = vector.load %arg5[%c5, %c0_59] : memref<9x128xf32, #tpu.memory_space<vmem>>, vector<1x128xf32>
    %56 = vector.broadcast %53 : vector<1x128xf32> to vector<16x128xf32>
    %57 = arith.addf %52, %56 : vector<16x128xf32>
    %cst_60 = arith.constant 0.000000e+00 : f32
    %58 = vector.broadcast %cst_60 : f32 to vector<16x128xf32>
    %59 = arith.maximumf %57, %58 : vector<16x128xf32>
    %60 = vector.broadcast %54 : vector<1x128xf32> to vector<16x128xf32>
    %61 = arith.mulf %59, %60 : vector<16x128xf32>
    %62 = vector.broadcast %55 : vector<1x128xf32> to vector<16x128xf32>
    %63 = arith.addf %61, %62 : vector<16x128xf32>
    %c1_61 = arith.constant 1 : index
    %c0_62 = arith.constant 0 : index
    %64 = vector.load %arg11[%c1_61, %c0_62] : memref<18x128xf32, #tpu.memory_space<vmem>>, vector<16x128xf32>
    tpu.vector_store %arg11[%c1_61, %c0_62], %63 {strides = array<i32>} : memref<18x128xf32, #tpu.memory_space<vmem>>, vector<16x128xf32>,
    %65 = vector.extract_strided_slice %63 {offsets = [1, 0], sizes = [1, 128], strides = [1, 1]} : vector<16x128xf32> to vector<1x128xf32>
    %c0_63 = arith.constant 0 : index
    %c0_64 = arith.constant 0 : index
    %66 = vector.load %arg11[%c0_63, %c0_64] : memref<18x128xf32, #tpu.memory_space<vmem>>, vector<1x128xf32>
    tpu.vector_store %arg11[%c0_63, %c0_64], %65 {strides = array<i32>} : memref<18x128xf32, #tpu.memory_space<vmem>>, vector<1x128xf32>,
    %67 = vector.extract_strided_slice %63 {offsets = [14, 0], sizes = [1, 128], strides = [1, 1]} : vector<16x128xf32> to vector<1x128xf32>
    %c17_65 = arith.constant 17 : index
    %c0_66 = arith.constant 0 : index
    %68 = vector.load %arg11[%c17_65, %c0_66] : memref<18x128xf32, #tpu.memory_space<vmem>>, vector<1x128xf32>
    tpu.vector_store %arg11[%c17_65, %c0_66], %67 {strides = array<i32>} : memref<18x128xf32, #tpu.memory_space<vmem>>, vector<1x128xf32>,
    %c0_67 = arith.constant 0 : index
    %c0_68 = arith.constant 0 : index
    %69 = vector.load %arg11[%c0_67, %c0_68] : memref<18x128xf32, #tpu.memory_space<vmem>>, vector<16x128xf32>
    %c0_69 = arith.constant 0 : index
    %c0_70 = arith.constant 0 : index
    %c0_71 = arith.constant 0 : index
    %70 = vector.load %arg4[%c0_69, %c0_70, %c0_71] : memref<3x128x128xf32, #tpu.memory_space<vmem>>, vector<1x128x128xf32>
    %71 = vector.shape_cast %70 : vector<1x128x128xf32> to vector<128x128xf32>
    %cst_72 = arith.constant dense<0.000000e+00> : vector<16x128xf32>
    %72 = tpu.matmul %69, %71, %cst_72 {dimension_numbers = #tpu.dot_dimension_numbers<[1], [0], [0], [1], [0, 0, 1, 1], [], []>} : vector<16x128xf32>, vector<128x128xf32>, vector<16x128xf32> -> vector<16x128xf32>
    %c1_73 = arith.constant 1 : index
    %c0_74 = arith.constant 0 : index
    %73 = vector.load %arg11[%c1_73, %c0_74] : memref<18x128xf32, #tpu.memory_space<vmem>>, vector<16x128xf32>
    %c1_75 = arith.constant 1 : index
    %c0_76 = arith.constant 0 : index
    %c0_77 = arith.constant 0 : index
    %74 = vector.load %arg4[%c1_75, %c0_76, %c0_77] : memref<3x128x128xf32, #tpu.memory_space<vmem>>, vector<1x128x128xf32>
    %75 = vector.shape_cast %74 : vector<1x128x128xf32> to vector<128x128xf32>
    %cst_78 = arith.constant dense<0.000000e+00> : vector<16x128xf32>
    %76 = tpu.matmul %73, %75, %cst_78 {dimension_numbers = #tpu.dot_dimension_numbers<[1], [0], [0], [1], [0, 0, 1, 1], [], []>} : vector<16x128xf32>, vector<128x128xf32>, vector<16x128xf32> -> vector<16x128xf32>
    %77 = arith.addf %72, %76 : vector<16x128xf32>
    %c2_79 = arith.constant 2 : index
    %c0_80 = arith.constant 0 : index
    %78 = vector.load %arg11[%c2_79, %c0_80] : memref<18x128xf32, #tpu.memory_space<vmem>>, vector<16x128xf32>
    %c2_81 = arith.constant 2 : index
    %c0_82 = arith.constant 0 : index
    %c0_83 = arith.constant 0 : index
    %79 = vector.load %arg4[%c2_81, %c0_82, %c0_83] : memref<3x128x128xf32, #tpu.memory_space<vmem>>, vector<1x128x128xf32>
    %80 = vector.shape_cast %79 : vector<1x128x128xf32> to vector<128x128xf32>
    %cst_84 = arith.constant dense<0.000000e+00> : vector<16x128xf32>
    %81 = tpu.matmul %78, %80, %cst_84 {dimension_numbers = #tpu.dot_dimension_numbers<[1], [0], [0], [1], [0, 0, 1, 1], [], []>} : vector<16x128xf32>, vector<128x128xf32>, vector<16x128xf32> -> vector<16x128xf32>
    %82 = arith.addf %77, %81 : vector<16x128xf32>
    %c6 = arith.constant 6 : index
    %c0_85 = arith.constant 0 : index
    %83 = vector.load %arg5[%c6, %c0_85] : memref<9x128xf32, #tpu.memory_space<vmem>>, vector<1x128xf32>
    %c7 = arith.constant 7 : index
    %c0_86 = arith.constant 0 : index
    %84 = vector.load %arg5[%c7, %c0_86] : memref<9x128xf32, #tpu.memory_space<vmem>>, vector<1x128xf32>
    %c8 = arith.constant 8 : index
    %c0_87 = arith.constant 0 : index
    %85 = vector.load %arg5[%c8, %c0_87] : memref<9x128xf32, #tpu.memory_space<vmem>>, vector<1x128xf32>
    %86 = vector.broadcast %83 : vector<1x128xf32> to vector<16x128xf32>
    %87 = arith.addf %82, %86 : vector<16x128xf32>
    %cst_88 = arith.constant 0.000000e+00 : f32
    %88 = vector.broadcast %cst_88 : f32 to vector<16x128xf32>
    %89 = arith.maximumf %87, %88 : vector<16x128xf32>
    %90 = vector.broadcast %84 : vector<1x128xf32> to vector<16x128xf32>
    %91 = arith.mulf %89, %90 : vector<16x128xf32>
    %92 = vector.broadcast %85 : vector<1x128xf32> to vector<16x128xf32>
    %93 = arith.addf %91, %92 : vector<16x128xf32>
    %94 = vector.shape_cast %93 : vector<16x128xf32> to vector<16x1x128xf32>
    %c0_89 = arith.constant 0 : index
    %c0_90 = arith.constant 0 : index
    %c0_91 = arith.constant 0 : index
    %95 = vector.load %arg12[%c0_89, %c0_90, %c0_91] : memref<16x8x128xf32, #tpu.memory_space<vmem>>, vector<16x1x128xf32>
    tpu.vector_store %arg12[%c0_89, %c0_90, %c0_91], %94 {strides = array<i32>} : memref<16x8x128xf32, #tpu.memory_space<vmem>>, vector<16x1x128xf32>,
    %c1_92 = arith.constant 1 : index
    %c0_93 = arith.constant 0 : index
    %c0_94 = arith.constant 0 : index
    %96 = vector.load %arg1[%c1_92, %c0_93, %c0_94] : memref<4x16x16xf32, #tpu.memory_space<vmem>>, vector<1x16x16xf32>
    %97 = vector.shape_cast %96 : vector<1x16x16xf32> to vector<16x16xf32>
    %c1_95 = arith.constant 1 : index
    %c0_96 = arith.constant 0 : index
    %98 = vector.load %arg9[%c1_95, %c0_96] : memref<18x16xf32, #tpu.memory_space<vmem>>, vector<16x16xf32>
    tpu.vector_store %arg9[%c1_95, %c0_96], %97 {strides = array<i32>} : memref<18x16xf32, #tpu.memory_space<vmem>>, vector<16x16xf32>,
    %99 = vector.extract_strided_slice %97 {offsets = [1, 0], sizes = [1, 16], strides = [1, 1]} : vector<16x16xf32> to vector<1x16xf32>
    %c0_97 = arith.constant 0 : index
    %c0_98 = arith.constant 0 : index
    %100 = vector.load %arg9[%c0_97, %c0_98] : memref<18x16xf32, #tpu.memory_space<vmem>>, vector<1x16xf32>
    tpu.vector_store %arg9[%c0_97, %c0_98], %99 {strides = array<i32>} : memref<18x16xf32, #tpu.memory_space<vmem>>, vector<1x16xf32>,
    %101 = vector.extract_strided_slice %97 {offsets = [14, 0], sizes = [1, 16], strides = [1, 1]} : vector<16x16xf32> to vector<1x16xf32>
    %c17_99 = arith.constant 17 : index
    %c0_100 = arith.constant 0 : index
    %102 = vector.load %arg9[%c17_99, %c0_100] : memref<18x16xf32, #tpu.memory_space<vmem>>, vector<1x16xf32>
    tpu.vector_store %arg9[%c17_99, %c0_100], %101 {strides = array<i32>} : memref<18x16xf32, #tpu.memory_space<vmem>>, vector<1x16xf32>,
    %c0_101 = arith.constant 0 : index
    %c0_102 = arith.constant 0 : index
    %103 = vector.load %arg9[%c0_101, %c0_102] : memref<18x16xf32, #tpu.memory_space<vmem>>, vector<16x16xf32>
    %c0_103 = arith.constant 0 : index
    %c0_104 = arith.constant 0 : index
    %c0_105 = arith.constant 0 : index
    %104 = vector.load %arg2[%c0_103, %c0_104, %c0_105] : memref<3x16x64xf32, #tpu.memory_space<vmem>>, vector<1x16x64xf32>
    %105 = vector.shape_cast %104 : vector<1x16x64xf32> to vector<16x64xf32>
    %cst_106 = arith.constant dense<0.000000e+00> : vector<16x64xf32>
    %106 = tpu.matmul %103, %105, %cst_106 {dimension_numbers = #tpu.dot_dimension_numbers<[1], [0], [0], [1], [0, 0, 1, 1], [], []>} : vector<16x16xf32>, vector<16x64xf32>, vector<16x64xf32> -> vector<16x64xf32>
    %c1_107 = arith.constant 1 : index
    %c0_108 = arith.constant 0 : index
    %107 = vector.load %arg9[%c1_107, %c0_108] : memref<18x16xf32, #tpu.memory_space<vmem>>, vector<16x16xf32>
    %c1_109 = arith.constant 1 : index
    %c0_110 = arith.constant 0 : index
    %c0_111 = arith.constant 0 : index
    %108 = vector.load %arg2[%c1_109, %c0_110, %c0_111] : memref<3x16x64xf32, #tpu.memory_space<vmem>>, vector<1x16x64xf32>
    %109 = vector.shape_cast %108 : vector<1x16x64xf32> to vector<16x64xf32>
    %cst_112 = arith.constant dense<0.000000e+00> : vector<16x64xf32>
    %110 = tpu.matmul %107, %109, %cst_112 {dimension_numbers = #tpu.dot_dimension_numbers<[1], [0], [0], [1], [0, 0, 1, 1], [], []>} : vector<16x16xf32>, vector<16x64xf32>, vector<16x64xf32> -> vector<16x64xf32>
    %111 = arith.addf %106, %110 : vector<16x64xf32>
    %c2_113 = arith.constant 2 : index
    %c0_114 = arith.constant 0 : index
    %112 = vector.load %arg9[%c2_113, %c0_114] : memref<18x16xf32, #tpu.memory_space<vmem>>, vector<16x16xf32>
    %c2_115 = arith.constant 2 : index
    %c0_116 = arith.constant 0 : index
    %c0_117 = arith.constant 0 : index
    %113 = vector.load %arg2[%c2_115, %c0_116, %c0_117] : memref<3x16x64xf32, #tpu.memory_space<vmem>>, vector<1x16x64xf32>
    %114 = vector.shape_cast %113 : vector<1x16x64xf32> to vector<16x64xf32>
    %cst_118 = arith.constant dense<0.000000e+00> : vector<16x64xf32>
    %115 = tpu.matmul %112, %114, %cst_118 {dimension_numbers = #tpu.dot_dimension_numbers<[1], [0], [0], [1], [0, 0, 1, 1], [], []>} : vector<16x16xf32>, vector<16x64xf32>, vector<16x64xf32> -> vector<16x64xf32>
    %116 = arith.addf %111, %115 : vector<16x64xf32>
    %c0_119 = arith.constant 0 : index
    %c0_120 = arith.constant 0 : index
    %117 = vector.load %arg5[%c0_119, %c0_120] : memref<9x128xf32, #tpu.memory_space<vmem>>, vector<1x64xf32>
    %c1_121 = arith.constant 1 : index
    %c0_122 = arith.constant 0 : index
    %118 = vector.load %arg5[%c1_121, %c0_122] : memref<9x128xf32, #tpu.memory_space<vmem>>, vector<1x64xf32>
    %c2_123 = arith.constant 2 : index
    %c0_124 = arith.constant 0 : index
    %119 = vector.load %arg5[%c2_123, %c0_124] : memref<9x128xf32, #tpu.memory_space<vmem>>, vector<1x64xf32>
    %120 = vector.broadcast %117 : vector<1x64xf32> to vector<16x64xf32>
    %121 = arith.addf %116, %120 : vector<16x64xf32>
    %cst_125 = arith.constant 0.000000e+00 : f32
    %122 = vector.broadcast %cst_125 : f32 to vector<16x64xf32>
    %123 = arith.maximumf %121, %122 : vector<16x64xf32>
    %124 = vector.broadcast %118 : vector<1x64xf32> to vector<16x64xf32>
    %125 = arith.mulf %123, %124 : vector<16x64xf32>
    %126 = vector.broadcast %119 : vector<1x64xf32> to vector<16x64xf32>
    %127 = arith.addf %125, %126 : vector<16x64xf32>
    %c1_126 = arith.constant 1 : index
    %c0_127 = arith.constant 0 : index
    %128 = vector.load %arg10[%c1_126, %c0_127] : memref<18x64xf32, #tpu.memory_space<vmem>>, vector<16x64xf32>
    tpu.vector_store %arg10[%c1_126, %c0_127], %127 {strides = array<i32>} : memref<18x64xf32, #tpu.memory_space<vmem>>, vector<16x64xf32>,
    %129 = vector.extract_strided_slice %127 {offsets = [1, 0], sizes = [1, 64], strides = [1, 1]} : vector<16x64xf32> to vector<1x64xf32>
    %c0_128 = arith.constant 0 : index
    %c0_129 = arith.constant 0 : index
    %130 = vector.load %arg10[%c0_128, %c0_129] : memref<18x64xf32, #tpu.memory_space<vmem>>, vector<1x64xf32>
    tpu.vector_store %arg10[%c0_128, %c0_129], %129 {strides = array<i32>} : memref<18x64xf32, #tpu.memory_space<vmem>>, vector<1x64xf32>,
    %131 = vector.extract_strided_slice %127 {offsets = [14, 0], sizes = [1, 64], strides = [1, 1]} : vector<16x64xf32> to vector<1x64xf32>
    %c17_130 = arith.constant 17 : index
    %c0_131 = arith.constant 0 : index
    %132 = vector.load %arg10[%c17_130, %c0_131] : memref<18x64xf32, #tpu.memory_space<vmem>>, vector<1x64xf32>
    tpu.vector_store %arg10[%c17_130, %c0_131], %131 {strides = array<i32>} : memref<18x64xf32, #tpu.memory_space<vmem>>, vector<1x64xf32>,
    %c0_132 = arith.constant 0 : index
    %c0_133 = arith.constant 0 : index
    %133 = vector.load %arg10[%c0_132, %c0_133] : memref<18x64xf32, #tpu.memory_space<vmem>>, vector<16x64xf32>
    %c0_134 = arith.constant 0 : index
    %c0_135 = arith.constant 0 : index
    %c0_136 = arith.constant 0 : index
    %134 = vector.load %arg3[%c0_134, %c0_135, %c0_136] : memref<3x64x128xf32, #tpu.memory_space<vmem>>, vector<1x64x128xf32>
    %135 = vector.shape_cast %134 : vector<1x64x128xf32> to vector<64x128xf32>
    %cst_137 = arith.constant dense<0.000000e+00> : vector<16x128xf32>
    %136 = tpu.matmul %133, %135, %cst_137 {dimension_numbers = #tpu.dot_dimension_numbers<[1], [0], [0], [1], [0, 0, 1, 1], [], []>} : vector<16x64xf32>, vector<64x128xf32>, vector<16x128xf32> -> vector<16x128xf32>
    %c1_138 = arith.constant 1 : index
    %c0_139 = arith.constant 0 : index
    %137 = vector.load %arg10[%c1_138, %c0_139] : memref<18x64xf32, #tpu.memory_space<vmem>>, vector<16x64xf32>
    %c1_140 = arith.constant 1 : index
    %c0_141 = arith.constant 0 : index
    %c0_142 = arith.constant 0 : index
    %138 = vector.load %arg3[%c1_140, %c0_141, %c0_142] : memref<3x64x128xf32, #tpu.memory_space<vmem>>, vector<1x64x128xf32>
    %139 = vector.shape_cast %138 : vector<1x64x128xf32> to vector<64x128xf32>
    %cst_143 = arith.constant dense<0.000000e+00> : vector<16x128xf32>
    %140 = tpu.matmul %137, %139, %cst_143 {dimension_numbers = #tpu.dot_dimension_numbers<[1], [0], [0], [1], [0, 0, 1, 1], [], []>} : vector<16x64xf32>, vector<64x128xf32>, vector<16x128xf32> -> vector<16x128xf32>
    %141 = arith.addf %136, %140 : vector<16x128xf32>
    %c2_144 = arith.constant 2 : index
    %c0_145 = arith.constant 0 : index
    %142 = vector.load %arg10[%c2_144, %c0_145] : memref<18x64xf32, #tpu.memory_space<vmem>>, vector<16x64xf32>
    %c2_146 = arith.constant 2 : index
    %c0_147 = arith.constant 0 : index
    %c0_148 = arith.constant 0 : index
    %143 = vector.load %arg3[%c2_146, %c0_147, %c0_148] : memref<3x64x128xf32, #tpu.memory_space<vmem>>, vector<1x64x128xf32>
    %144 = vector.shape_cast %143 : vector<1x64x128xf32> to vector<64x128xf32>
    %cst_149 = arith.constant dense<0.000000e+00> : vector<16x128xf32>
    %145 = tpu.matmul %142, %144, %cst_149 {dimension_numbers = #tpu.dot_dimension_numbers<[1], [0], [0], [1], [0, 0, 1, 1], [], []>} : vector<16x64xf32>, vector<64x128xf32>, vector<16x128xf32> -> vector<16x128xf32>
    %146 = arith.addf %141, %145 : vector<16x128xf32>
    %c3_150 = arith.constant 3 : index
    %c0_151 = arith.constant 0 : index
    %147 = vector.load %arg5[%c3_150, %c0_151] : memref<9x128xf32, #tpu.memory_space<vmem>>, vector<1x128xf32>
    %c4_152 = arith.constant 4 : index
    %c0_153 = arith.constant 0 : index
    %148 = vector.load %arg5[%c4_152, %c0_153] : memref<9x128xf32, #tpu.memory_space<vmem>>, vector<1x128xf32>
    %c5_154 = arith.constant 5 : index
    %c0_155 = arith.constant 0 : index
    %149 = vector.load %arg5[%c5_154, %c0_155] : memref<9x128xf32, #tpu.memory_space<vmem>>, vector<1x128xf32>
    %150 = vector.broadcast %147 : vector<1x128xf32> to vector<16x128xf32>
    %151 = arith.addf %146, %150 : vector<16x128xf32>
    %cst_156 = arith.constant 0.000000e+00 : f32
    %152 = vector.broadcast %cst_156 : f32 to vector<16x128xf32>
    %153 = arith.maximumf %151, %152 : vector<16x128xf32>
    %154 = vector.broadcast %148 : vector<1x128xf32> to vector<16x128xf32>
    %155 = arith.mulf %153, %154 : vector<16x128xf32>
    %156 = vector.broadcast %149 : vector<1x128xf32> to vector<16x128xf32>
    %157 = arith.addf %155, %156 : vector<16x128xf32>
    %c1_157 = arith.constant 1 : index
    %c0_158 = arith.constant 0 : index
    %158 = vector.load %arg11[%c1_157, %c0_158] : memref<18x128xf32, #tpu.memory_space<vmem>>, vector<16x128xf32>
    tpu.vector_store %arg11[%c1_157, %c0_158], %157 {strides = array<i32>} : memref<18x128xf32, #tpu.memory_space<vmem>>, vector<16x128xf32>,
    %159 = vector.extract_strided_slice %157 {offsets = [1, 0], sizes = [1, 128], strides = [1, 1]} : vector<16x128xf32> to vector<1x128xf32>
    %c0_159 = arith.constant 0 : index
    %c0_160 = arith.constant 0 : index
    %160 = vector.load %arg11[%c0_159, %c0_160] : memref<18x128xf32, #tpu.memory_space<vmem>>, vector<1x128xf32>
    tpu.vector_store %arg11[%c0_159, %c0_160], %159 {strides = array<i32>} : memref<18x128xf32, #tpu.memory_space<vmem>>, vector<1x128xf32>,
    %161 = vector.extract_strided_slice %157 {offsets = [14, 0], sizes = [1, 128], strides = [1, 1]} : vector<16x128xf32> to vector<1x128xf32>
    %c17_161 = arith.constant 17 : index
    %c0_162 = arith.constant 0 : index
    %162 = vector.load %arg11[%c17_161, %c0_162] : memref<18x128xf32, #tpu.memory_space<vmem>>, vector<1x128xf32>
    tpu.vector_store %arg11[%c17_161, %c0_162], %161 {strides = array<i32>} : memref<18x128xf32, #tpu.memory_space<vmem>>, vector<1x128xf32>,
    %c0_163 = arith.constant 0 : index
    %c0_164 = arith.constant 0 : index
    %163 = vector.load %arg11[%c0_163, %c0_164] : memref<18x128xf32, #tpu.memory_space<vmem>>, vector<16x128xf32>
    %c0_165 = arith.constant 0 : index
    %c0_166 = arith.constant 0 : index
    %c0_167 = arith.constant 0 : index
    %164 = vector.load %arg4[%c0_165, %c0_166, %c0_167] : memref<3x128x128xf32, #tpu.memory_space<vmem>>, vector<1x128x128xf32>
    %165 = vector.shape_cast %164 : vector<1x128x128xf32> to vector<128x128xf32>
    %cst_168 = arith.constant dense<0.000000e+00> : vector<16x128xf32>
    %166 = tpu.matmul %163, %165, %cst_168 {dimension_numbers = #tpu.dot_dimension_numbers<[1], [0], [0], [1], [0, 0, 1, 1], [], []>} : vector<16x128xf32>, vector<128x128xf32>, vector<16x128xf32> -> vector<16x128xf32>
    %c1_169 = arith.constant 1 : index
    %c0_170 = arith.constant 0 : index
    %167 = vector.load %arg11[%c1_169, %c0_170] : memref<18x128xf32, #tpu.memory_space<vmem>>, vector<16x128xf32>
    %c1_171 = arith.constant 1 : index
    %c0_172 = arith.constant 0 : index
    %c0_173 = arith.constant 0 : index
    %168 = vector.load %arg4[%c1_171, %c0_172, %c0_173] : memref<3x128x128xf32, #tpu.memory_space<vmem>>, vector<1x128x128xf32>
    %169 = vector.shape_cast %168 : vector<1x128x128xf32> to vector<128x128xf32>
    %cst_174 = arith.constant dense<0.000000e+00> : vector<16x128xf32>
    %170 = tpu.matmul %167, %169, %cst_174 {dimension_numbers = #tpu.dot_dimension_numbers<[1], [0], [0], [1], [0, 0, 1, 1], [], []>} : vector<16x128xf32>, vector<128x128xf32>, vector<16x128xf32> -> vector<16x128xf32>
    %171 = arith.addf %166, %170 : vector<16x128xf32>
    %c2_175 = arith.constant 2 : index
    %c0_176 = arith.constant 0 : index
    %172 = vector.load %arg11[%c2_175, %c0_176] : memref<18x128xf32, #tpu.memory_space<vmem>>, vector<16x128xf32>
    %c2_177 = arith.constant 2 : index
    %c0_178 = arith.constant 0 : index
    %c0_179 = arith.constant 0 : index
    %173 = vector.load %arg4[%c2_177, %c0_178, %c0_179] : memref<3x128x128xf32, #tpu.memory_space<vmem>>, vector<1x128x128xf32>
    %174 = vector.shape_cast %173 : vector<1x128x128xf32> to vector<128x128xf32>
    %cst_180 = arith.constant dense<0.000000e+00> : vector<16x128xf32>
    %175 = tpu.matmul %172, %174, %cst_180 {dimension_numbers = #tpu.dot_dimension_numbers<[1], [0], [0], [1], [0, 0, 1, 1], [], []>} : vector<16x128xf32>, vector<128x128xf32>, vector<16x128xf32> -> vector<16x128xf32>
    %176 = arith.addf %171, %175 : vector<16x128xf32>
    %c6_181 = arith.constant 6 : index
    %c0_182 = arith.constant 0 : index
    %177 = vector.load %arg5[%c6_181, %c0_182] : memref<9x128xf32, #tpu.memory_space<vmem>>, vector<1x128xf32>
    %c7_183 = arith.constant 7 : index
    %c0_184 = arith.constant 0 : index
    %178 = vector.load %arg5[%c7_183, %c0_184] : memref<9x128xf32, #tpu.memory_space<vmem>>, vector<1x128xf32>
    %c8_185 = arith.constant 8 : index
    %c0_186 = arith.constant 0 : index
    %179 = vector.load %arg5[%c8_185, %c0_186] : memref<9x128xf32, #tpu.memory_space<vmem>>, vector<1x128xf32>
    %180 = vector.broadcast %177 : vector<1x128xf32> to vector<16x128xf32>
    %181 = arith.addf %176, %180 : vector<16x128xf32>
    %cst_187 = arith.constant 0.000000e+00 : f32
    %182 = vector.broadcast %cst_187 : f32 to vector<16x128xf32>
    %183 = arith.maximumf %181, %182 : vector<16x128xf32>
    %184 = vector.broadcast %178 : vector<1x128xf32> to vector<16x128xf32>
    %185 = arith.mulf %183, %184 : vector<16x128xf32>
    %186 = vector.broadcast %179 : vector<1x128xf32> to vector<16x128xf32>
    %187 = arith.addf %185, %186 : vector<16x128xf32>
    %188 = vector.shape_cast %187 : vector<16x128xf32> to vector<16x1x128xf32>
    %c0_188 = arith.constant 0 : index
    %c1_189 = arith.constant 1 : index
    %c0_190 = arith.constant 0 : index
    %189 = vector.load %arg12[%c0_188, %c1_189, %c0_190] : memref<16x8x128xf32, #tpu.memory_space<vmem>>, vector<16x1x128xf32>
    tpu.vector_store %arg12[%c0_188, %c1_189, %c0_190], %188 {strides = array<i32>} : memref<16x8x128xf32, #tpu.memory_space<vmem>>, vector<16x1x128xf32>,
    %c2_191 = arith.constant 2 : index
    %c0_192 = arith.constant 0 : index
    %c0_193 = arith.constant 0 : index
    %190 = vector.load %arg1[%c2_191, %c0_192, %c0_193] : memref<4x16x16xf32, #tpu.memory_space<vmem>>, vector<1x16x16xf32>
    %191 = vector.shape_cast %190 : vector<1x16x16xf32> to vector<16x16xf32>
    %c1_194 = arith.constant 1 : index
    %c0_195 = arith.constant 0 : index
    %192 = vector.load %arg9[%c1_194, %c0_195] : memref<18x16xf32, #tpu.memory_space<vmem>>, vector<16x16xf32>
    tpu.vector_store %arg9[%c1_194, %c0_195], %191 {strides = array<i32>} : memref<18x16xf32, #tpu.memory_space<vmem>>, vector<16x16xf32>,
    %193 = vector.extract_strided_slice %191 {offsets = [1, 0], sizes = [1, 16], strides = [1, 1]} : vector<16x16xf32> to vector<1x16xf32>
    %c0_196 = arith.constant 0 : index
    %c0_197 = arith.constant 0 : index
    %194 = vector.load %arg9[%c0_196, %c0_197] : memref<18x16xf32, #tpu.memory_space<vmem>>, vector<1x16xf32>
    tpu.vector_store %arg9[%c0_196, %c0_197], %193 {strides = array<i32>} : memref<18x16xf32, #tpu.memory_space<vmem>>, vector<1x16xf32>,
    %195 = vector.extract_strided_slice %191 {offsets = [14, 0], sizes = [1, 16], strides = [1, 1]} : vector<16x16xf32> to vector<1x16xf32>
    %c17_198 = arith.constant 17 : index
    %c0_199 = arith.constant 0 : index
    %196 = vector.load %arg9[%c17_198, %c0_199] : memref<18x16xf32, #tpu.memory_space<vmem>>, vector<1x16xf32>
    tpu.vector_store %arg9[%c17_198, %c0_199], %195 {strides = array<i32>} : memref<18x16xf32, #tpu.memory_space<vmem>>, vector<1x16xf32>,
    %c0_200 = arith.constant 0 : index
    %c0_201 = arith.constant 0 : index
    %197 = vector.load %arg9[%c0_200, %c0_201] : memref<18x16xf32, #tpu.memory_space<vmem>>, vector<16x16xf32>
    %c0_202 = arith.constant 0 : index
    %c0_203 = arith.constant 0 : index
    %c0_204 = arith.constant 0 : index
    %198 = vector.load %arg2[%c0_202, %c0_203, %c0_204] : memref<3x16x64xf32, #tpu.memory_space<vmem>>, vector<1x16x64xf32>
    %199 = vector.shape_cast %198 : vector<1x16x64xf32> to vector<16x64xf32>
    %cst_205 = arith.constant dense<0.000000e+00> : vector<16x64xf32>
    %200 = tpu.matmul %197, %199, %cst_205 {dimension_numbers = #tpu.dot_dimension_numbers<[1], [0], [0], [1], [0, 0, 1, 1], [], []>} : vector<16x16xf32>, vector<16x64xf32>, vector<16x64xf32> -> vector<16x64xf32>
    %c1_206 = arith.constant 1 : index
    %c0_207 = arith.constant 0 : index
    %201 = vector.load %arg9[%c1_206, %c0_207] : memref<18x16xf32, #tpu.memory_space<vmem>>, vector<16x16xf32>
    %c1_208 = arith.constant 1 : index
    %c0_209 = arith.constant 0 : index
    %c0_210 = arith.constant 0 : index
    %202 = vector.load %arg2[%c1_208, %c0_209, %c0_210] : memref<3x16x64xf32, #tpu.memory_space<vmem>>, vector<1x16x64xf32>
    %203 = vector.shape_cast %202 : vector<1x16x64xf32> to vector<16x64xf32>
    %cst_211 = arith.constant dense<0.000000e+00> : vector<16x64xf32>
    %204 = tpu.matmul %201, %203, %cst_211 {dimension_numbers = #tpu.dot_dimension_numbers<[1], [0], [0], [1], [0, 0, 1, 1], [], []>} : vector<16x16xf32>, vector<16x64xf32>, vector<16x64xf32> -> vector<16x64xf32>
    %205 = arith.addf %200, %204 : vector<16x64xf32>
    %c2_212 = arith.constant 2 : index
    %c0_213 = arith.constant 0 : index
    %206 = vector.load %arg9[%c2_212, %c0_213] : memref<18x16xf32, #tpu.memory_space<vmem>>, vector<16x16xf32>
    %c2_214 = arith.constant 2 : index
    %c0_215 = arith.constant 0 : index
    %c0_216 = arith.constant 0 : index
    %207 = vector.load %arg2[%c2_214, %c0_215, %c0_216] : memref<3x16x64xf32, #tpu.memory_space<vmem>>, vector<1x16x64xf32>
    %208 = vector.shape_cast %207 : vector<1x16x64xf32> to vector<16x64xf32>
    %cst_217 = arith.constant dense<0.000000e+00> : vector<16x64xf32>
    %209 = tpu.matmul %206, %208, %cst_217 {dimension_numbers = #tpu.dot_dimension_numbers<[1], [0], [0], [1], [0, 0, 1, 1], [], []>} : vector<16x16xf32>, vector<16x64xf32>, vector<16x64xf32> -> vector<16x64xf32>
    %210 = arith.addf %205, %209 : vector<16x64xf32>
    %c0_218 = arith.constant 0 : index
    %c0_219 = arith.constant 0 : index
    %211 = vector.load %arg5[%c0_218, %c0_219] : memref<9x128xf32, #tpu.memory_space<vmem>>, vector<1x64xf32>
    %c1_220 = arith.constant 1 : index
    %c0_221 = arith.constant 0 : index
    %212 = vector.load %arg5[%c1_220, %c0_221] : memref<9x128xf32, #tpu.memory_space<vmem>>, vector<1x64xf32>
    %c2_222 = arith.constant 2 : index
    %c0_223 = arith.constant 0 : index
    %213 = vector.load %arg5[%c2_222, %c0_223] : memref<9x128xf32, #tpu.memory_space<vmem>>, vector<1x64xf32>
    %214 = vector.broadcast %211 : vector<1x64xf32> to vector<16x64xf32>
    %215 = arith.addf %210, %214 : vector<16x64xf32>
    %cst_224 = arith.constant 0.000000e+00 : f32
    %216 = vector.broadcast %cst_224 : f32 to vector<16x64xf32>
    %217 = arith.maximumf %215, %216 : vector<16x64xf32>
    %218 = vector.broadcast %212 : vector<1x64xf32> to vector<16x64xf32>
    %219 = arith.mulf %217, %218 : vector<16x64xf32>
    %220 = vector.broadcast %213 : vector<1x64xf32> to vector<16x64xf32>
    %221 = arith.addf %219, %220 : vector<16x64xf32>
    %c1_225 = arith.constant 1 : index
    %c0_226 = arith.constant 0 : index
    %222 = vector.load %arg10[%c1_225, %c0_226] : memref<18x64xf32, #tpu.memory_space<vmem>>, vector<16x64xf32>
    tpu.vector_store %arg10[%c1_225, %c0_226], %221 {strides = array<i32>} : memref<18x64xf32, #tpu.memory_space<vmem>>, vector<16x64xf32>,
    %223 = vector.extract_strided_slice %221 {offsets = [1, 0], sizes = [1, 64], strides = [1, 1]} : vector<16x64xf32> to vector<1x64xf32>
    %c0_227 = arith.constant 0 : index
    %c0_228 = arith.constant 0 : index
    %224 = vector.load %arg10[%c0_227, %c0_228] : memref<18x64xf32, #tpu.memory_space<vmem>>, vector<1x64xf32>
    tpu.vector_store %arg10[%c0_227, %c0_228], %223 {strides = array<i32>} : memref<18x64xf32, #tpu.memory_space<vmem>>, vector<1x64xf32>,
    %225 = vector.extract_strided_slice %221 {offsets = [14, 0], sizes = [1, 64], strides = [1, 1]} : vector<16x64xf32> to vector<1x64xf32>
    %c17_229 = arith.constant 17 : index
    %c0_230 = arith.constant 0 : index
    %226 = vector.load %arg10[%c17_229, %c0_230] : memref<18x64xf32, #tpu.memory_space<vmem>>, vector<1x64xf32>
    tpu.vector_store %arg10[%c17_229, %c0_230], %225 {strides = array<i32>} : memref<18x64xf32, #tpu.memory_space<vmem>>, vector<1x64xf32>,
    %c0_231 = arith.constant 0 : index
    %c0_232 = arith.constant 0 : index
    %227 = vector.load %arg10[%c0_231, %c0_232] : memref<18x64xf32, #tpu.memory_space<vmem>>, vector<16x64xf32>
    %c0_233 = arith.constant 0 : index
    %c0_234 = arith.constant 0 : index
    %c0_235 = arith.constant 0 : index
    %228 = vector.load %arg3[%c0_233, %c0_234, %c0_235] : memref<3x64x128xf32, #tpu.memory_space<vmem>>, vector<1x64x128xf32>
    %229 = vector.shape_cast %228 : vector<1x64x128xf32> to vector<64x128xf32>
    %cst_236 = arith.constant dense<0.000000e+00> : vector<16x128xf32>
    %230 = tpu.matmul %227, %229, %cst_236 {dimension_numbers = #tpu.dot_dimension_numbers<[1], [0], [0], [1], [0, 0, 1, 1], [], []>} : vector<16x64xf32>, vector<64x128xf32>, vector<16x128xf32> -> vector<16x128xf32>
    %c1_237 = arith.constant 1 : index
    %c0_238 = arith.constant 0 : index
    %231 = vector.load %arg10[%c1_237, %c0_238] : memref<18x64xf32, #tpu.memory_space<vmem>>, vector<16x64xf32>
    %c1_239 = arith.constant 1 : index
    %c0_240 = arith.constant 0 : index
    %c0_241 = arith.constant 0 : index
    %232 = vector.load %arg3[%c1_239, %c0_240, %c0_241] : memref<3x64x128xf32, #tpu.memory_space<vmem>>, vector<1x64x128xf32>
    %233 = vector.shape_cast %232 : vector<1x64x128xf32> to vector<64x128xf32>
    %cst_242 = arith.constant dense<0.000000e+00> : vector<16x128xf32>
    %234 = tpu.matmul %231, %233, %cst_242 {dimension_numbers = #tpu.dot_dimension_numbers<[1], [0], [0], [1], [0, 0, 1, 1], [], []>} : vector<16x64xf32>, vector<64x128xf32>, vector<16x128xf32> -> vector<16x128xf32>
    %235 = arith.addf %230, %234 : vector<16x128xf32>
    %c2_243 = arith.constant 2 : index
    %c0_244 = arith.constant 0 : index
    %236 = vector.load %arg10[%c2_243, %c0_244] : memref<18x64xf32, #tpu.memory_space<vmem>>, vector<16x64xf32>
    %c2_245 = arith.constant 2 : index
    %c0_246 = arith.constant 0 : index
    %c0_247 = arith.constant 0 : index
    %237 = vector.load %arg3[%c2_245, %c0_246, %c0_247] : memref<3x64x128xf32, #tpu.memory_space<vmem>>, vector<1x64x128xf32>
    %238 = vector.shape_cast %237 : vector<1x64x128xf32> to vector<64x128xf32>
    %cst_248 = arith.constant dense<0.000000e+00> : vector<16x128xf32>
    %239 = tpu.matmul %236, %238, %cst_248 {dimension_numbers = #tpu.dot_dimension_numbers<[1], [0], [0], [1], [0, 0, 1, 1], [], []>} : vector<16x64xf32>, vector<64x128xf32>, vector<16x128xf32> -> vector<16x128xf32>
    %240 = arith.addf %235, %239 : vector<16x128xf32>
    %c3_249 = arith.constant 3 : index
    %c0_250 = arith.constant 0 : index
    %241 = vector.load %arg5[%c3_249, %c0_250] : memref<9x128xf32, #tpu.memory_space<vmem>>, vector<1x128xf32>
    %c4_251 = arith.constant 4 : index
    %c0_252 = arith.constant 0 : index
    %242 = vector.load %arg5[%c4_251, %c0_252] : memref<9x128xf32, #tpu.memory_space<vmem>>, vector<1x128xf32>
    %c5_253 = arith.constant 5 : index
    %c0_254 = arith.constant 0 : index
    %243 = vector.load %arg5[%c5_253, %c0_254] : memref<9x128xf32, #tpu.memory_space<vmem>>, vector<1x128xf32>
    %244 = vector.broadcast %241 : vector<1x128xf32> to vector<16x128xf32>
    %245 = arith.addf %240, %244 : vector<16x128xf32>
    %cst_255 = arith.constant 0.000000e+00 : f32
    %246 = vector.broadcast %cst_255 : f32 to vector<16x128xf32>
    %247 = arith.maximumf %245, %246 : vector<16x128xf32>
    %248 = vector.broadcast %242 : vector<1x128xf32> to vector<16x128xf32>
    %249 = arith.mulf %247, %248 : vector<16x128xf32>
    %250 = vector.broadcast %243 : vector<1x128xf32> to vector<16x128xf32>
    %251 = arith.addf %249, %250 : vector<16x128xf32>
    %c1_256 = arith.constant 1 : index
    %c0_257 = arith.constant 0 : index
    %252 = vector.load %arg11[%c1_256, %c0_257] : memref<18x128xf32, #tpu.memory_space<vmem>>, vector<16x128xf32>
    tpu.vector_store %arg11[%c1_256, %c0_257], %251 {strides = array<i32>} : memref<18x128xf32, #tpu.memory_space<vmem>>, vector<16x128xf32>,
    %253 = vector.extract_strided_slice %251 {offsets = [1, 0], sizes = [1, 128], strides = [1, 1]} : vector<16x128xf32> to vector<1x128xf32>
    %c0_258 = arith.constant 0 : index
    %c0_259 = arith.constant 0 : index
    %254 = vector.load %arg11[%c0_258, %c0_259] : memref<18x128xf32, #tpu.memory_space<vmem>>, vector<1x128xf32>
    tpu.vector_store %arg11[%c0_258, %c0_259], %253 {strides = array<i32>} : memref<18x128xf32, #tpu.memory_space<vmem>>, vector<1x128xf32>,
    %255 = vector.extract_strided_slice %251 {offsets = [14, 0], sizes = [1, 128], strides = [1, 1]} : vector<16x128xf32> to vector<1x128xf32>
    %c17_260 = arith.constant 17 : index
    %c0_261 = arith.constant 0 : index
    %256 = vector.load %arg11[%c17_260, %c0_261] : memref<18x128xf32, #tpu.memory_space<vmem>>, vector<1x128xf32>
    tpu.vector_store %arg11[%c17_260, %c0_261], %255 {strides = array<i32>} : memref<18x128xf32, #tpu.memory_space<vmem>>, vector<1x128xf32>,
    %c0_262 = arith.constant 0 : index
    %c0_263 = arith.constant 0 : index
    %257 = vector.load %arg11[%c0_262, %c0_263] : memref<18x128xf32, #tpu.memory_space<vmem>>, vector<16x128xf32>
    %c0_264 = arith.constant 0 : index
    %c0_265 = arith.constant 0 : index
    %c0_266 = arith.constant 0 : index
    %258 = vector.load %arg4[%c0_264, %c0_265, %c0_266] : memref<3x128x128xf32, #tpu.memory_space<vmem>>, vector<1x128x128xf32>
    %259 = vector.shape_cast %258 : vector<1x128x128xf32> to vector<128x128xf32>
    %cst_267 = arith.constant dense<0.000000e+00> : vector<16x128xf32>
    %260 = tpu.matmul %257, %259, %cst_267 {dimension_numbers = #tpu.dot_dimension_numbers<[1], [0], [0], [1], [0, 0, 1, 1], [], []>} : vector<16x128xf32>, vector<128x128xf32>, vector<16x128xf32> -> vector<16x128xf32>
    %c1_268 = arith.constant 1 : index
    %c0_269 = arith.constant 0 : index
    %261 = vector.load %arg11[%c1_268, %c0_269] : memref<18x128xf32, #tpu.memory_space<vmem>>, vector<16x128xf32>
    %c1_270 = arith.constant 1 : index
    %c0_271 = arith.constant 0 : index
    %c0_272 = arith.constant 0 : index
    %262 = vector.load %arg4[%c1_270, %c0_271, %c0_272] : memref<3x128x128xf32, #tpu.memory_space<vmem>>, vector<1x128x128xf32>
    %263 = vector.shape_cast %262 : vector<1x128x128xf32> to vector<128x128xf32>
    %cst_273 = arith.constant dense<0.000000e+00> : vector<16x128xf32>
    %264 = tpu.matmul %261, %263, %cst_273 {dimension_numbers = #tpu.dot_dimension_numbers<[1], [0], [0], [1], [0, 0, 1, 1], [], []>} : vector<16x128xf32>, vector<128x128xf32>, vector<16x128xf32> -> vector<16x128xf32>
    %265 = arith.addf %260, %264 : vector<16x128xf32>
    %c2_274 = arith.constant 2 : index
    %c0_275 = arith.constant 0 : index
    %266 = vector.load %arg11[%c2_274, %c0_275] : memref<18x128xf32, #tpu.memory_space<vmem>>, vector<16x128xf32>
    %c2_276 = arith.constant 2 : index
    %c0_277 = arith.constant 0 : index
    %c0_278 = arith.constant 0 : index
    %267 = vector.load %arg4[%c2_276, %c0_277, %c0_278] : memref<3x128x128xf32, #tpu.memory_space<vmem>>, vector<1x128x128xf32>
    %268 = vector.shape_cast %267 : vector<1x128x128xf32> to vector<128x128xf32>
    %cst_279 = arith.constant dense<0.000000e+00> : vector<16x128xf32>
    %269 = tpu.matmul %266, %268, %cst_279 {dimension_numbers = #tpu.dot_dimension_numbers<[1], [0], [0], [1], [0, 0, 1, 1], [], []>} : vector<16x128xf32>, vector<128x128xf32>, vector<16x128xf32> -> vector<16x128xf32>
    %270 = arith.addf %265, %269 : vector<16x128xf32>
    %c6_280 = arith.constant 6 : index
    %c0_281 = arith.constant 0 : index
    %271 = vector.load %arg5[%c6_280, %c0_281] : memref<9x128xf32, #tpu.memory_space<vmem>>, vector<1x128xf32>
    %c7_282 = arith.constant 7 : index
    %c0_283 = arith.constant 0 : index
    %272 = vector.load %arg5[%c7_282, %c0_283] : memref<9x128xf32, #tpu.memory_space<vmem>>, vector<1x128xf32>
    %c8_284 = arith.constant 8 : index
    %c0_285 = arith.constant 0 : index
    %273 = vector.load %arg5[%c8_284, %c0_285] : memref<9x128xf32, #tpu.memory_space<vmem>>, vector<1x128xf32>
    %274 = vector.broadcast %271 : vector<1x128xf32> to vector<16x128xf32>
    %275 = arith.addf %270, %274 : vector<16x128xf32>
    %cst_286 = arith.constant 0.000000e+00 : f32
    %276 = vector.broadcast %cst_286 : f32 to vector<16x128xf32>
    %277 = arith.maximumf %275, %276 : vector<16x128xf32>
    %278 = vector.broadcast %272 : vector<1x128xf32> to vector<16x128xf32>
    %279 = arith.mulf %277, %278 : vector<16x128xf32>
    %280 = vector.broadcast %273 : vector<1x128xf32> to vector<16x128xf32>
    %281 = arith.addf %279, %280 : vector<16x128xf32>
    %282 = vector.shape_cast %281 : vector<16x128xf32> to vector<16x1x128xf32>
    %c0_287 = arith.constant 0 : index
    %c2_288 = arith.constant 2 : index
    %c0_289 = arith.constant 0 : index
    %283 = vector.load %arg12[%c0_287, %c2_288, %c0_289] : memref<16x8x128xf32, #tpu.memory_space<vmem>>, vector<16x1x128xf32>
    tpu.vector_store %arg12[%c0_287, %c2_288, %c0_289], %282 {strides = array<i32>} : memref<16x8x128xf32, #tpu.memory_space<vmem>>, vector<16x1x128xf32>,
    %c3_290 = arith.constant 3 : index
    %c0_291 = arith.constant 0 : index
    %c0_292 = arith.constant 0 : index
    %284 = vector.load %arg1[%c3_290, %c0_291, %c0_292] : memref<4x16x16xf32, #tpu.memory_space<vmem>>, vector<1x16x16xf32>
    %285 = vector.shape_cast %284 : vector<1x16x16xf32> to vector<16x16xf32>
    %c1_293 = arith.constant 1 : index
    %c0_294 = arith.constant 0 : index
    %286 = vector.load %arg9[%c1_293, %c0_294] : memref<18x16xf32, #tpu.memory_space<vmem>>, vector<16x16xf32>
    tpu.vector_store %arg9[%c1_293, %c0_294], %285 {strides = array<i32>} : memref<18x16xf32, #tpu.memory_space<vmem>>, vector<16x16xf32>,
    %287 = vector.extract_strided_slice %285 {offsets = [1, 0], sizes = [1, 16], strides = [1, 1]} : vector<16x16xf32> to vector<1x16xf32>
    %c0_295 = arith.constant 0 : index
    %c0_296 = arith.constant 0 : index
    %288 = vector.load %arg9[%c0_295, %c0_296] : memref<18x16xf32, #tpu.memory_space<vmem>>, vector<1x16xf32>
    tpu.vector_store %arg9[%c0_295, %c0_296], %287 {strides = array<i32>} : memref<18x16xf32, #tpu.memory_space<vmem>>, vector<1x16xf32>,
    %289 = vector.extract_strided_slice %285 {offsets = [14, 0], sizes = [1, 16], strides = [1, 1]} : vector<16x16xf32> to vector<1x16xf32>
    %c17_297 = arith.constant 17 : index
    %c0_298 = arith.constant 0 : index
    %290 = vector.load %arg9[%c17_297, %c0_298] : memref<18x16xf32, #tpu.memory_space<vmem>>, vector<1x16xf32>
    tpu.vector_store %arg9[%c17_297, %c0_298], %289 {strides = array<i32>} : memref<18x16xf32, #tpu.memory_space<vmem>>, vector<1x16xf32>,
    %c0_299 = arith.constant 0 : index
    %c0_300 = arith.constant 0 : index
    %291 = vector.load %arg9[%c0_299, %c0_300] : memref<18x16xf32, #tpu.memory_space<vmem>>, vector<16x16xf32>
    %c0_301 = arith.constant 0 : index
    %c0_302 = arith.constant 0 : index
    %c0_303 = arith.constant 0 : index
    %292 = vector.load %arg2[%c0_301, %c0_302, %c0_303] : memref<3x16x64xf32, #tpu.memory_space<vmem>>, vector<1x16x64xf32>
    %293 = vector.shape_cast %292 : vector<1x16x64xf32> to vector<16x64xf32>
    %cst_304 = arith.constant dense<0.000000e+00> : vector<16x64xf32>
    %294 = tpu.matmul %291, %293, %cst_304 {dimension_numbers = #tpu.dot_dimension_numbers<[1], [0], [0], [1], [0, 0, 1, 1], [], []>} : vector<16x16xf32>, vector<16x64xf32>, vector<16x64xf32> -> vector<16x64xf32>
    %c1_305 = arith.constant 1 : index
    %c0_306 = arith.constant 0 : index
    %295 = vector.load %arg9[%c1_305, %c0_306] : memref<18x16xf32, #tpu.memory_space<vmem>>, vector<16x16xf32>
    %c1_307 = arith.constant 1 : index
    %c0_308 = arith.constant 0 : index
    %c0_309 = arith.constant 0 : index
    %296 = vector.load %arg2[%c1_307, %c0_308, %c0_309] : memref<3x16x64xf32, #tpu.memory_space<vmem>>, vector<1x16x64xf32>
    %297 = vector.shape_cast %296 : vector<1x16x64xf32> to vector<16x64xf32>
    %cst_310 = arith.constant dense<0.000000e+00> : vector<16x64xf32>
    %298 = tpu.matmul %295, %297, %cst_310 {dimension_numbers = #tpu.dot_dimension_numbers<[1], [0], [0], [1], [0, 0, 1, 1], [], []>} : vector<16x16xf32>, vector<16x64xf32>, vector<16x64xf32> -> vector<16x64xf32>
    %299 = arith.addf %294, %298 : vector<16x64xf32>
    %c2_311 = arith.constant 2 : index
    %c0_312 = arith.constant 0 : index
    %300 = vector.load %arg9[%c2_311, %c0_312] : memref<18x16xf32, #tpu.memory_space<vmem>>, vector<16x16xf32>
    %c2_313 = arith.constant 2 : index
    %c0_314 = arith.constant 0 : index
    %c0_315 = arith.constant 0 : index
    %301 = vector.load %arg2[%c2_313, %c0_314, %c0_315] : memref<3x16x64xf32, #tpu.memory_space<vmem>>, vector<1x16x64xf32>
    %302 = vector.shape_cast %301 : vector<1x16x64xf32> to vector<16x64xf32>
    %cst_316 = arith.constant dense<0.000000e+00> : vector<16x64xf32>
    %303 = tpu.matmul %300, %302, %cst_316 {dimension_numbers = #tpu.dot_dimension_numbers<[1], [0], [0], [1], [0, 0, 1, 1], [], []>} : vector<16x16xf32>, vector<16x64xf32>, vector<16x64xf32> -> vector<16x64xf32>
    %304 = arith.addf %299, %303 : vector<16x64xf32>
    %c0_317 = arith.constant 0 : index
    %c0_318 = arith.constant 0 : index
    %305 = vector.load %arg5[%c0_317, %c0_318] : memref<9x128xf32, #tpu.memory_space<vmem>>, vector<1x64xf32>
    %c1_319 = arith.constant 1 : index
    %c0_320 = arith.constant 0 : index
    %306 = vector.load %arg5[%c1_319, %c0_320] : memref<9x128xf32, #tpu.memory_space<vmem>>, vector<1x64xf32>
    %c2_321 = arith.constant 2 : index
    %c0_322 = arith.constant 0 : index
    %307 = vector.load %arg5[%c2_321, %c0_322] : memref<9x128xf32, #tpu.memory_space<vmem>>, vector<1x64xf32>
    %308 = vector.broadcast %305 : vector<1x64xf32> to vector<16x64xf32>
    %309 = arith.addf %304, %308 : vector<16x64xf32>
    %cst_323 = arith.constant 0.000000e+00 : f32
    %310 = vector.broadcast %cst_323 : f32 to vector<16x64xf32>
    %311 = arith.maximumf %309, %310 : vector<16x64xf32>
    %312 = vector.broadcast %306 : vector<1x64xf32> to vector<16x64xf32>
    %313 = arith.mulf %311, %312 : vector<16x64xf32>
    %314 = vector.broadcast %307 : vector<1x64xf32> to vector<16x64xf32>
    %315 = arith.addf %313, %314 : vector<16x64xf32>
    %c1_324 = arith.constant 1 : index
    %c0_325 = arith.constant 0 : index
    %316 = vector.load %arg10[%c1_324, %c0_325] : memref<18x64xf32, #tpu.memory_space<vmem>>, vector<16x64xf32>
    tpu.vector_store %arg10[%c1_324, %c0_325], %315 {strides = array<i32>} : memref<18x64xf32, #tpu.memory_space<vmem>>, vector<16x64xf32>,
    %317 = vector.extract_strided_slice %315 {offsets = [1, 0], sizes = [1, 64], strides = [1, 1]} : vector<16x64xf32> to vector<1x64xf32>
    %c0_326 = arith.constant 0 : index
    %c0_327 = arith.constant 0 : index
    %318 = vector.load %arg10[%c0_326, %c0_327] : memref<18x64xf32, #tpu.memory_space<vmem>>, vector<1x64xf32>
    tpu.vector_store %arg10[%c0_326, %c0_327], %317 {strides = array<i32>} : memref<18x64xf32, #tpu.memory_space<vmem>>, vector<1x64xf32>,
    %319 = vector.extract_strided_slice %315 {offsets = [14, 0], sizes = [1, 64], strides = [1, 1]} : vector<16x64xf32> to vector<1x64xf32>
    %c17_328 = arith.constant 17 : index
    %c0_329 = arith.constant 0 : index
    %320 = vector.load %arg10[%c17_328, %c0_329] : memref<18x64xf32, #tpu.memory_space<vmem>>, vector<1x64xf32>
    tpu.vector_store %arg10[%c17_328, %c0_329], %319 {strides = array<i32>} : memref<18x64xf32, #tpu.memory_space<vmem>>, vector<1x64xf32>,
    %c0_330 = arith.constant 0 : index
    %c0_331 = arith.constant 0 : index
    %321 = vector.load %arg10[%c0_330, %c0_331] : memref<18x64xf32, #tpu.memory_space<vmem>>, vector<16x64xf32>
    %c0_332 = arith.constant 0 : index
    %c0_333 = arith.constant 0 : index
    %c0_334 = arith.constant 0 : index
    %322 = vector.load %arg3[%c0_332, %c0_333, %c0_334] : memref<3x64x128xf32, #tpu.memory_space<vmem>>, vector<1x64x128xf32>
    %323 = vector.shape_cast %322 : vector<1x64x128xf32> to vector<64x128xf32>
    %cst_335 = arith.constant dense<0.000000e+00> : vector<16x128xf32>
    %324 = tpu.matmul %321, %323, %cst_335 {dimension_numbers = #tpu.dot_dimension_numbers<[1], [0], [0], [1], [0, 0, 1, 1], [], []>} : vector<16x64xf32>, vector<64x128xf32>, vector<16x128xf32> -> vector<16x128xf32>
    %c1_336 = arith.constant 1 : index
    %c0_337 = arith.constant 0 : index
    %325 = vector.load %arg10[%c1_336, %c0_337] : memref<18x64xf32, #tpu.memory_space<vmem>>, vector<16x64xf32>
    %c1_338 = arith.constant 1 : index
    %c0_339 = arith.constant 0 : index
    %c0_340 = arith.constant 0 : index
    %326 = vector.load %arg3[%c1_338, %c0_339, %c0_340] : memref<3x64x128xf32, #tpu.memory_space<vmem>>, vector<1x64x128xf32>
    %327 = vector.shape_cast %326 : vector<1x64x128xf32> to vector<64x128xf32>
    %cst_341 = arith.constant dense<0.000000e+00> : vector<16x128xf32>
    %328 = tpu.matmul %325, %327, %cst_341 {dimension_numbers = #tpu.dot_dimension_numbers<[1], [0], [0], [1], [0, 0, 1, 1], [], []>} : vector<16x64xf32>, vector<64x128xf32>, vector<16x128xf32> -> vector<16x128xf32>
    %329 = arith.addf %324, %328 : vector<16x128xf32>
    %c2_342 = arith.constant 2 : index
    %c0_343 = arith.constant 0 : index
    %330 = vector.load %arg10[%c2_342, %c0_343] : memref<18x64xf32, #tpu.memory_space<vmem>>, vector<16x64xf32>
    %c2_344 = arith.constant 2 : index
    %c0_345 = arith.constant 0 : index
    %c0_346 = arith.constant 0 : index
    %331 = vector.load %arg3[%c2_344, %c0_345, %c0_346] : memref<3x64x128xf32, #tpu.memory_space<vmem>>, vector<1x64x128xf32>
    %332 = vector.shape_cast %331 : vector<1x64x128xf32> to vector<64x128xf32>
    %cst_347 = arith.constant dense<0.000000e+00> : vector<16x128xf32>
    %333 = tpu.matmul %330, %332, %cst_347 {dimension_numbers = #tpu.dot_dimension_numbers<[1], [0], [0], [1], [0, 0, 1, 1], [], []>} : vector<16x64xf32>, vector<64x128xf32>, vector<16x128xf32> -> vector<16x128xf32>
    %334 = arith.addf %329, %333 : vector<16x128xf32>
    %c3_348 = arith.constant 3 : index
    %c0_349 = arith.constant 0 : index
    %335 = vector.load %arg5[%c3_348, %c0_349] : memref<9x128xf32, #tpu.memory_space<vmem>>, vector<1x128xf32>
    %c4_350 = arith.constant 4 : index
    %c0_351 = arith.constant 0 : index
    %336 = vector.load %arg5[%c4_350, %c0_351] : memref<9x128xf32, #tpu.memory_space<vmem>>, vector<1x128xf32>
    %c5_352 = arith.constant 5 : index
    %c0_353 = arith.constant 0 : index
    %337 = vector.load %arg5[%c5_352, %c0_353] : memref<9x128xf32, #tpu.memory_space<vmem>>, vector<1x128xf32>
    %338 = vector.broadcast %335 : vector<1x128xf32> to vector<16x128xf32>
    %339 = arith.addf %334, %338 : vector<16x128xf32>
    %cst_354 = arith.constant 0.000000e+00 : f32
    %340 = vector.broadcast %cst_354 : f32 to vector<16x128xf32>
    %341 = arith.maximumf %339, %340 : vector<16x128xf32>
    %342 = vector.broadcast %336 : vector<1x128xf32> to vector<16x128xf32>
    %343 = arith.mulf %341, %342 : vector<16x128xf32>
    %344 = vector.broadcast %337 : vector<1x128xf32> to vector<16x128xf32>
    %345 = arith.addf %343, %344 : vector<16x128xf32>
    %c1_355 = arith.constant 1 : index
    %c0_356 = arith.constant 0 : index
    %346 = vector.load %arg11[%c1_355, %c0_356] : memref<18x128xf32, #tpu.memory_space<vmem>>, vector<16x128xf32>
    tpu.vector_store %arg11[%c1_355, %c0_356], %345 {strides = array<i32>} : memref<18x128xf32, #tpu.memory_space<vmem>>, vector<16x128xf32>,
    %347 = vector.extract_strided_slice %345 {offsets = [1, 0], sizes = [1, 128], strides = [1, 1]} : vector<16x128xf32> to vector<1x128xf32>
    %c0_357 = arith.constant 0 : index
    %c0_358 = arith.constant 0 : index
    %348 = vector.load %arg11[%c0_357, %c0_358] : memref<18x128xf32, #tpu.memory_space<vmem>>, vector<1x128xf32>
    tpu.vector_store %arg11[%c0_357, %c0_358], %347 {strides = array<i32>} : memref<18x128xf32, #tpu.memory_space<vmem>>, vector<1x128xf32>,
    %349 = vector.extract_strided_slice %345 {offsets = [14, 0], sizes = [1, 128], strides = [1, 1]} : vector<16x128xf32> to vector<1x128xf32>
    %c17_359 = arith.constant 17 : index
    %c0_360 = arith.constant 0 : index
    %350 = vector.load %arg11[%c17_359, %c0_360] : memref<18x128xf32, #tpu.memory_space<vmem>>, vector<1x128xf32>
    tpu.vector_store %arg11[%c17_359, %c0_360], %349 {strides = array<i32>} : memref<18x128xf32, #tpu.memory_space<vmem>>, vector<1x128xf32>,
    %c0_361 = arith.constant 0 : index
    %c0_362 = arith.constant 0 : index
    %351 = vector.load %arg11[%c0_361, %c0_362] : memref<18x128xf32, #tpu.memory_space<vmem>>, vector<16x128xf32>
    %c0_363 = arith.constant 0 : index
    %c0_364 = arith.constant 0 : index
    %c0_365 = arith.constant 0 : index
    %352 = vector.load %arg4[%c0_363, %c0_364, %c0_365] : memref<3x128x128xf32, #tpu.memory_space<vmem>>, vector<1x128x128xf32>
    %353 = vector.shape_cast %352 : vector<1x128x128xf32> to vector<128x128xf32>
    %cst_366 = arith.constant dense<0.000000e+00> : vector<16x128xf32>
    %354 = tpu.matmul %351, %353, %cst_366 {dimension_numbers = #tpu.dot_dimension_numbers<[1], [0], [0], [1], [0, 0, 1, 1], [], []>} : vector<16x128xf32>, vector<128x128xf32>, vector<16x128xf32> -> vector<16x128xf32>
    %c1_367 = arith.constant 1 : index
    %c0_368 = arith.constant 0 : index
    %355 = vector.load %arg11[%c1_367, %c0_368] : memref<18x128xf32, #tpu.memory_space<vmem>>, vector<16x128xf32>
    %c1_369 = arith.constant 1 : index
    %c0_370 = arith.constant 0 : index
    %c0_371 = arith.constant 0 : index
    %356 = vector.load %arg4[%c1_369, %c0_370, %c0_371] : memref<3x128x128xf32, #tpu.memory_space<vmem>>, vector<1x128x128xf32>
    %357 = vector.shape_cast %356 : vector<1x128x128xf32> to vector<128x128xf32>
    %cst_372 = arith.constant dense<0.000000e+00> : vector<16x128xf32>
    %358 = tpu.matmul %355, %357, %cst_372 {dimension_numbers = #tpu.dot_dimension_numbers<[1], [0], [0], [1], [0, 0, 1, 1], [], []>} : vector<16x128xf32>, vector<128x128xf32>, vector<16x128xf32> -> vector<16x128xf32>
    %359 = arith.addf %354, %358 : vector<16x128xf32>
    %c2_373 = arith.constant 2 : index
    %c0_374 = arith.constant 0 : index
    %360 = vector.load %arg11[%c2_373, %c0_374] : memref<18x128xf32, #tpu.memory_space<vmem>>, vector<16x128xf32>
    %c2_375 = arith.constant 2 : index
    %c0_376 = arith.constant 0 : index
    %c0_377 = arith.constant 0 : index
    %361 = vector.load %arg4[%c2_375, %c0_376, %c0_377] : memref<3x128x128xf32, #tpu.memory_space<vmem>>, vector<1x128x128xf32>
    %362 = vector.shape_cast %361 : vector<1x128x128xf32> to vector<128x128xf32>
    %cst_378 = arith.constant dense<0.000000e+00> : vector<16x128xf32>
    %363 = tpu.matmul %360, %362, %cst_378 {dimension_numbers = #tpu.dot_dimension_numbers<[1], [0], [0], [1], [0, 0, 1, 1], [], []>} : vector<16x128xf32>, vector<128x128xf32>, vector<16x128xf32> -> vector<16x128xf32>
    %364 = arith.addf %359, %363 : vector<16x128xf32>
    %c6_379 = arith.constant 6 : index
    %c0_380 = arith.constant 0 : index
    %365 = vector.load %arg5[%c6_379, %c0_380] : memref<9x128xf32, #tpu.memory_space<vmem>>, vector<1x128xf32>
    %c7_381 = arith.constant 7 : index
    %c0_382 = arith.constant 0 : index
    %366 = vector.load %arg5[%c7_381, %c0_382] : memref<9x128xf32, #tpu.memory_space<vmem>>, vector<1x128xf32>
    %c8_383 = arith.constant 8 : index
    %c0_384 = arith.constant 0 : index
    %367 = vector.load %arg5[%c8_383, %c0_384] : memref<9x128xf32, #tpu.memory_space<vmem>>, vector<1x128xf32>
    %368 = vector.broadcast %365 : vector<1x128xf32> to vector<16x128xf32>
    %369 = arith.addf %364, %368 : vector<16x128xf32>
    %cst_385 = arith.constant 0.000000e+00 : f32
    %370 = vector.broadcast %cst_385 : f32 to vector<16x128xf32>
    %371 = arith.maximumf %369, %370 : vector<16x128xf32>
    %372 = vector.broadcast %366 : vector<1x128xf32> to vector<16x128xf32>
    %373 = arith.mulf %371, %372 : vector<16x128xf32>
    %374 = vector.broadcast %367 : vector<1x128xf32> to vector<16x128xf32>
    %375 = arith.addf %373, %374 : vector<16x128xf32>
    %376 = vector.shape_cast %375 : vector<16x128xf32> to vector<16x1x128xf32>
    %c0_386 = arith.constant 0 : index
    %c3_387 = arith.constant 3 : index
    %c0_388 = arith.constant 0 : index
    %377 = vector.load %arg12[%c0_386, %c3_387, %c0_388] : memref<16x8x128xf32, #tpu.memory_space<vmem>>, vector<16x1x128xf32>
    tpu.vector_store %arg12[%c0_386, %c3_387, %c0_388], %376 {strides = array<i32>} : memref<16x8x128xf32, #tpu.memory_space<vmem>>, vector<16x1x128xf32>,
    %cst_389 = arith.constant 0.000000e+00 : f32
    %378 = vector.broadcast %cst_389 : f32 to vector<8x256xf32>
    %c0_390 = arith.constant 0 : index
    %c0_391 = arith.constant 0 : index
    %c0_392 = arith.constant 0 : index
    %379 = vector.load %arg12[%c0_390, %c0_391, %c0_392] : memref<16x8x128xf32, #tpu.memory_space<vmem>>, vector<1x8x128xf32>
    %380 = vector.shape_cast %379 : vector<1x8x128xf32> to vector<8x128xf32>
    %381 = arith.truncf %380 : vector<8x128xf32> to vector<8x128xbf16>
    %c0_393 = arith.constant 0 : index
    %c0_394 = arith.constant 0 : index
    %c0_395 = arith.constant 0 : index
    %382 = vector.load %arg6[%c0_393, %c0_394, %c0_395] : memref<16x128x256xbf16, #tpu.memory_space<vmem>>, vector<1x128x256xbf16>
    %383 = vector.shape_cast %382 : vector<1x128x256xbf16> to vector<128x256xbf16>
    %cst_396 = arith.constant dense<0.000000e+00> : vector<8x256xf32>
    %384 = tpu.matmul %381, %383, %cst_396 {dimension_numbers = #tpu.dot_dimension_numbers<[1], [0], [0], [1], [0, 0, 1, 1], [], []>} : vector<8x128xbf16>, vector<128x256xbf16>, vector<8x256xf32> -> vector<8x256xf32>
    %385 = arith.addf %378, %384 : vector<8x256xf32>
    %c1_397 = arith.constant 1 : index
    %c0_398 = arith.constant 0 : index
    %c0_399 = arith.constant 0 : index
    %386 = vector.load %arg12[%c1_397, %c0_398, %c0_399] : memref<16x8x128xf32, #tpu.memory_space<vmem>>, vector<1x8x128xf32>
    %387 = vector.shape_cast %386 : vector<1x8x128xf32> to vector<8x128xf32>
    %388 = arith.truncf %387 : vector<8x128xf32> to vector<8x128xbf16>
    %c1_400 = arith.constant 1 : index
    %c0_401 = arith.constant 0 : index
    %c0_402 = arith.constant 0 : index
    %389 = vector.load %arg6[%c1_400, %c0_401, %c0_402] : memref<16x128x256xbf16, #tpu.memory_space<vmem>>, vector<1x128x256xbf16>
    %390 = vector.shape_cast %389 : vector<1x128x256xbf16> to vector<128x256xbf16>
    %cst_403 = arith.constant dense<0.000000e+00> : vector<8x256xf32>
    %391 = tpu.matmul %388, %390, %cst_403 {dimension_numbers = #tpu.dot_dimension_numbers<[1], [0], [0], [1], [0, 0, 1, 1], [], []>} : vector<8x128xbf16>, vector<128x256xbf16>, vector<8x256xf32> -> vector<8x256xf32>
    %392 = arith.addf %385, %391 : vector<8x256xf32>
    %c2_404 = arith.constant 2 : index
    %c0_405 = arith.constant 0 : index
    %c0_406 = arith.constant 0 : index
    %393 = vector.load %arg12[%c2_404, %c0_405, %c0_406] : memref<16x8x128xf32, #tpu.memory_space<vmem>>, vector<1x8x128xf32>
    %394 = vector.shape_cast %393 : vector<1x8x128xf32> to vector<8x128xf32>
    %395 = arith.truncf %394 : vector<8x128xf32> to vector<8x128xbf16>
    %c2_407 = arith.constant 2 : index
    %c0_408 = arith.constant 0 : index
    %c0_409 = arith.constant 0 : index
    %396 = vector.load %arg6[%c2_407, %c0_408, %c0_409] : memref<16x128x256xbf16, #tpu.memory_space<vmem>>, vector<1x128x256xbf16>
    %397 = vector.shape_cast %396 : vector<1x128x256xbf16> to vector<128x256xbf16>
    %cst_410 = arith.constant dense<0.000000e+00> : vector<8x256xf32>
    %398 = tpu.matmul %395, %397, %cst_410 {dimension_numbers = #tpu.dot_dimension_numbers<[1], [0], [0], [1], [0, 0, 1, 1], [], []>} : vector<8x128xbf16>, vector<128x256xbf16>, vector<8x256xf32> -> vector<8x256xf32>
    %399 = arith.addf %392, %398 : vector<8x256xf32>
    %c3_411 = arith.constant 3 : index
    %c0_412 = arith.constant 0 : index
    %c0_413 = arith.constant 0 : index
    %400 = vector.load %arg12[%c3_411, %c0_412, %c0_413] : memref<16x8x128xf32, #tpu.memory_space<vmem>>, vector<1x8x128xf32>
    %401 = vector.shape_cast %400 : vector<1x8x128xf32> to vector<8x128xf32>
    %402 = arith.truncf %401 : vector<8x128xf32> to vector<8x128xbf16>
    %c3_414 = arith.constant 3 : index
    %c0_415 = arith.constant 0 : index
    %c0_416 = arith.constant 0 : index
    %403 = vector.load %arg6[%c3_414, %c0_415, %c0_416] : memref<16x128x256xbf16, #tpu.memory_space<vmem>>, vector<1x128x256xbf16>
    %404 = vector.shape_cast %403 : vector<1x128x256xbf16> to vector<128x256xbf16>
    %cst_417 = arith.constant dense<0.000000e+00> : vector<8x256xf32>
    %405 = tpu.matmul %402, %404, %cst_417 {dimension_numbers = #tpu.dot_dimension_numbers<[1], [0], [0], [1], [0, 0, 1, 1], [], []>} : vector<8x128xbf16>, vector<128x256xbf16>, vector<8x256xf32> -> vector<8x256xf32>
    %406 = arith.addf %399, %405 : vector<8x256xf32>
    %c4_418 = arith.constant 4 : index
    %c0_419 = arith.constant 0 : index
    %c0_420 = arith.constant 0 : index
    %407 = vector.load %arg12[%c4_418, %c0_419, %c0_420] : memref<16x8x128xf32, #tpu.memory_space<vmem>>, vector<1x8x128xf32>
    %408 = vector.shape_cast %407 : vector<1x8x128xf32> to vector<8x128xf32>
    %409 = arith.truncf %408 : vector<8x128xf32> to vector<8x128xbf16>
    %c4_421 = arith.constant 4 : index
    %c0_422 = arith.constant 0 : index
    %c0_423 = arith.constant 0 : index
    %410 = vector.load %arg6[%c4_421, %c0_422, %c0_423] : memref<16x128x256xbf16, #tpu.memory_space<vmem>>, vector<1x128x256xbf16>
    %411 = vector.shape_cast %410 : vector<1x128x256xbf16> to vector<128x256xbf16>
    %cst_424 = arith.constant dense<0.000000e+00> : vector<8x256xf32>
    %412 = tpu.matmul %409, %411, %cst_424 {dimension_numbers = #tpu.dot_dimension_numbers<[1], [0], [0], [1], [0, 0, 1, 1], [], []>} : vector<8x128xbf16>, vector<128x256xbf16>, vector<8x256xf32> -> vector<8x256xf32>
    %413 = arith.addf %406, %412 : vector<8x256xf32>
    %c5_425 = arith.constant 5 : index
    %c0_426 = arith.constant 0 : index
    %c0_427 = arith.constant 0 : index
    %414 = vector.load %arg12[%c5_425, %c0_426, %c0_427] : memref<16x8x128xf32, #tpu.memory_space<vmem>>, vector<1x8x128xf32>
    %415 = vector.shape_cast %414 : vector<1x8x128xf32> to vector<8x128xf32>
    %416 = arith.truncf %415 : vector<8x128xf32> to vector<8x128xbf16>
    %c5_428 = arith.constant 5 : index
    %c0_429 = arith.constant 0 : index
    %c0_430 = arith.constant 0 : index
    %417 = vector.load %arg6[%c5_428, %c0_429, %c0_430] : memref<16x128x256xbf16, #tpu.memory_space<vmem>>, vector<1x128x256xbf16>
    %418 = vector.shape_cast %417 : vector<1x128x256xbf16> to vector<128x256xbf16>
    %cst_431 = arith.constant dense<0.000000e+00> : vector<8x256xf32>
    %419 = tpu.matmul %416, %418, %cst_431 {dimension_numbers = #tpu.dot_dimension_numbers<[1], [0], [0], [1], [0, 0, 1, 1], [], []>} : vector<8x128xbf16>, vector<128x256xbf16>, vector<8x256xf32> -> vector<8x256xf32>
    %420 = arith.addf %413, %419 : vector<8x256xf32>
    %c6_432 = arith.constant 6 : index
    %c0_433 = arith.constant 0 : index
    %c0_434 = arith.constant 0 : index
    %421 = vector.load %arg12[%c6_432, %c0_433, %c0_434] : memref<16x8x128xf32, #tpu.memory_space<vmem>>, vector<1x8x128xf32>
    %422 = vector.shape_cast %421 : vector<1x8x128xf32> to vector<8x128xf32>
    %423 = arith.truncf %422 : vector<8x128xf32> to vector<8x128xbf16>
    %c6_435 = arith.constant 6 : index
    %c0_436 = arith.constant 0 : index
    %c0_437 = arith.constant 0 : index
    %424 = vector.load %arg6[%c6_435, %c0_436, %c0_437] : memref<16x128x256xbf16, #tpu.memory_space<vmem>>, vector<1x128x256xbf16>
    %425 = vector.shape_cast %424 : vector<1x128x256xbf16> to vector<128x256xbf16>
    %cst_438 = arith.constant dense<0.000000e+00> : vector<8x256xf32>
    %426 = tpu.matmul %423, %425, %cst_438 {dimension_numbers = #tpu.dot_dimension_numbers<[1], [0], [0], [1], [0, 0, 1, 1], [], []>} : vector<8x128xbf16>, vector<128x256xbf16>, vector<8x256xf32> -> vector<8x256xf32>
    %427 = arith.addf %420, %426 : vector<8x256xf32>
    %c7_439 = arith.constant 7 : index
    %c0_440 = arith.constant 0 : index
    %c0_441 = arith.constant 0 : index
    %428 = vector.load %arg12[%c7_439, %c0_440, %c0_441] : memref<16x8x128xf32, #tpu.memory_space<vmem>>, vector<1x8x128xf32>
    %429 = vector.shape_cast %428 : vector<1x8x128xf32> to vector<8x128xf32>
    %430 = arith.truncf %429 : vector<8x128xf32> to vector<8x128xbf16>
    %c7_442 = arith.constant 7 : index
    %c0_443 = arith.constant 0 : index
    %c0_444 = arith.constant 0 : index
    %431 = vector.load %arg6[%c7_442, %c0_443, %c0_444] : memref<16x128x256xbf16, #tpu.memory_space<vmem>>, vector<1x128x256xbf16>
    %432 = vector.shape_cast %431 : vector<1x128x256xbf16> to vector<128x256xbf16>
    %cst_445 = arith.constant dense<0.000000e+00> : vector<8x256xf32>
    %433 = tpu.matmul %430, %432, %cst_445 {dimension_numbers = #tpu.dot_dimension_numbers<[1], [0], [0], [1], [0, 0, 1, 1], [], []>} : vector<8x128xbf16>, vector<128x256xbf16>, vector<8x256xf32> -> vector<8x256xf32>
    %434 = arith.addf %427, %433 : vector<8x256xf32>
    %c8_446 = arith.constant 8 : index
    %c0_447 = arith.constant 0 : index
    %c0_448 = arith.constant 0 : index
    %435 = vector.load %arg12[%c8_446, %c0_447, %c0_448] : memref<16x8x128xf32, #tpu.memory_space<vmem>>, vector<1x8x128xf32>
    %436 = vector.shape_cast %435 : vector<1x8x128xf32> to vector<8x128xf32>
    %437 = arith.truncf %436 : vector<8x128xf32> to vector<8x128xbf16>
    %c8_449 = arith.constant 8 : index
    %c0_450 = arith.constant 0 : index
    %c0_451 = arith.constant 0 : index
    %438 = vector.load %arg6[%c8_449, %c0_450, %c0_451] : memref<16x128x256xbf16, #tpu.memory_space<vmem>>, vector<1x128x256xbf16>
    %439 = vector.shape_cast %438 : vector<1x128x256xbf16> to vector<128x256xbf16>
    %cst_452 = arith.constant dense<0.000000e+00> : vector<8x256xf32>
    %440 = tpu.matmul %437, %439, %cst_452 {dimension_numbers = #tpu.dot_dimension_numbers<[1], [0], [0], [1], [0, 0, 1, 1], [], []>} : vector<8x128xbf16>, vector<128x256xbf16>, vector<8x256xf32> -> vector<8x256xf32>
    %441 = arith.addf %434, %440 : vector<8x256xf32>
    %c9 = arith.constant 9 : index
    %c0_453 = arith.constant 0 : index
    %c0_454 = arith.constant 0 : index
    %442 = vector.load %arg12[%c9, %c0_453, %c0_454] : memref<16x8x128xf32, #tpu.memory_space<vmem>>, vector<1x8x128xf32>
    %443 = vector.shape_cast %442 : vector<1x8x128xf32> to vector<8x128xf32>
    %444 = arith.truncf %443 : vector<8x128xf32> to vector<8x128xbf16>
    %c9_455 = arith.constant 9 : index
    %c0_456 = arith.constant 0 : index
    %c0_457 = arith.constant 0 : index
    %445 = vector.load %arg6[%c9_455, %c0_456, %c0_457] : memref<16x128x256xbf16, #tpu.memory_space<vmem>>, vector<1x128x256xbf16>
    %446 = vector.shape_cast %445 : vector<1x128x256xbf16> to vector<128x256xbf16>
    %cst_458 = arith.constant dense<0.000000e+00> : vector<8x256xf32>
    %447 = tpu.matmul %444, %446, %cst_458 {dimension_numbers = #tpu.dot_dimension_numbers<[1], [0], [0], [1], [0, 0, 1, 1], [], []>} : vector<8x128xbf16>, vector<128x256xbf16>, vector<8x256xf32> -> vector<8x256xf32>
    %448 = arith.addf %441, %447 : vector<8x256xf32>
    %c10 = arith.constant 10 : index
    %c0_459 = arith.constant 0 : index
    %c0_460 = arith.constant 0 : index
    %449 = vector.load %arg12[%c10, %c0_459, %c0_460] : memref<16x8x128xf32, #tpu.memory_space<vmem>>, vector<1x8x128xf32>
    %450 = vector.shape_cast %449 : vector<1x8x128xf32> to vector<8x128xf32>
    %451 = arith.truncf %450 : vector<8x128xf32> to vector<8x128xbf16>
    %c10_461 = arith.constant 10 : index
    %c0_462 = arith.constant 0 : index
    %c0_463 = arith.constant 0 : index
    %452 = vector.load %arg6[%c10_461, %c0_462, %c0_463] : memref<16x128x256xbf16, #tpu.memory_space<vmem>>, vector<1x128x256xbf16>
    %453 = vector.shape_cast %452 : vector<1x128x256xbf16> to vector<128x256xbf16>
    %cst_464 = arith.constant dense<0.000000e+00> : vector<8x256xf32>
    %454 = tpu.matmul %451, %453, %cst_464 {dimension_numbers = #tpu.dot_dimension_numbers<[1], [0], [0], [1], [0, 0, 1, 1], [], []>} : vector<8x128xbf16>, vector<128x256xbf16>, vector<8x256xf32> -> vector<8x256xf32>
    %455 = arith.addf %448, %454 : vector<8x256xf32>
    %c11 = arith.constant 11 : index
    %c0_465 = arith.constant 0 : index
    %c0_466 = arith.constant 0 : index
    %456 = vector.load %arg12[%c11, %c0_465, %c0_466] : memref<16x8x128xf32, #tpu.memory_space<vmem>>, vector<1x8x128xf32>
    %457 = vector.shape_cast %456 : vector<1x8x128xf32> to vector<8x128xf32>
    %458 = arith.truncf %457 : vector<8x128xf32> to vector<8x128xbf16>
    %c11_467 = arith.constant 11 : index
    %c0_468 = arith.constant 0 : index
    %c0_469 = arith.constant 0 : index
    %459 = vector.load %arg6[%c11_467, %c0_468, %c0_469] : memref<16x128x256xbf16, #tpu.memory_space<vmem>>, vector<1x128x256xbf16>
    %460 = vector.shape_cast %459 : vector<1x128x256xbf16> to vector<128x256xbf16>
    %cst_470 = arith.constant dense<0.000000e+00> : vector<8x256xf32>
    %461 = tpu.matmul %458, %460, %cst_470 {dimension_numbers = #tpu.dot_dimension_numbers<[1], [0], [0], [1], [0, 0, 1, 1], [], []>} : vector<8x128xbf16>, vector<128x256xbf16>, vector<8x256xf32> -> vector<8x256xf32>
    %462 = arith.addf %455, %461 : vector<8x256xf32>
    %c12 = arith.constant 12 : index
    %c0_471 = arith.constant 0 : index
    %c0_472 = arith.constant 0 : index
    %463 = vector.load %arg12[%c12, %c0_471, %c0_472] : memref<16x8x128xf32, #tpu.memory_space<vmem>>, vector<1x8x128xf32>
    %464 = vector.shape_cast %463 : vector<1x8x128xf32> to vector<8x128xf32>
    %465 = arith.truncf %464 : vector<8x128xf32> to vector<8x128xbf16>
    %c12_473 = arith.constant 12 : index
    %c0_474 = arith.constant 0 : index
    %c0_475 = arith.constant 0 : index
    %466 = vector.load %arg6[%c12_473, %c0_474, %c0_475] : memref<16x128x256xbf16, #tpu.memory_space<vmem>>, vector<1x128x256xbf16>
    %467 = vector.shape_cast %466 : vector<1x128x256xbf16> to vector<128x256xbf16>
    %cst_476 = arith.constant dense<0.000000e+00> : vector<8x256xf32>
    %468 = tpu.matmul %465, %467, %cst_476 {dimension_numbers = #tpu.dot_dimension_numbers<[1], [0], [0], [1], [0, 0, 1, 1], [], []>} : vector<8x128xbf16>, vector<128x256xbf16>, vector<8x256xf32> -> vector<8x256xf32>
    %469 = arith.addf %462, %468 : vector<8x256xf32>
    %c13 = arith.constant 13 : index
    %c0_477 = arith.constant 0 : index
    %c0_478 = arith.constant 0 : index
    %470 = vector.load %arg12[%c13, %c0_477, %c0_478] : memref<16x8x128xf32, #tpu.memory_space<vmem>>, vector<1x8x128xf32>
    %471 = vector.shape_cast %470 : vector<1x8x128xf32> to vector<8x128xf32>
    %472 = arith.truncf %471 : vector<8x128xf32> to vector<8x128xbf16>
    %c13_479 = arith.constant 13 : index
    %c0_480 = arith.constant 0 : index
    %c0_481 = arith.constant 0 : index
    %473 = vector.load %arg6[%c13_479, %c0_480, %c0_481] : memref<16x128x256xbf16, #tpu.memory_space<vmem>>, vector<1x128x256xbf16>
    %474 = vector.shape_cast %473 : vector<1x128x256xbf16> to vector<128x256xbf16>
    %cst_482 = arith.constant dense<0.000000e+00> : vector<8x256xf32>
    %475 = tpu.matmul %472, %474, %cst_482 {dimension_numbers = #tpu.dot_dimension_numbers<[1], [0], [0], [1], [0, 0, 1, 1], [], []>} : vector<8x128xbf16>, vector<128x256xbf16>, vector<8x256xf32> -> vector<8x256xf32>
    %476 = arith.addf %469, %475 : vector<8x256xf32>
    %c14 = arith.constant 14 : index
    %c0_483 = arith.constant 0 : index
    %c0_484 = arith.constant 0 : index
    %477 = vector.load %arg12[%c14, %c0_483, %c0_484] : memref<16x8x128xf32, #tpu.memory_space<vmem>>, vector<1x8x128xf32>
    %478 = vector.shape_cast %477 : vector<1x8x128xf32> to vector<8x128xf32>
    %479 = arith.truncf %478 : vector<8x128xf32> to vector<8x128xbf16>
    %c14_485 = arith.constant 14 : index
    %c0_486 = arith.constant 0 : index
    %c0_487 = arith.constant 0 : index
    %480 = vector.load %arg6[%c14_485, %c0_486, %c0_487] : memref<16x128x256xbf16, #tpu.memory_space<vmem>>, vector<1x128x256xbf16>
    %481 = vector.shape_cast %480 : vector<1x128x256xbf16> to vector<128x256xbf16>
    %cst_488 = arith.constant dense<0.000000e+00> : vector<8x256xf32>
    %482 = tpu.matmul %479, %481, %cst_488 {dimension_numbers = #tpu.dot_dimension_numbers<[1], [0], [0], [1], [0, 0, 1, 1], [], []>} : vector<8x128xbf16>, vector<128x256xbf16>, vector<8x256xf32> -> vector<8x256xf32>
    %483 = arith.addf %476, %482 : vector<8x256xf32>
    %c15 = arith.constant 15 : index
    %c0_489 = arith.constant 0 : index
    %c0_490 = arith.constant 0 : index
    %484 = vector.load %arg12[%c15, %c0_489, %c0_490] : memref<16x8x128xf32, #tpu.memory_space<vmem>>, vector<1x8x128xf32>
    %485 = vector.shape_cast %484 : vector<1x8x128xf32> to vector<8x128xf32>
    %486 = arith.truncf %485 : vector<8x128xf32> to vector<8x128xbf16>
    %c15_491 = arith.constant 15 : index
    %c0_492 = arith.constant 0 : index
    %c0_493 = arith.constant 0 : index
    %487 = vector.load %arg6[%c15_491, %c0_492, %c0_493] : memref<16x128x256xbf16, #tpu.memory_space<vmem>>, vector<1x128x256xbf16>
    %488 = vector.shape_cast %487 : vector<1x128x256xbf16> to vector<128x256xbf16>
    %cst_494 = arith.constant dense<0.000000e+00> : vector<8x256xf32>
    %489 = tpu.matmul %486, %488, %cst_494 {dimension_numbers = #tpu.dot_dimension_numbers<[1], [0], [0], [1], [0, 0, 1, 1], [], []>} : vector<8x128xbf16>, vector<128x256xbf16>, vector<8x256xf32> -> vector<8x256xf32>
    %490 = arith.addf %483, %489 : vector<8x256xf32>
    %c0_495 = arith.constant 0 : index
    %c0_496 = arith.constant 0 : index
    %491 = vector.load %arg7[%c0_495, %c0_496] : memref<3x256xf32, #tpu.memory_space<vmem>>, vector<1x256xf32>
    %c1_497 = arith.constant 1 : index
    %c0_498 = arith.constant 0 : index
    %492 = vector.load %arg7[%c1_497, %c0_498] : memref<3x256xf32, #tpu.memory_space<vmem>>, vector<1x256xf32>
    %c2_499 = arith.constant 2 : index
    %c0_500 = arith.constant 0 : index
    %493 = vector.load %arg7[%c2_499, %c0_500] : memref<3x256xf32, #tpu.memory_space<vmem>>, vector<1x256xf32>
    %494 = vector.broadcast %491 : vector<1x256xf32> to vector<8x256xf32>
    %495 = arith.addf %490, %494 : vector<8x256xf32>
    %cst_501 = arith.constant 0.000000e+00 : f32
    %496 = vector.broadcast %cst_501 : f32 to vector<8x256xf32>
    %497 = arith.maximumf %495, %496 : vector<8x256xf32>
    %498 = vector.broadcast %492 : vector<1x256xf32> to vector<8x256xf32>
    %499 = arith.mulf %497, %498 : vector<8x256xf32>
    %500 = vector.broadcast %493 : vector<1x256xf32> to vector<8x256xf32>
    %501 = arith.addf %499, %500 : vector<8x256xf32>
    %c0_502 = arith.constant 0 : index
    %c0_503 = arith.constant 0 : index
    %502 = vector.load %arg8[%c0_502, %c0_503] : memref<8x256xf32, #tpu.memory_space<vmem>>, vector<8x256xf32>
    tpu.vector_store %arg8[%c0_502, %c0_503], %501 {strides = array<i32>} : memref<8x256xf32, #tpu.memory_space<vmem>>, vector<8x256xf32>,
    return
  }
  func.func @transform_0(%arg0: i32) -> (i32, i32, i32) {
    %c0_i32 = arith.constant 0 : i32
    %c0_i32_0 = arith.constant 0 : i32
    %c0_i32_1 = arith.constant 0 : i32
    %c0_i32_2 = arith.constant 0 : i32
    return %c0_i32, %c0_i32_0, %c0_i32_1 : i32, i32, i32
  }
  func.func @transform_1(%arg0: i32) -> (i32, i32, i32) {
    %c0_i32 = arith.constant 0 : i32
    %c0_i32_0 = arith.constant 0 : i32
    %c0_i32_1 = arith.constant 0 : i32
    %c0_i32_2 = arith.constant 0 : i32
    return %c0_i32, %c0_i32_0, %c0_i32_1 : i32, i32, i32
  }
  func.func @transform_2(%arg0: i32) -> (i32, i32, i32) {
    %c0_i32 = arith.constant 0 : i32
    %c0_i32_0 = arith.constant 0 : i32
    %c0_i32_1 = arith.constant 0 : i32
    %c0_i32_2 = arith.constant 0 : i32
    return %c0_i32, %c0_i32_0, %c0_i32_1 : i32, i32, i32
  }
  func.func @transform_3(%arg0: i32) -> (i32, i32, i32) {
    %c0_i32 = arith.constant 0 : i32
    %c0_i32_0 = arith.constant 0 : i32
    %c0_i32_1 = arith.constant 0 : i32
    %c0_i32_2 = arith.constant 0 : i32
    return %c0_i32, %c0_i32_0, %c0_i32_1 : i32, i32, i32
  }
  func.func @transform_4(%arg0: i32) -> (i32, i32) {
    %c0_i32 = arith.constant 0 : i32
    %c0_i32_0 = arith.constant 0 : i32
    %c0_i32_1 = arith.constant 0 : i32
    return %c0_i32, %c0_i32_0 : i32, i32
  }
  func.func @transform_5(%arg0: i32) -> (i32, i32, i32) {
    %c0_i32 = arith.constant 0 : i32
    %c0_i32_0 = arith.constant 0 : i32
    %c0_i32_1 = arith.constant 0 : i32
    return %c0_i32, %c0_i32_0, %arg0 : i32, i32, i32
  }
  func.func @transform_6(%arg0: i32) -> (i32, i32) {
    %c0_i32 = arith.constant 0 : i32
    %c0_i32_0 = arith.constant 0 : i32
    return %c0_i32, %arg0 : i32, i32
  }
  func.func @transform_7(%arg0: i32) -> (i32, i32) {
    %c0_i32 = arith.constant 0 : i32
    %c0_i32_0 = arith.constant 0 : i32
    return %c0_i32, %arg0 : i32, i32
  }
}

</mosaic_0001>

<bundles_post_ra>
// kernel: network_forward.1
= control target key start
LH: loop header
LB: loop body
LE: loop exit
PB: predicated region body
PF: predicated region fallthrough
CT: control target
= control target key end

     0   :  { %s11192_s0 = inlined_call_operand.vmem [shape: f32[4,16,16], index: 0, kind: input, shape index: {}]   ;;  %s11193_s1 = inlined_call_operand.hbm [shape: f32[3,16,64], index: 1, kind: input, shape index: {}]   ;;  %s11194_s2 = inlined_call_operand.hbm [shape: f32[3,64,128], index: 2, kind: input, shape index: {}]   ;;  %s11195_s3 = inlined_call_operand.hbm [shape: f32[3,128,128], index: 3, kind: input, shape index: {}]   ;;  %s11196_s4 = inlined_call_operand.hbm [shape: f32[9,128], index: 4, kind: input, shape index: {}]   ;;  %s11197_s5 = inlined_call_operand.hbm [shape: bf16[16,128,512], index: 5, kind: input, shape index: {}]   ;;  %s11198_s6 = inlined_call_operand.hbm [shape: f32[3,512], index: 6, kind: input, shape index: {}]   ;;  %s11199_s7 = inlined_call_operand.vmem [shape: f32[8,512], index: 7, kind: output, shape index: {}]  }
   0x1   :  { %11292 = sst [smem:[#allocation41_spill]] %s11193_s1 }
   0x2   :  { %11293 = sst [smem:[#allocation42_spill]] %s11194_s2 }
   0x3   :  { %12 = vsyncpa [#allocation7], 0 }
   0x4   :  { %13 = vsyncpa [#allocation9], 0 }
   0x5   :  { %14 = vsyncpa [#allocation12], 0  ;;  %s9496_s24 = smov 0   ;;  %s9498_s25 = smov 0  }
   0x6   :  { %s9500_s26 = smov 0   ;;  %s9502_s27 = smov 0  }
   0x7 LB: > { %s9515_s28 = sadd.s32 4294967295, %s9442_s27   ;;  %s9518_s29 = sadd.s32 1, %s9442_s27   ;;  %s9442_s27 = sphi %s9502_s27, %s11402_s27   ;;  %s9438_s26 = sphi %s9500_s26, %s11401_s26   ;;  %s9434_s25 = sphi %s9498_s25, %s11400_s25   ;;  %s9430_s24 = sphi %s9496_s24, %s11399_s24  }
   0x8   : > { %s129_s30 = ssub.s32 %s9442_s27, %s9518_s29  ;;  %s132_s8 = sadd.s32 1, %s9438_s26 }
   0x9   : > { %p130_p0 = scmp.eq.s32.totalorder %s129_s30, 0  ;;  %p139_p1 = scmp.ne.s32.totalorder %s9438_s26, %s9434_s25 }
   0xa   : > { %p140_p2 = scmp.eq.s32.totalorder %s9442_s27, 0  ;;  %p145_p3 = scmp.ne.s32.totalorder %s9434_s25, %s9430_s24 }
   0xb   : > { %s9528_s9 = scalar_select %p130_p0, %s9438_s26, %s132_s8  }
   0xc   : > { %p9530_p4 = por %p140_p2, %p139_p1  ;;  %p11200_p5 = scmp.eq.s32.totalorder %s9515_s28, 0 }
   0xd   : > { %p6994_p6 = scmp.ge.s32.totalorder %s9442_s27, 1  ;;  %p208_p7 = scmp.lt.s32.totalorder %s9442_s27, 3 }
   0xe   : > { %p9539_p8 = por %p11200_p5, %p145_p3  ;;  %s9444_s13 = smov [#allocation6]  }
   0xf   : > { %p9543_p9 = pnand %p6994_p6, %p208_p7  ;;  %s223_s14 = sshll.u32 %s9444_s13, 4  ;;  %s224_s14 = int_to_ptr.vmem [resolvable:$true] %s223_s14 }
  0x10   : > { %s11295_s11 = scalar_select %p9539_p8, 1, 0 }
  0x11   : > { %s11296_s12 = scalar_select %p9543_p9, 1, 0 }
  0x12   : > { %p8775_p10 = pneg %p9543_p9  ;;  %p8799_p12 = scmp.lt.s32.totalorder %s9442_s27, 2 }
  0x13   : > { %s9247_s18 = scalar_lea.vmem %s224_s14, 768  ;;  %p9255_p6 = scmp.lt.s32.totalorder %s224_s14, %s224_s14 }
  0x14   : > { %p9551_p11 = pnand %p8775_p10, %p11200_p5  ;;  %p9559_p13 = pnand %p8799_p12, %p9530_p4 }
  0x15   : > { %p9248_p1 = scmp.ne.s32.totalorder %s224_s14, %s9247_s18  ;;  %p9256_p7 = scmp.lt.s32.totalorder %s9247_s18, %s9247_s18 }
  0x16   : > { %p11205_p0 = pneg %p9551_p11 }
  0x17   : > { %p9257_p10 = por %p9256_p7, %p9255_p6 }
  0x18   : > { %p9250_p2 = pnand %p9248_p1, %p11205_p0 }
  0x1a   : > { %p9251_p3 = pneg %p9250_p2 }
  0x1c   : > { %p9258_p5 = pnand %p9257_p10, %p9251_p3 }
  0x1e   : > { %9261 = shalt.err (!%p9258_p5)
}
  0x1f   : > { %s11201_s19 = smov 128   ;;  %s9446_s20 = smov 8  }
  0x20   : > { %s11299_s1 = sld [smem:[#allocation41_spill]]  ;;  %s9447_s23 = smov [#allocation8]  }
  0x21   : > { %s236_s24 = sshll.u32 %s9447_s23, 4  ;;  %s237_s24 = int_to_ptr.vmem [resolvable:$true] %s236_s24 }
  0x22   : > { %s9273_s30 = scalar_lea.vmem %s237_s24, 3072  ;;  %p9281_p1 = scmp.lt.s32.totalorder %s237_s24, %s237_s24 }
  0x23   : > { %p9274_p4 = scmp.ne.s32.totalorder %s237_s24, %s9273_s30  ;;  %p9282_p2 = scmp.lt.s32.totalorder %s9273_s30, %s9273_s30 }
  0x25   : > { %p9276_p5 = pnand %p9274_p4, %p11205_p0  ;;  %p9283_p3 = por %p9282_p2, %p9281_p1 }
  0x26   : > { %8778 = dma.hbm_to_vmem [thread:$0]  (!%p9551_p11), %s11299_s1, 768, %s224_s14, [#allocation7], %s11201_s19, %s11201_s19, %s9446_s20  }
  0x27   : > { %p9277_p12 = pneg %p9276_p5 }
  0x29   : > { %p9284_p6 = pnand %p9283_p3, %p9277_p12 }
  0x2b   : > { %9287 = shalt.err (!%p9284_p6)
}
  0x2c   : > { %s11300_s2 = sld [smem:[#allocation42_spill]]  ;;  %s11203_s13 = sand.u32 1, %s9438_s26  }
  0x2d   : > { %s11204_s14 = sshll.u32 %s9442_s27, 7  ;;  %s7000_s18 = sshll.u32 %s11203_s13, 11 }
  0x2e   : > { %s9596_s23 = scalar_lea.hbm %s11197_s5, %s11204_s14  ;;  %s280_s30 = scalar_lea.vmem [#allocation13], %s7000_s18 }
  0x2f   : > { %s287_s8 = sshll.u32 %s280_s30, 4  ;;  %s9448_s10 = smov [#allocation10]   ;;  %s9598_s8 = int_to_ptr.vmem [resolvable:$true] %s287_s8 }
  0x30   : > { %s9600_s16 = sshll.u32 %s9448_s10, 4  ;;  %s9288_s13 = scalar_lea.hbm %s9596_s23, 32768  ;;  %s250_s16 = int_to_ptr.vmem [resolvable:$true] %s9600_s16 }
  0x31   : > { %p9289_p7 = scmp.ne.s32.totalorder %s9596_s23, %s9288_s13  ;;  %p9290_p10 = pneg %p9559_p13 }
  0x32   : > { %8781 = dma.hbm_to_vmem [thread:$0]  (!%p9551_p11), %s11300_s2, 3072, %s237_s24, [#allocation9], %s11201_s19, %s11201_s19, %s9446_s20  }
  0x33   : > { %s11301_s24 = sand.u32 1, %s9442_s27   ;;  %p9291_p4 = pnand %p9290_p10, %p9289_p7 }
  0x34   : > { %s9604_s19 = scalar_lea.sflag [#allocation7], %s11301_s24  ;;  %s9293_s18 = scalar_lea.hbm %s11197_s5, 65536 }
  0x35   : > { %p9292_p5 = pneg %p9291_p4  ;;  %p9294_p12 = scmp.lt.s32.totalorder %s9596_s23, %s11197_s5 }
  0x36   : > { %p9295_p1 = scmp.lt.s32.totalorder %s9293_s18, %s9288_s13 }
  0x38   : > { %p9296_p2 = por %p9295_p1, %p9294_p12 }
  0x3a   : > { %p9297_p3 = pnand %p9296_p2, %p9292_p5 }
  0x3c   : > { %9300 = shalt.err (!%p9297_p3)
}
  0x3d   : > { %s9301_s10 = scalar_lea.vmem %s9598_s8, 32768  ;;  %s9449_s24 = smov [#allocation13]  }
  0x3e   : > { %p9302_p6 = scmp.ne.s32.totalorder %s9598_s8, %s9301_s10  ;;  %s9306_s21 = sshll.u32 %s9449_s24, 4  ;;  %s9307_s21 = int_to_ptr.vmem [resolvable:$false] %s9306_s21 }
  0x3f   : > { %s9308_s22 = scalar_lea.vmem %s9307_s21, 65536  ;;  %p9309_p0 = scmp.lt.s32.totalorder %s9598_s8, %s9307_s21 }
  0x40   : > { %p9304_p7 = pnand %p9302_p6, %p9290_p10  ;;  %p9310_p8 = scmp.lt.s32.totalorder %s9308_s22, %s9301_s10 }
  0x42   : > { %p9305_p4 = pneg %p9304_p7  ;;  %p9311_p9 = por %p9310_p8, %p9309_p0 }
  0x44   : > { %p9312_p12 = pnand %p9311_p9, %p9305_p4 }
  0x46   : > { %9315 = shalt.err (!%p9312_p12)
}
  0x47   : > { %s9450_s13 = smov 256   ;;  %s11302_s14 = smov 128  }
  0x48   : > { %8791 = dma.hbm_to_vmem [thread:$0]  (!%p9559_p13), %s9596_s23, 32768, %s9598_s8, %s9604_s19, %s9450_s13, %s11302_s14, %s9446_s20  }
  0x49   : > { %s9327_s18 = scalar_lea.vmem %s250_s16, 6144  ;;  %p11303_p1 = pneg %p9551_p11 }
  0x4a   : > { %p9328_p5 = scmp.ne.s32.totalorder %s250_s16, %s9327_s18  ;;  %p9335_p9 = scmp.lt.s32.totalorder %s250_s16, %s250_s16 }
  0x4b   : > { %p9336_p0 = scmp.lt.s32.totalorder %s9327_s18, %s9327_s18 }
  0x4c   : > { %p9330_p2 = pnand %p9328_p5, %p11303_p1 }
  0x4d   : > { %p9337_p3 = por %p9336_p0, %p9335_p9 }
  0x4e   : > { %p9331_p8 = pneg %p9330_p2 }
  0x50   : > { %p9338_p6 = pnand %p9337_p3, %p9331_p8 }
  0x52   : > { %9341 = shalt.err (!%p9338_p6)
}
  0x53   : > { %8784 = dma.hbm_to_vmem [thread:$0]  (!%p9551_p11), %s11195_s3, 6144, %s250_s16, [#allocation9], %s11302_s14, %s11302_s14, %s9446_s20  }
  0x54   : > { %s9451_s23 = smov [#allocation11]   ;;  %s11304_s24 = sand.u32 1, %s9438_s26  }
  0x55   : > { %s262_s8 = sshll.u32 %s9451_s23, 4  ;;  %s7003_s21 = sshll.u32 %s11304_s24, 3  ;;  %s263_s8 = int_to_ptr.vmem [resolvable:$true] %s262_s8 }
  0x56   : > { %s9353_s22 = scalar_lea.vmem %s263_s8, 256  ;;  %p11305_p4 = pmov %p11303_p1 }
  0x57   : > { %p9354_p7 = scmp.ne.s32.totalorder %s263_s8, %s9353_s22  ;;  %p9361_p1 = scmp.lt.s32.totalorder %s263_s8, %s263_s8 }
  0x58   : > { %p9362_p2 = scmp.lt.s32.totalorder %s9353_s22, %s9353_s22 }
  0x59   : > { %p9356_p12 = pnand %p9354_p7, %p11305_p4 }
  0x5a   : > { %p9363_p8 = por %p9362_p2, %p9361_p1 }
  0x5b   : > { %p9357_p5 = pneg %p9356_p12 }
  0x5d   : > { %p9364_p9 = pnand %p9363_p8, %p9357_p5 }
  0x5f   : > { %9367 = shalt.err (!%p9364_p9)
}
  0x60   : > { %8787 = dma.hbm_to_vmem [thread:$0]  (!%p9551_p11), %s11196_s4, 256, %s263_s8, [#allocation12], %s11302_s14, %s11302_s14, %s9446_s20  }
  0x61   : > { %s11306_s18 = sshll.u32 %s9442_s27, 7  ;;  %s301_s24 = scalar_lea.vmem [#allocation14], %s7003_s21 }
  0x62   : > { %s307_s23 = scalar_lea.hbm %s11198_s6, %s11306_s18  ;;  %s309_s22 = sshll.u32 %s301_s24, 4  ;;  %s310_s22 = int_to_ptr.vmem [resolvable:$true] %s309_s22 }
  0x63   : > { %s9368_s1 = scalar_lea.hbm %s307_s23, 128  ;;  %s9373_s16 = scalar_lea.hbm %s11198_s6, 256 }
  0x64   : > { %p9369_p0 = scmp.ne.s32.totalorder %s307_s23, %s9368_s1  ;;  %p9374_p11 = scmp.lt.s32.totalorder %s307_s23, %s11198_s6 }
  0x65   : > { %p9375_p7 = scmp.lt.s32.totalorder %s9373_s16, %s9368_s1 }
  0x66   : > { %p9371_p3 = pnand %p9369_p0, %p9290_p10 }
  0x67   : > { %p9376_p4 = por %p9375_p7, %p9374_p11 }
  0x68   : > { %p9372_p6 = pneg %p9371_p3 }
  0x6a   : > { %p9377_p12 = pnand %p9376_p4, %p9372_p6 }
  0x6c   : > { %9380 = shalt.err (!%p9377_p12)
}
  0x6d   : > { %s9381_s27 = scalar_lea.vmem %s310_s22, 128  ;;  %s9452_s14 = smov [#allocation14]  }
  0x6e   : > { %p9382_p5 = scmp.ne.s32.totalorder %s310_s22, %s9381_s27  ;;  %s9386_s8 = sshll.u32 %s9452_s14, 4  ;;  %s9387_s8 = int_to_ptr.vmem [resolvable:$false] %s9386_s8 }
  0x6f   : > { %s9388_s2 = scalar_lea.vmem %s9387_s8, 256  ;;  %p9389_p8 = scmp.lt.s32.totalorder %s310_s22, %s9387_s8 }
  0x70   : > { %p9384_p1 = pnand %p9382_p5, %p9290_p10  ;;  %p9390_p9 = scmp.lt.s32.totalorder %s9388_s2, %s9381_s27 }
  0x72   : > { %p9385_p2 = pneg %p9384_p1  ;;  %p9391_p0 = por %p9390_p9, %p9389_p8 }
  0x74   : > { %p9392_p3 = pnand %p9391_p0, %p9385_p2 }
  0x76   : > { %9395 = shalt.err (!%p9392_p3)
}
  0x77   : > { %8794 = dma.hbm_to_vmem [thread:$0]  (!%p9559_p13), %s307_s23, 128, %s310_s22, %s9604_s19  }
  0x78   : > { %p11307_p6 = scmp.ne.s32.totalorder %s11296_s12, 0 }
  0x7a   : > { %318 = sbr.rel (%p11307_p6) target bundleno = 2670 (0xa6e), region = 48 }
  0x7f   : > { %p11308_p11 = scmp.eq.s32.totalorder %s9515_s28, 0 }
  0x81   : > { %9413 = dma.done.wait (%p11308_p11), [#allocation7], 768   ;;  %p11309_p10 = pmov %p11308_p11 }
  0x83   : > { %9415 = vsyncadd (%p11309_p10), [#allocation7], 4294966528  ;;  %p11310_p7 = pmov %p11309_p10 }
  0x85   : > { %9417 = dma.done.wait (%p11310_p7), [#allocation9], 9216   ;;  %p11311_p4 = pmov %p11310_p7 }
  0x87   : > { %9419 = vsyncadd (%p11311_p4), [#allocation9], 4294958080  ;;  %p11312_p12 = pmov %p11311_p4 }
  0x88   : > { %p11313_p13 = pmov %p11311_p4 }
  0x89   : > { %9421 = dma.done.wait (%p11312_p12), [#allocation12], 256  }
  0x8a   : > { %9423 = vsyncadd (%p11313_p13), [#allocation12], 4294967040  ;;  %s336_s1 = sand.u32 1, %s9515_s28   ;;  %s338_s12 = sand.u32 1, %s9434_s25  }
  0x8b   : > { %s7011_s17 = sshll.u32 %s338_s12, 11  ;;  %s337_s19 = scalar_lea.sflag [#allocation7], %s336_s1 }
  0x8c   : > { %s9696_s21 = scalar_lea.vmem [#allocation13], %s7011_s17  ;;  %p11314_p5 = scmp.ne.s32.totalorder %s11295_s11, 0 }
  0x8e   : > { %9425 = dma.done.wait (%p11314_p5), %s337_s19, 32896  }
  0x8f   : > { %9427 = vsyncadd (%p11314_p5), %s337_s19, 4294934400  ;;  %vm412_vm0 = vcmask 130048   ;;  %vm415_vm1 = vcmask 123905   ;;  %v9702_v0 = vld [vmem:[#allocation6 + $0x18] sm:$0xff]  ;;  %v422_v1 = vld [vmem:[#allocation6 + $0x8] sm:$0xff]  ;;  %vm417_vm2 = vcmask 129030  }
  0x90   : > { %v426_v2 = vld [vmem:[#allocation6 + $0x10] sm:$0xff]  ;;  %8023 = vmatprep.subr.mxu0 %v9702_v0  ;;  %8030 = vmatprep.subr.mxu1 %v422_v1  ;;  %v421_v3 = vld [vmem:[#allocation6] sm:$0xff]  ;;  %v410_v4 = vld [vmem:[%s11192_s0] sm:$0xff]  ;;  %vm701_vm3 = vcmask 523264   ;;  %vm706_vm4 = vcmask 522246   ;;  %vm704_vm5 = vcmask 517121  }
  0x91   : > { %8024 = vmatpush3.msra.mxu0 %v9702_v0  ;;  %8031 = vmatpush3.msra.mxu1 %v422_v1  ;;  %413 = vst.msk [vmem:[#allocation2 + $0x1] sm:$0xff] %vm412_vm0, %v410_v4  ;;  %v594_v5 = vld [vmem:[#allocation6 + $0x28] sm:$0xff]  ;;  %v411_v6 = vld [vmem:[%s11192_s0 + $0x8] sm:$0xff]  ;;  %v7045_v8 = vld [vmem:[%s11192_s0 + $0x18] sm:$0xff]  ;;  %s7012_s17 = sshll.u32 %s338_s12, 3  ;;  %s7013_s19 = sshll.u32 %s9515_s28, 1 }
  0x92   : > { %416 = vst.msk [vmem:[#allocation2 - $0x1] sm:$0x2] %vm415_vm1, %v410_v4  ;;  %8025 = vmatprep.subr.mxu0 %v426_v2  ;;  %8032 = vmatprep.subr.mxu1 %v421_v3  ;;  %v7044_v7 = vld [vmem:[%s11192_s0 + $0x10] sm:$0xff]  ;;  %v593_v9 = vld [vmem:[#allocation6 + $0x20] sm:$0xff]  ;;  %v9740_v18 = vld [vmem:[#allocation8 + $0x68] sm:$0xff]  ;;  %p388_p1 = scmp.lt.s32.totalorder %s7013_s19, 3 }
  0x93   : > { %414 = vst.msk [vmem:[#allocation2 + $0x9] sm:$0xff] %vm412_vm0, %v411_v6  ;;  %8026 = vmatpush3.msra.mxu0 %v426_v2  ;;  %8033 = vmatpush3.msra.mxu1 %v421_v3  ;;  %v9732_v16 = vld [vmem:[#allocation8 + $0x78] sm:$0xff]  ;;  %v9736_v17 = vld [vmem:[#allocation8 + $0x70] sm:$0xff]  ;;  %v9744_v19 = vld [vmem:[#allocation8 + $0x60] sm:$0xff] }
  0x94   : > { %418 = vst.msk [vmem:[#allocation2 + $0xb] sm:$0x40] %vm417_vm2, %v411_v6  ;;  %8037 = vmatprep.subr.mxu0 %v594_v5  ;;  %8044 = vmatprep.subr.mxu1 %v9732_v16  ;;  %v9748_v20 = vld [vmem:[#allocation8 + $0x58] sm:$0xff]  ;;  %v9751_v21 = vld [vmem:[#allocation8 + $0x50] sm:$0xff]  ;;  %v9753_v22 = vld [vmem:[#allocation8 + $0x48] sm:$0xff]  ;;  %s11404_s19 = smov (!%p388_p1, %s7013_s19), 3 }
  0x95   : > { %v9758_v23 = vld [vmem:[#allocation8 + $0x40] sm:$0xff]  ;;  %v9764_v24 = vld [vmem:[#allocation8 + $0x38] sm:$0xff]  ;;  %v9784_v48 = vld [vmem:[#allocation8 + $0x30] sm:$0xff]  ;;  %s7014_s28 = sshll.u32 %s11404_s19, 3 }
  0x96   : > { %v9767_v31 = vld [vmem:[#allocation11] ss:$0 sm:$0xff]  ;;  %v9770_v37 = vld [vmem:[#allocation11 + $0x1] ss:$0 sm:$0xff]  ;;  %v9773_v40 = vld [vmem:[#allocation11 + $0x2] ss:$0 sm:$0xff]  ;;  %s391_s30 = scalar_lea.vmem %s11199_s7, %s7014_s28 }
  0x97   : > { %v9789_v50 = vld [vmem:[#allocation8 + $0x28] sm:$0xff]  ;;  %v9793_v51 = vld [vmem:[#allocation8 + $0x20] sm:$0xff]  ;;  %v9797_v52 = vld [vmem:[#allocation8 + $0x18] sm:$0xff] }
  0x98   : > { %v423_v10 = vld [vmem:[#allocation2 + $0x1] sm:$0xff]  ;;  %v9809_v55 = vld [vmem:[#allocation8] sm:$0xff]  ;;  %v9813_v56 = vld [vmem:[#allocation8 + $0xb8] sm:$0xff] }
  0x99   : > { %v419_v11 = vld [vmem:[#allocation2] sm:$0xff]  ;;  %8027 = vmatprep.mubr.msk.f32.mxu0 %vm412_vm0, %v423_v10  ;;  %v9801_v53 = vld [vmem:[#allocation8 + $0x10] sm:$0xff]  ;;  %v9827_v61 = vld [vmem:[#allocation8 + $0xa0] sm:$0xff] }
  0x9a   : > { %8034 = vmatprep.mubr.msk.f32.mxu1 %vm412_vm0, %v419_v11  ;;  %v424_v12 = vld [vmem:[#allocation2 + $0x9] sm:$0xff]  ;;  %1455 = vst.msk [vmem:[#allocation2 - $0x1] sm:$0x2] %vm415_vm1, %v7044_v7  ;;  %v9805_v54 = vld [vmem:[#allocation8 + $0x8] sm:$0xff]  ;;  %v9843_v2 = vld [vmem:[#allocation8 + $0x80] sm:$0xff] }
  0x9b   : > { %v420_v13 = vld [vmem:[#allocation2 + $0x8] sm:$0xff]  ;;  %8028 = vmatmul.mubr.msk.f32.vlgmr.msra.gmra.mxu0 %vm412_vm0, %v424_v12  ;;  %v9823_v60 = vld [vmem:[#allocation8 + $0xa8] sm:$0xff]  ;;  %v9831_v62 = vld [vmem:[#allocation8 + $0x98] sm:$0xff] }
  0x9c   : > { %v590_v14 = vld [vmem:[#allocation2 + $0x2] sm:$0xff]  ;;  %8035 = vmatmul.mubr.msk.f32.vlgmr.msra.gmra.mxu1 %vm412_vm0, %v420_v13  ;;  %v591_v15 = vld [vmem:[#allocation2 + $0xa] sm:$0xff]  ;;  %8038 = vmatpush3.msra.mxu0 %v594_v5  ;;  %v9882_v13 = vld [vmem:[#allocation10 + $0x60] sm:$0xff] }
  0x9d   : > { %1453 = vst.msk [vmem:[#allocation2 + $0x1] sm:$0xff] %vm412_vm0, %v7044_v7  ;;  %8041 = vmatprep.mubr.msk.f32.mxu0 %vm412_vm0, %v590_v14  ;;  %1454 = vst.msk [vmem:[#allocation2 + $0x9] sm:$0xff] %vm412_vm0, %v7045_v8  ;;  %8039 = vmatprep.subr.mxu0 %v593_v9  ;;  %v9817_v58 = vld [vmem:[#allocation8 + $0xb0] sm:$0xff]  ;;  %v9839_v1 = vld [vmem:[#allocation8 + $0x88] sm:$0xff] }
  0x9e   : > { %1456 = vst.msk [vmem:[#allocation2 + $0xb] sm:$0x40] %vm417_vm2, %v7045_v8  ;;  %8040 = vmatpush3.msra.mxu0 %v593_v9  ;;  %8045 = vmatpush3.msra.mxu1 %v9732_v16  ;;  %v9835_v63 = vld [vmem:[#allocation8 + $0x90] sm:$0xff]  ;;  %v9850_v4 = vld [vmem:[#allocation10 + $0xf8] sm:$0xff]  ;;  %v9858_v6 = vld [vmem:[#allocation10 + $0xe8] sm:$0xff] }
  0x9f   : > { %8042 = vmatmul.mubr.msk.f32.vlgmr.msra.gmra.mxu0 %vm412_vm0, %v591_v15  ;;  %8046 = vmatprep.subr.mxu1 %v9736_v17  ;;  %v9854_v5 = vld [vmem:[#allocation10 + $0xf0] sm:$0xff]  ;;  %v9862_v7 = vld [vmem:[#allocation10 + $0xe0] sm:$0xff]  ;;  %v9864_v8 = vld [vmem:[#allocation10 + $0x78] sm:$0xff]  ;;  %11315 = vst [vmem:[#allocation19_spill] sm:$0xff] %v9882_v13 }
  0xa0   : > { %8047 = vmatpush3.msra.mxu1 %v9736_v17  ;;  %8101 = vmatprep.subr.mxu0 %v9850_v4  ;;  %v9866_v9 = vld [vmem:[#allocation10 + $0x70] sm:$0xff]  ;;  %v9871_v10 = vld [vmem:[#allocation10 + $0xd8] sm:$0xff]  ;;  %v9874_v11 = vld [vmem:[#allocation10 + $0x68] sm:$0xff] }
  0xa1   : > { %8048 = vmatprep.subr.mxu1 %v9740_v18  ;;  %8102 = vmatpush3.msra.mxu0 %v9850_v4  ;;  %v9877_v12 = vld [vmem:[#allocation10 + $0xd0] sm:$0xff]  ;;  %v9887_v14 = vld [vmem:[#allocation10 + $0xc8] sm:$0xff]  ;;  %v9890_v15 = vld [vmem:[#allocation10 + $0x58] sm:$0xff] }
  0xa2   : > { %8049 = vmatpush3.msra.mxu1 %v9740_v18  ;;  %8103 = vmatprep.subr.mxu0 %v9854_v5  ;;  %11316 = vst [vmem:[#allocation20_spill] sm:$0xff] %v9890_v15 }
  0xa3   : > { %8050 = vmatprep.subr.mxu1 %v9744_v19  ;;  %8104 = vmatpush3.msra.mxu0 %v9854_v5 }
  0xa4   : > { %8051 = vmatpush3.msra.mxu1 %v9744_v19  ;;  %8105 = vmatprep.subr.mxu0 %v9858_v6 }
  0xa5   : > { %8052 = vmatprep.subr.mxu1 %v9748_v20  ;;  %8106 = vmatpush3.msra.mxu0 %v9858_v6 }
  0xa6   : > { %8053 = vmatpush3.msra.mxu1 %v9748_v20  ;;  %8107 = vmatprep.subr.mxu0 %v9862_v7 }
  0xa7   : > { %8054 = vmatprep.subr.mxu1 %v9751_v21  ;;  %8108 = vmatpush3.msra.mxu0 %v9862_v7 }
  0xa8   : > { %8055 = vmatpush3.msra.mxu1 %v9751_v21  ;;  %8109 = vmatprep.subr.mxu0 %v9871_v10 }
  0xa9   : > { %8056 = vmatprep.subr.mxu1 %v9753_v22  ;;  %8110 = vmatpush3.msra.mxu0 %v9871_v10 }
  0xaa   : > { %8057 = vmatpush3.msra.mxu1 %v9753_v22  ;;  %8111 = vmatprep.subr.mxu0 %v9877_v12 }
  0xab   : > { %8058 = vmatprep.subr.mxu1 %v9758_v23  ;;  %8112 = vmatpush3.msra.mxu0 %v9877_v12 }
  0xac   : > { %8059 = vmatpush3.msra.mxu1 %v9758_v23  ;;  %8113 = vmatprep.subr.mxu0 %v9887_v14 }
  0xad   : > { %8063 = vmatprep.subr.mxu1 %v9764_v24  ;;  %8114 = vmatpush3.msra.mxu0 %v9887_v14 }
 0x15b   : > { %v8029_v25 = vpop.f32.mrf.mxu0 }
 0x15c   : > { %v8036_v26 = vpop.f32.mrf.mxu1 }
 0x15d   : > { %v500_v27 = vpop.f32.mrf.mxu0  ;;  %v587_v29 = vadd.f32 %v8036_v26, %v8029_v25  ;;  %v9895_v25 = vld [vmem:[#allocation10 + $0xc0] sm:$0xff]  ;;  %v9898_v26 = vld [vmem:[#allocation10 + $0x50] sm:$0xff] }
 0x15e   : > { %v581_v28 = vpop.f32.mrf.mxu1  ;;  %11317 = vst [vmem:[#allocation21_spill] sm:$0xff] %v9898_v26  ;;  %8115 = vmatprep.subr.mxu0 %v9895_v25 }
 0x15f   : > { %v8043_v30 = vpop.f32.mrf.mxu0  ;;  %v582_v32 = vadd.f32 %v581_v28, %v500_v27  ;;  %8116 = vmatpush3.msra.mxu0 %v9895_v25  ;;  %v9903_v27 = vld [vmem:[#allocation10 + $0xb8] sm:$0xff]  ;;  %v9909_v28 = vld [vmem:[#allocation10 + $0xb0] sm:$0xff] }
 0x160   : > { %v677_v33 = vadd.f32 %v8043_v30, %v587_v29  ;;  %8117 = vmatprep.subr.mxu0 %v9903_v27  ;;  %11318 = vst [vmem:[#allocation22_spill] sm:$0xff] %v9909_v28  ;;  %v9914_v29 = vld [vmem:[#allocation10 + $0xa8] sm:$0xff] }
 0x161   : > { %v667_v34 = vpop.f32.mrf.mxu0  ;;  %8118 = vmatpush3.msra.mxu0 %v9903_v27  ;;  %11319 = vst [vmem:[#allocation23_spill] sm:$0xff] %v9914_v29  ;;  %v9917_v30 = vld [vmem:[#allocation10 + $0x48] sm:$0xff] }
 0x162   : > { %v686_v35 = vadd.f32 %v9767_v31, %v677_v33  ;;  %v676_v36 = vadd.f32 %v667_v34, %v582_v32  ;;  %8119 = vmatprep.subr.mxu0 %v9909_v28  ;;  %11320 = vst [vmem:[#allocation24_spill] sm:$0xff] %v9917_v30  ;;  %v9920_v32 = vld [vmem:[#allocation10 + $0xa0] sm:$0xff]  ;;  %v9928_v34 = vld [vmem:[#allocation10 + $0x98] sm:$0xff] }
 0x163   : > { %8120 = vmatpush3.msra.mxu0 %v9909_v28  ;;  %11321 = vst [vmem:[#allocation25_spill] sm:$0xff] %v9920_v32  ;;  %v9923_v33 = vld [vmem:[#allocation10 + $0x40] sm:$0xff]  ;;  %11323 = vst [vmem:[#allocation27_spill] sm:$0xff] %v9928_v34 }
 0x164   : > { %v688_v38 = vmax.f32 %v686_v35, 0.0  ;;  %v685_v39 = vadd.f32 %v9767_v31, %v676_v36  ;;  %8121 = vmatprep.subr.mxu0 %v9914_v29  ;;  %11322 = vst [vmem:[#allocation26_spill] sm:$0xff] %v9923_v33  ;;  %v9931_v35 = vld [vmem:[#allocation10 + $0x38] sm:$0xff]  ;;  %v9936_v36 = vld [vmem:[#allocation10 + $0x90] sm:$0xff] }
 0x165   : > { %8122 = vmatpush3.msra.mxu0 %v9914_v29  ;;  %11324 = vst [vmem:[#allocation28_spill] sm:$0xff] %v9931_v35  ;;  %11325 = vst [vmem:[#allocation29_spill] sm:$0xff] %v9936_v36 }
 0x166   : > { %v694_v41 = vmul.f32 %v9770_v37, %v688_v38  ;;  %v687_v42 = vmax.f32 %v685_v39, 0.0  ;;  %8123 = vmatprep.subr.mxu0 %v9920_v32  ;;  %v9939_v38 = vld [vmem:[#allocation10 + $0x30] sm:$0xff]  ;;  %v9944_v39 = vld [vmem:[#allocation10 + $0x88] sm:$0xff] }
 0x167   : > { %8124 = vmatpush3.msra.mxu0 %v9920_v32  ;;  %11326 = vst [vmem:[#allocation30_spill] sm:$0xff] %v9939_v38  ;;  %11327 = vst [vmem:[#allocation31_spill] sm:$0xff] %v9944_v39 }
 0x168   : > { %v700_v43 = vadd.f32 %v9773_v40, %v694_v41  ;;  %v693_v44 = vmul.f32 %v9770_v37, %v687_v42  ;;  %8125 = vmatprep.subr.mxu0 %v9928_v34  ;;  %v9947_v41 = vld [vmem:[#allocation10 + $0x28] sm:$0xff]  ;;  %v9952_v42 = vld [vmem:[#allocation10 + $0x80] sm:$0xff] }
 0x169   : > { %8126 = vmatpush3.msra.mxu0 %v9928_v34  ;;  %11328 = vst [vmem:[#allocation32_spill] sm:$0xff] %v9947_v41  ;;  %11329 = vst [vmem:[#allocation33_spill] sm:$0xff] %v9952_v42 }
 0x16a   : > { %703 = vst.msk [vmem:[#allocation3 + $0x9] sm:$0xff] %vm701_vm3, %v700_v43  ;;  %v699_v45 = vadd.f32 %v9773_v40, %v693_v44  ;;  %8127 = vmatprep.subr.mxu0 %v9936_v36  ;;  %v9960_v44 = vld [vmem:[#allocation10 + $0x178] sm:$0xff] }
 0x16b   : > { %707 = vst.msk [vmem:[#allocation3 + $0xb] sm:$0x40] %vm706_vm4, %v700_v43  ;;  %8128 = vmatpush3.msra.mxu0 %v9936_v36  ;;  %v9955_v43 = vld [vmem:[#allocation10 + $0x20] sm:$0xff] }
 0x16c   : > { %702 = vst.msk [vmem:[#allocation3 + $0x1] sm:$0xff] %vm701_vm3, %v699_v45  ;;  %8129 = vmatprep.subr.mxu0 %v9944_v39  ;;  %11330 = vst [vmem:[#allocation34_spill] sm:$0xff] %v9955_v43  ;;  %v10000_v36 = vld [vmem:[#allocation11 + $0x3] ss:$0 sm:$0xff] }
 0x16d   : > { %705 = vst.msk [vmem:[#allocation3 - $0x1] sm:$0x2] %vm704_vm5, %v699_v45  ;;  %8130 = vmatpush3.msra.mxu0 %v9944_v39  ;;  %v9963_v45 = vld [vmem:[#allocation10 + $0x18] sm:$0xff] }
 0x16e   : > { %8131 = vmatprep.subr.mxu0 %v9952_v42  ;;  %11331 = vst [vmem:[#allocation35_spill] sm:$0xff] %v9963_v45 }
 0x16f   : > { %8132 = vmatpush3.msra.mxu0 %v9952_v42 }
 0x170   : > { %8171 = vmatprep.subr.mxu0 %v9960_v44 }
 0x171   : > { %v719_v47 = vld [vmem:[#allocation3 + $0x9] sm:$0xff] }
 0x172   : > { %v892_v3 = vld [vmem:[#allocation3 + $0xa] sm:$0xff] }
 0x173   : > { %v718_v46 = vld [vmem:[#allocation3 + $0x1] sm:$0xff] }
 0x174   : > { %8060 = vmatprep.mubr.msk.f32.mxu1 %vm701_vm3, %v718_v46  ;;  %v708_v49 = vld [vmem:[#allocation3] sm:$0xff]  ;;  %v709_v57 = vld [vmem:[#allocation3 + $0x8] sm:$0xff]  ;;  %v9967_v46 = vld [vmem:[#allocation10 + $0x10] sm:$0xff] }
 0x175   : > { %8061 = vmatmul.mubr.msk.f32.vlgmr.msra.gmra.mxu1 %vm701_vm3, %v719_v47  ;;  %v891_v59 = vld [vmem:[#allocation3 + $0x2] sm:$0xff]  ;;  %11332 = vst [vmem:[#allocation36_spill] sm:$0xff] %v9967_v46 }
 0x176   : > { %8064 = vmatpush3.msra.mxu1 %v9764_v24  ;;  %8079 = vmatprep.mubr.msk.f32.mxu1 %vm701_vm3, %v708_v49  ;;  %v9971_v47 = vld [vmem:[#allocation10 + $0x8] sm:$0xff]  ;;  %v9975_v49 = vld [vmem:[#allocation10] sm:$0xff] }
 0x177   : > { %8065 = vmatprep.subr.mxu1 %v9784_v48  ;;  %11333 = vst [vmem:[#allocation37_spill] sm:$0xff] %v9971_v47  ;;  %11334 = vst [vmem:[#allocation38_spill] sm:$0xff] %v9975_v49 }
 0x178   : > { %8066 = vmatpush3.msra.mxu1 %v9784_v48 }
 0x179   : > { %8067 = vmatprep.subr.mxu1 %v9789_v50 }
 0x17a   : > { %8068 = vmatpush3.msra.mxu1 %v9789_v50 }
 0x17b   : > { %8069 = vmatprep.subr.mxu1 %v9793_v51 }
 0x17c   : > { %8070 = vmatpush3.msra.mxu1 %v9793_v51 }
 0x17d   : > { %8071 = vmatprep.subr.mxu1 %v9797_v52 }
 0x17e   : > { %8072 = vmatpush3.msra.mxu1 %v9797_v52 }
 0x17f   : > { %8073 = vmatprep.subr.mxu1 %v9801_v53 }
 0x180   : > { %8074 = vmatpush3.msra.mxu1 %v9801_v53 }
 0x181   : > { %8075 = vmatprep.subr.mxu1 %v9805_v54 }
 0x182   : > { %8076 = vmatpush3.msra.mxu1 %v9805_v54 }
 0x183   : > { %8077 = vmatprep.subr.mxu1 %v9809_v55 }
 0x184   : > { %8078 = vmatpush3.msra.mxu1 %v9809_v55 }
 0x185   : > { %8080 = vmatmul.mubr.msk.f32.vlgmr.msra.gmra.mxu1 %vm701_vm3, %v709_v57  ;;  %8082 = vmatprep.subr.mxu1 %v9813_v56  ;;  %v9982_v57 = vld [vmem:[#allocation2] sm:$0xff] }
 0x186   : > { %8083 = vmatpush3.msra.mxu1 %v9813_v56  ;;  %8098 = vmatprep.mubr.msk.f32.mxu1 %vm701_vm3, %v891_v59  ;;  %v7075_v59 = vld [vmem:[%s11192_s0 + $0x20] sm:$0xff] }
 0x187   : > { %8084 = vmatprep.subr.mxu1 %v9817_v58  ;;  %2484 = vst.msk [vmem:[#allocation2 - $0x1] sm:$0x2] %vm415_vm1, %v7075_v59 }
 0x188   : > { %8085 = vmatpush3.msra.mxu1 %v9817_v58 }
 0x189   : > { %8086 = vmatprep.subr.mxu1 %v9823_v60 }
 0x18a   : > { %8087 = vmatpush3.msra.mxu1 %v9823_v60 }
 0x18b   : > { %8088 = vmatprep.subr.mxu1 %v9827_v61 }
 0x18c   : > { %8089 = vmatpush3.msra.mxu1 %v9827_v61 }
 0x18d   : > { %8090 = vmatprep.subr.mxu1 %v9831_v62 }
 0x18e   : > { %8091 = vmatpush3.msra.mxu1 %v9831_v62 }
 0x18f   : > { %8092 = vmatprep.subr.mxu1 %v9835_v63 }
 0x190   : > { %8093 = vmatpush3.msra.mxu1 %v9835_v63 }
 0x191   : > { %8094 = vmatprep.subr.mxu1 %v9839_v1 }
 0x192   : > { %8095 = vmatpush3.msra.mxu1 %v9839_v1 }
 0x193   : > { %8096 = vmatprep.subr.mxu1 %v9843_v2 }
 0x194   : > { %8097 = vmatpush3.msra.mxu1 %v9843_v2 }
 0x195   : > { %8099 = vmatmul.mubr.msk.f32.vlgmr.msra.gmra.mxu1 %vm701_vm3, %v892_v3  ;;  %8136 = vmatprep.subr.mxu1 %v9864_v8  ;;  %v1461_v3 = vld [vmem:[#allocation2 + $0x1] sm:$0xff] }
 0x196   : > { %8137 = vmatpush3.msra.mxu1 %v9864_v8 }
 0x197   : > { %8138 = vmatprep.subr.mxu1 %v9866_v9 }
 0x198   : > { %8139 = vmatpush3.msra.mxu1 %v9866_v9 }
 0x199   : > { %8140 = vmatprep.subr.mxu1 %v9874_v11 }
 0x19a   : > { %8141 = vmatpush3.msra.mxu1 %v9874_v11 }
 0x19b   : > { %8142 = vmatprep.subr.mxu1 %v9882_v13 }
 0x19c   : > { %8143 = vmatpush3.msra.mxu1 %v9882_v13 }
 0x19d   : > { %8144 = vmatprep.subr.mxu1 %v9890_v15 }
 0x19e   : > { %8145 = vmatpush3.msra.mxu1 %v9890_v15 }
 0x19f   : > { %8146 = vmatprep.subr.mxu1 %v9898_v26 }
 0x1a0   : > { %8147 = vmatpush3.msra.mxu1 %v9898_v26  ;;  %v10003_v26 = vld [vmem:[#allocation11 + $0x4] ss:$0 sm:$0xff] }
 0x1a1   : > { %8148 = vmatprep.subr.mxu1 %v9917_v30 }
 0x1a2   : > { %8149 = vmatpush3.msra.mxu1 %v9917_v30 }
 0x1a3   : > { %8150 = vmatprep.subr.mxu1 %v9923_v33 }
 0x1a4   : > { %8151 = vmatpush3.msra.mxu1 %v9923_v33 }
 0x1a5   : > { %8152 = vmatprep.subr.mxu1 %v9931_v35 }
 0x1a6   : > { %8153 = vmatpush3.msra.mxu1 %v9931_v35 }
 0x1a7   : > { %8154 = vmatprep.subr.mxu1 %v9939_v38 }
 0x1a8   : > { %8155 = vmatpush3.msra.mxu1 %v9939_v38 }
 0x1a9   : > { %8156 = vmatprep.subr.mxu1 %v9947_v41 }
 0x1aa   : > { %8157 = vmatpush3.msra.mxu1 %v9947_v41 }
 0x1ab   : > { %8158 = vmatprep.subr.mxu1 %v9955_v43 }
 0x1ac   : > { %8159 = vmatpush3.msra.mxu1 %v9955_v43  ;;  %v9993_v43 = vld [vmem:[#allocation2 + $0xa] sm:$0xff] }
 0x1ad   : > { %8160 = vmatprep.subr.mxu1 %v9963_v45 }
 0x1ae   : > { %8161 = vmatpush3.msra.mxu1 %v9963_v45  ;;  %v9990_v45 = vld [vmem:[#allocation2 + $0x2] sm:$0xff] }
 0x1af   : > { %8162 = vmatprep.subr.mxu1 %v9967_v46 }
 0x1b0   : > { %8163 = vmatpush3.msra.mxu1 %v9967_v46  ;;  %v9988_v46 = vld [vmem:[#allocation2 + $0x8] sm:$0xff] }
 0x1b1   : > { %8164 = vmatprep.subr.mxu1 %v9971_v47  ;;  %2482 = vst.msk [vmem:[#allocation2 + $0x1] sm:$0xff] %vm412_vm0, %v7075_v59 }
 0x1b2   : > { %8165 = vmatpush3.msra.mxu1 %v9971_v47  ;;  %v1462_v47 = vld [vmem:[#allocation2 + $0x9] sm:$0xff] }
 0x1b3   : > { %8166 = vmatprep.subr.mxu1 %v9975_v49 }
 0x1b4   : > { %8167 = vmatpush3.msra.mxu1 %v9975_v49 }
 0x1b5   : > { %8206 = vmatprep.subr.mxu1 %v9702_v0  ;;  %v7076_v0 = vld [vmem:[%s11192_s0 + $0x28] sm:$0xff] }
 0x1b6   : > { %2483 = vst.msk [vmem:[#allocation2 + $0x9] sm:$0xff] %vm412_vm0, %v7076_v0 }
 0x1b7   : > { %2485 = vst.msk [vmem:[#allocation2 + $0xb] sm:$0x40] %vm417_vm2, %v7076_v0  ;;  %v10006_v0 = vld [vmem:[#allocation11 + $0x5] ss:$0 sm:$0xff] }
 0x235   : > { %v8062_v49 = vpop.f32.mrf.mxu1 }
 0x237   : > { %v801_v41 = vpop.f32.mrf.mxu1 }
 0x245   : > { %v8081_v42 = vpop.f32.mrf.mxu1 }
 0x246   : > { %v888_v39 = vadd.f32 %v8081_v42, %v8062_v49 }
 0x247   : > { %v882_v38 = vpop.f32.mrf.mxu1 }
 0x248   : > { %v883_v33 = vadd.f32 %v882_v38, %v801_v41  ;;  %v9231_v38 = vld [vmem:[#allocation6 + $0x10] sm:$0xff]  ;;  %v9232_v41 = vld [vmem:[#allocation6 + $0x8] sm:$0xff] }
 0x255   : > { %v8100_v35 = vpop.f32.mrf.mxu1 }
 0x256   : > { %v984_v59 = vadd.f32 %v8100_v35, %v888_v39  ;;  %v10030_v39 = vld [vmem:[#allocation10 + $0x150] sm:$0xff] }
 0x257   : > { %v974_v34 = vpop.f32.mrf.mxu1 }
 0x258   : > { %v993_v30 = vadd.f32 %v10000_v36, %v984_v59  ;;  %v983_v32 = vadd.f32 %v974_v34, %v883_v33  ;;  %v10012_v33 = vld [vmem:[#allocation10 + $0x170] sm:$0xff]  ;;  %v9230_v34 = vld [vmem:[#allocation6 + $0x18] sm:$0xff] }
 0x259   : > { %v9233_v59 = vld [vmem:[#allocation6] sm:$0xff] }
 0x25a   : > { %v995_v29 = vmax.f32 %v993_v30, 0.0  ;;  %v992_v15 = vadd.f32 %v10000_v36, %v983_v32  ;;  %v10015_v30 = vld [vmem:[#allocation10 + $0x168] sm:$0xff]  ;;  %v10024_v32 = vld [vmem:[#allocation10 + $0x158] sm:$0xff] }
 0x25c   : > { %v1001_v28 = vmul.f32 %v10003_v26, %v995_v29  ;;  %v994_v13 = vmax.f32 %v992_v15, 0.0  ;;  %v10019_v15 = vld [vmem:[#allocation10 + $0x160] sm:$0xff] }
 0x25e   : > { %v1007_v42 = vadd.f32 %v10006_v0, %v1001_v28  ;;  %v1000_v49 = vmul.f32 %v10003_v26, %v994_v13 }
 0x260   : > { %1009 = vst [vmem:[#allocation4 + $0x9] sm:$0xff] %v1007_v42  ;;  %1011 = vst [vmem:[#allocation4 + $0xb] sm:$0x40] %v1007_v42  ;;  %v1006_v35 = vadd.f32 %v10006_v0, %v1000_v49  ;;  %v10047_v49 = vld [vmem:[#allocation10 + $0x138] sm:$0xff] }
 0x262   : > { %1008 = vst [vmem:[#allocation4 + $0x1] sm:$0xff] %v1006_v35  ;;  %1010 = vst [vmem:[#allocation4 - $0x1] sm:$0x2] %v1006_v35  ;;  %8133 = vmatprep.mubr.f32.mxu0 %v1006_v35 }
 0x263   : > { %8134 = vmatmul.mubr.f32.vlgmr.msra.gmra.mxu0 %v1007_v42  ;;  %v9234_v42 = vld [vmem:[#allocation6 + $0x28] sm:$0xff] }
 0x264   : > { %8172 = vmatpush3.msra.mxu0 %v9960_v44 }
 0x265   : > { %8173 = vmatprep.subr.mxu0 %v10012_v33 }
 0x266   : > { %8174 = vmatpush3.msra.mxu0 %v10012_v33 }
 0x267   : > { %8175 = vmatprep.subr.mxu0 %v10015_v30 }
 0x268   : > { %8176 = vmatpush3.msra.mxu0 %v10015_v30 }
 0x269   : > { %v1012_v13 = vld [vmem:[#allocation4] sm:$0xff]  ;;  %v1013_v28 = vld [vmem:[#allocation4 + $0x8] sm:$0xff]  ;;  %8177 = vmatprep.subr.mxu0 %v10019_v15 }
 0x26a   : > { %v1199_v29 = vld [vmem:[#allocation4 + $0x2] sm:$0xff]  ;;  %8168 = vmatprep.mubr.f32.mxu1 %v1012_v13  ;;  %8178 = vmatpush3.msra.mxu0 %v10019_v15 }
 0x26b   : > { %8203 = vmatprep.mubr.f32.mxu0 %v1199_v29  ;;  %8169 = vmatmul.mubr.f32.vlgmr.msra.gmra.mxu1 %v1013_v28 }
 0x26c   : > { %8207 = vmatpush3.msra.mxu1 %v9230_v34  ;;  %8210 = vmatprep.mubr.msk.f32.mxu1 %vm412_vm0, %v1461_v3  ;;  %v10036_v3 = vld [vmem:[#allocation10 + $0x148] sm:$0xff] }
 0x26d   : > { %8208 = vmatprep.subr.mxu1 %v9231_v38  ;;  %8179 = vmatprep.subr.mxu0 %v10024_v32 }
 0x26e   : > { %8209 = vmatpush3.msra.mxu1 %v9231_v38  ;;  %8180 = vmatpush3.msra.mxu0 %v10024_v32 }
 0x26f   : > { %8213 = vmatprep.subr.mxu1 %v9232_v41  ;;  %8211 = vmatmul.mubr.msk.f32.vlgmr.msra.gmra.mxu1 %vm412_vm0, %v1462_v47  ;;  %v10042_v47 = vld [vmem:[#allocation10 + $0x140] sm:$0xff] }
 0x270   : > { %8214 = vmatpush3.msra.mxu1 %v9232_v41  ;;  %8217 = vmatprep.mubr.msk.f32.mxu1 %vm412_vm0, %v9982_v57  ;;  %v9235_v57 = vld [vmem:[#allocation6 + $0x20] sm:$0xff] }
 0x271   : > { %8215 = vmatprep.subr.mxu1 %v9233_v59  ;;  %8181 = vmatprep.subr.mxu0 %v10030_v39 }
 0x272   : > { %8216 = vmatpush3.msra.mxu1 %v9233_v59  ;;  %8182 = vmatpush3.msra.mxu0 %v10030_v39 }
 0x273   : > { %8220 = vmatprep.subr.mxu1 %v9234_v42  ;;  %8218 = vmatmul.mubr.msk.f32.vlgmr.msra.gmra.mxu1 %vm412_vm0, %v9988_v46  ;;  %v10053_v46 = vld [vmem:[#allocation10 + $0x130] sm:$0xff] }
 0x274   : > { %8221 = vmatpush3.msra.mxu1 %v9234_v42  ;;  %8183 = vmatprep.subr.mxu0 %v10036_v3 }
 0x275   : > { %8222 = vmatprep.subr.mxu1 %v9235_v57  ;;  %8224 = vmatprep.mubr.msk.f32.mxu1 %vm412_vm0, %v9990_v45  ;;  %v10059_v45 = vld [vmem:[#allocation10 + $0x128] sm:$0xff] }
 0x276   : > { %8223 = vmatpush3.msra.mxu1 %v9235_v57  ;;  %8184 = vmatpush3.msra.mxu0 %v10036_v3 }
 0x277   : > { %8225 = vmatmul.mubr.msk.f32.vlgmr.msra.gmra.mxu1 %vm412_vm0, %v9993_v43  ;;  %8185 = vmatprep.subr.mxu0 %v10042_v47  ;;  %v10065_v43 = vld [vmem:[#allocation10 + $0x120] sm:$0xff] }
 0x278   : > { %8186 = vmatpush3.msra.mxu0 %v10042_v47  ;;  %8227 = vmatprep.subr.mxu1 %v9732_v16 }
 0x279   : > { %8187 = vmatprep.subr.mxu0 %v10047_v49  ;;  %8228 = vmatpush3.msra.mxu1 %v9732_v16  ;;  %v10071_v16 = vld [vmem:[#allocation10 + $0x118] sm:$0xff] }
 0x27a   : > { %8188 = vmatpush3.msra.mxu0 %v10047_v49  ;;  %8229 = vmatprep.subr.mxu1 %v9736_v17 }
 0x27b   : > { %8189 = vmatprep.subr.mxu0 %v10053_v46  ;;  %8230 = vmatpush3.msra.mxu1 %v9736_v17  ;;  %v10077_v17 = vld [vmem:[#allocation10 + $0x110] sm:$0xff] }
 0x27c   : > { %8190 = vmatpush3.msra.mxu0 %v10053_v46  ;;  %8231 = vmatprep.subr.mxu1 %v9740_v18 }
 0x27d   : > { %8191 = vmatprep.subr.mxu0 %v10059_v45  ;;  %8232 = vmatpush3.msra.mxu1 %v9740_v18  ;;  %v10083_v18 = vld [vmem:[#allocation10 + $0x108] sm:$0xff] }
 0x27e   : > { %8192 = vmatpush3.msra.mxu0 %v10059_v45  ;;  %8233 = vmatprep.subr.mxu1 %v9744_v19 }
 0x27f   : > { %8193 = vmatprep.subr.mxu0 %v10065_v43  ;;  %8234 = vmatpush3.msra.mxu1 %v9744_v19  ;;  %v10089_v19 = vld [vmem:[#allocation10 + $0x100] sm:$0xff] }
 0x280   : > { %8194 = vmatpush3.msra.mxu0 %v10065_v43  ;;  %8235 = vmatprep.subr.mxu1 %v9748_v20 }
 0x281   : > { %8195 = vmatprep.subr.mxu0 %v10071_v16  ;;  %8236 = vmatpush3.msra.mxu1 %v9748_v20  ;;  %v1200_v20 = vld [vmem:[#allocation4 + $0xa] sm:$0xff] }
 0x282   : > { %8196 = vmatpush3.msra.mxu0 %v10071_v16  ;;  %8237 = vmatprep.subr.mxu1 %v9751_v21 }
 0x283   : > { %8197 = vmatprep.subr.mxu0 %v10077_v17  ;;  %8238 = vmatpush3.msra.mxu1 %v9751_v21  ;;  %v9453_v21 = vmov 0.0  }
 0x284   : > { %8198 = vmatpush3.msra.mxu0 %v10077_v17  ;;  %8239 = vmatprep.subr.mxu1 %v9753_v22  ;;  %402 = vst [vmem:[#allocation5 + $0x40] sm:$0xff] %v9453_v21  ;;  %403 = vst [vmem:[#allocation5 + $0x48] sm:$0xff] %v9453_v21 }
 0x285   : > { %8199 = vmatprep.subr.mxu0 %v10083_v18  ;;  %8240 = vmatpush3.msra.mxu1 %v9753_v22  ;;  %404 = vst [vmem:[#allocation5 + $0x50] sm:$0xff] %v9453_v21  ;;  %405 = vst [vmem:[#allocation5 + $0x58] sm:$0xff] %v9453_v21 }
 0x286   : > { %8200 = vmatpush3.msra.mxu0 %v10083_v18  ;;  %8241 = vmatprep.subr.mxu1 %v9758_v23  ;;  %406 = vst [vmem:[#allocation5 + $0x60] sm:$0xff] %v9453_v21  ;;  %407 = vst [vmem:[#allocation5 + $0x68] sm:$0xff] %v9453_v21 }
 0x287   : > { %8201 = vmatprep.subr.mxu0 %v10089_v19  ;;  %8242 = vmatpush3.msra.mxu1 %v9758_v23  ;;  %408 = vst [vmem:[#allocation5 + $0x70] sm:$0xff] %v9453_v21  ;;  %409 = vst [vmem:[#allocation5 + $0x78] sm:$0xff] %v9453_v21 }
 0x288   : > { %8202 = vmatpush3.msra.mxu0 %v10089_v19  ;;  %8265 = vmatprep.subr.mxu1 %v9813_v56  ;;  %394 = vst [vmem:[#allocation5] sm:$0xff] %v9453_v21  ;;  %395 = vst [vmem:[#allocation5 + $0x8] sm:$0xff] %v9453_v21 }
 0x289   : > { %8204 = vmatmul.mubr.f32.vlgmr.msra.gmra.mxu0 %v1200_v20  ;;  %8246 = vmatprep.subr.mxu0 %v9764_v24  ;;  %396 = vst [vmem:[#allocation5 + $0x10] sm:$0xff] %v9453_v21  ;;  %397 = vst [vmem:[#allocation5 + $0x18] sm:$0xff] %v9453_v21 }
 0x28a   : > { %8247 = vmatpush3.msra.mxu0 %v9764_v24  ;;  %398 = vst [vmem:[#allocation5 + $0x20] sm:$0xff] %v9453_v21  ;;  %399 = vst [vmem:[#allocation5 + $0x28] sm:$0xff] %v9453_v21 }
 0x28b   : > { %8248 = vmatprep.subr.mxu0 %v9784_v48  ;;  %400 = vst [vmem:[#allocation5 + $0x30] sm:$0xff] %v9453_v21  ;;  %401 = vst [vmem:[#allocation5 + $0x38] sm:$0xff] %v9453_v21 }
 0x28c   : > { %8249 = vmatpush3.msra.mxu0 %v9784_v48 }
 0x28d   : > { %8250 = vmatprep.subr.mxu0 %v9789_v50 }
 0x28e   : > { %8251 = vmatpush3.msra.mxu0 %v9789_v50 }
 0x28f   : > { %8252 = vmatprep.subr.mxu0 %v9793_v51 }
 0x290   : > { %8253 = vmatpush3.msra.mxu0 %v9793_v51 }
 0x291   : > { %8254 = vmatprep.subr.mxu0 %v9797_v52 }
 0x292   : > { %8255 = vmatpush3.msra.mxu0 %v9797_v52 }
 0x293   : > { %8256 = vmatprep.subr.mxu0 %v9801_v53 }
 0x294   : > { %8257 = vmatpush3.msra.mxu0 %v9801_v53 }
 0x295   : > { %8258 = vmatprep.subr.mxu0 %v9805_v54 }
 0x296   : > { %8259 = vmatpush3.msra.mxu0 %v9805_v54 }
 0x297   : > { %8260 = vmatprep.subr.mxu0 %v9809_v55 }
 0x298   : > { %8261 = vmatpush3.msra.mxu0 %v9809_v55 }
 0x299   : > { %8284 = vmatprep.subr.mxu0 %v9850_v4 }
 0x323   : > { %v8135_v20 = vpop.f32.mrf.mxu0 }
 0x325   : > { %v1115_v21 = vpop.f32.mrf.mxu0 }
 0x32b   : > { %v8170_v22 = vpop.f32.mrf.mxu1 }
 0x32d   : > { %v1190_v23 = vpop.f32.mrf.mxu1 }
 0x32f   : > { %v8212_v24 = vpop.f32.mrf.mxu1 }
 0x331   : > { %v1537_v48 = vpop.f32.mrf.mxu1 }
 0x333   : > { %v8219_v50 = vpop.f32.mrf.mxu1 }
 0x334   : > { %v1624_v52 = vadd.f32 %v8219_v50, %v8212_v24  ;;  %v9454_v24 = vmov 1966171168   ;;  %v1324_v50 = vlaneseq }
 0x335   : > { %v1618_v51 = vpop.f32.mrf.mxu1 }
 0x336   : > { %v1619_v54 = vadd.f32 %v1618_v51, %v1537_v48  ;;  %v1322_v48 = vunpack.c.l.s4 %v9454_v24 }
 0x337   : > { %v8226_v53 = vpop.f32.mrf.mxu1 }
 0x338   : > { %v1713_v55 = vadd.f32 %v8226_v53, %v1624_v52  ;;  %v10127_v52 = vld [vmem:[#allocation11 + $0x6] ss:$0 sm:$0xff] }
 0x339   : > { %v1703_v35 = vpop.f32.mrf.mxu1 }
 0x33a   : > { %v1722_v13 = vadd.f32 %v9767_v31, %v1713_v55  ;;  %v1712_v28 = vadd.f32 %v1703_v35, %v1619_v54 }
 0x33c   : > { %v1724_v29 = vmax.f32 %v1722_v13, 0.0  ;;  %v1721_v34 = vadd.f32 %v9767_v31, %v1712_v28  ;;  %v1196_v31 = vadd.f32 %v8170_v22, %v8135_v20  ;;  %v1323_v28 = vunpack.c.0.s8 %v1322_v48 }
 0x33e   : > { %v1730_v38 = vmul.f32 %v9770_v37, %v1724_v29  ;;  %v1723_v41 = vmax.f32 %v1721_v34, 0.0  ;;  %v10130_v29 = vshrl.u32 %v1324_v50, 7 }
 0x340   : > { %v1736_v59 = vadd.f32 %v9773_v40, %v1730_v38  ;;  %v1729_v42 = vmul.f32 %v9770_v37, %v1723_v41  ;;  %v1191_v37 = vadd.f32 %v1190_v23, %v1115_v21  ;;  %11335 = vst [vmem:[#allocation39_spill] sm:$0xff] %v10130_v29  ;;  %v10134_v38 = vld [vmem:[#allocation11 + $0x7] ss:$0 sm:$0xff]  ;;  %v10147_v20 = vsub.s32 %v1323_v28, %v10130_v29  ;;  %v10575_v29 = vld [vmem:[#allocation10 + $0x178] sm:$0xff] }
 0x342   : > { %1740 = vst.msk [vmem:[#allocation3 + $0xb] sm:$0x40] %vm706_vm4, %v1736_v59  ;;  %v1735_v57 = vadd.f32 %v9773_v40, %v1729_v42  ;;  %v10141_v42 = vld [vmem:[#allocation11 + $0x8] ss:$0 sm:$0xff] }
 0x343   : > { %1738 = vst.msk [vmem:[#allocation3 + $0x9] sm:$0xff] %vm701_vm3, %v1736_v59 }
 0x344   : > { %1739 = vst.msk [vmem:[#allocation3 - $0x1] sm:$0x2] %vm704_vm5, %v1735_v57 }
 0x345   : > { %1737 = vst.msk [vmem:[#allocation3 + $0x1] sm:$0xff] %vm701_vm3, %v1735_v57 }
 0x349   : > { %v8205_v51 = vpop.f32.mrf.mxu0 }
 0x34a   : > { %v1294_v53 = vadd.f32 %v8205_v51, %v1196_v31  ;;  %v1752_v22 = vld [vmem:[#allocation3 + $0x9] sm:$0xff] }
 0x34b   : > { %v1284_v54 = vpop.f32.mrf.mxu0 }
 0x34c   : > { %v1751_v55 = vld [vmem:[#allocation3 + $0x1] sm:$0xff]  ;;  %v1303_v40 = vadd.f32 %v10127_v52, %v1294_v53  ;;  %v1293_v34 = vadd.f32 %v1284_v54, %v1191_v37 }
 0x34d   : > { %v1741_v35 = vld [vmem:[#allocation3] sm:$0xff]  ;;  %v1742_v13 = vld [vmem:[#allocation3 + $0x8] sm:$0xff]  ;;  %8243 = vmatprep.mubr.msk.f32.mxu1 %vm701_vm3, %v1751_v55 }
 0x34e   : > { %8262 = vmatprep.mubr.msk.f32.mxu0 %vm701_vm3, %v1741_v35  ;;  %8244 = vmatmul.mubr.msk.f32.vlgmr.msra.gmra.mxu1 %vm701_vm3, %v1752_v22  ;;  %v1923_v23 = vld [vmem:[#allocation3 + $0x2] sm:$0xff]  ;;  %v1305_v41 = vmax.f32 %v1303_v40, 0.0  ;;  %v1302_v59 = vadd.f32 %v10127_v52, %v1293_v34  ;;  %v1924_v22 = vld [vmem:[#allocation3 + $0xa] sm:$0xff] }
 0x34f   : > { %8263 = vmatmul.mubr.msk.f32.vlgmr.msra.gmra.mxu0 %vm701_vm3, %v1742_v13  ;;  %8266 = vmatpush3.msra.mxu1 %v9813_v56 }
 0x350   : > { %8281 = vmatprep.mubr.msk.f32.mxu1 %vm701_vm3, %v1923_v23  ;;  %8267 = vmatprep.subr.mxu1 %v9817_v58  ;;  %v1311_v57 = vmul.f32 %v10134_v38, %v1305_v41  ;;  %v1304_v21 = vmax.f32 %v1302_v59, 0.0 }
 0x351   : > { %8285 = vmatpush3.msra.mxu0 %v9850_v4  ;;  %8268 = vmatpush3.msra.mxu1 %v9817_v58 }
 0x352   : > { %8286 = vmatprep.subr.mxu0 %v9854_v5  ;;  %8269 = vmatprep.subr.mxu1 %v9823_v60  ;;  %v1317_v56 = vadd.f32 %v10141_v42, %v1311_v57  ;;  %v1310_v31 = vmul.f32 %v10134_v38, %v1304_v21  ;;  %v11344_v57 = vld [vmem:[#allocation26_spill] sm:$0xff]  ;;  %v11345_v21 = vld [vmem:[#allocation29_spill] sm:$0xff] }
 0x353   : > { %8287 = vmatpush3.msra.mxu0 %v9854_v5  ;;  %8270 = vmatpush3.msra.mxu1 %v9823_v60 }
 0x354   : > { %8288 = vmatprep.subr.mxu0 %v9858_v6  ;;  %8271 = vmatprep.subr.mxu1 %v9827_v61  ;;  %v1369_v4 = vcombine.high %v1317_v56, %v1317_v56  ;;  %v1376_v58 = vrot.slane %v1317_v56, %v10147_v20  ;;  %v1316_v24 = vadd.f32 %v10141_v42, %v1310_v31  ;;  %v11346_v56 = vld [vmem:[#allocation28_spill] sm:$0xff]  ;;  %v11347_v31 = vld [vmem:[#allocation31_spill] sm:$0xff] }
 0x355   : > { %8289 = vmatpush3.msra.mxu0 %v9858_v6  ;;  %8272 = vmatpush3.msra.mxu1 %v9827_v61 }
 0x356   : > { %8290 = vmatprep.subr.mxu0 %v9862_v7  ;;  %8273 = vmatprep.subr.mxu1 %v9831_v62  ;;  %v1383_v60 = vrot.slane %v1369_v4, %v10147_v20  ;;  %v1384_v5 = vcombine.high %v1376_v58, %v1376_v58  ;;  %v1392_v48 = vrot.slane %v1376_v58, %v10147_v20  ;;  %v11348_v4 = vld [vmem:[#allocation30_spill] sm:$0xff] }
 0x357   : > { %8291 = vmatpush3.msra.mxu0 %v9862_v7  ;;  %7040 = vst.sshfl [vmem:[#allocation5 + $0x40] sm:$0x1 pattern:$0x73625140] %v1376_v58  ;;  %v1320_v6 = vcombine.high %v1316_v24, %v1316_v24  ;;  %8274 = vmatpush3.msra.mxu1 %v9831_v62  ;;  %v1327_v50 = vrot.slane %v1316_v24, %v10147_v20  ;;  %v11349_v58 = vld [vmem:[#allocation33_spill] sm:$0xff]  ;;  %v11350_v24 = vld [vmem:[#allocation32_spill] sm:$0xff] }
 0x358   : > { %8275 = vmatprep.subr.mxu1 %v9835_v63  ;;  %8292 = vmatprep.subr.mxu0 %v9871_v10  ;;  %v1385_v61 = vcombine.high %v1383_v60, %v1383_v60  ;;  %v1399_v51 = vrot.slane %v1383_v60, %v10147_v20  ;;  %v1406_v7 = vrot.slane %v1384_v5, %v10147_v20 }
 0x359   : > { %v1414_v37 = vcombine.high %v1392_v48, %v1392_v48  ;;  %7041 = vst.sshfl [vmem:[#allocation5 + $0x48] sm:$0x1 pattern:$0x73625140] %v1384_v5  ;;  %8276 = vmatpush3.msra.mxu1 %v9835_v63  ;;  %v1334_v53 = vrot.slane %v1320_v6, %v10147_v20  ;;  %v1335_v54 = vcombine.high %v1327_v50, %v1327_v50  ;;  %v11352_v5 = vld [vmem:[#allocation35_spill] sm:$0xff]  ;;  %v11353_v48 = vld [vmem:[#allocation36_spill] sm:$0xff] }
 0x35a   : > { %7042 = vst.sshfl [vmem:[#allocation5 + $0x60] sm:$0x1 pattern:$0x73625140] %v1383_v60  ;;  %v1343_v62 = vrot.slane %v1327_v50, %v10147_v20  ;;  %8277 = vmatprep.subr.mxu1 %v9839_v1  ;;  %8293 = vmatpush3.msra.mxu0 %v9871_v10  ;;  %v1413_v55 = vrot.slane %v1385_v61, %v10147_v20  ;;  %v11351_v60 = vld [vmem:[#allocation34_spill] sm:$0xff]  ;;  %v11354_v6 = vld [vmem:[#allocation37_spill] sm:$0xff] }
 0x35b   : > { %7036 = vst.sshfl [vmem:[#allocation5] sm:$0x1 pattern:$0x73625140] %v1327_v50  ;;  %v1415_v35 = vcombine.high %v1399_v51, %v1399_v51  ;;  %v1416_v13 = vcombine.high %v1406_v7, %v1406_v7  ;;  %1444 = vst [vmem:[#allocation5 + $0x50] sm:$0x1] %v1414_v37  ;;  %8278 = vmatpush3.msra.mxu1 %v9839_v1  ;;  %8294 = vmatprep.subr.mxu0 %v9877_v12 }
 0x35c   : > { %7043 = vst.sshfl [vmem:[#allocation5 + $0x68] sm:$0x1 pattern:$0x73625140] %v1385_v61  ;;  %v1336_v63 = vcombine.high %v1334_v53, %v1334_v53  ;;  %v1350_v40 = vrot.slane %v1334_v53, %v10147_v20  ;;  %v1357_v28 = vrot.slane %v1335_v54, %v10147_v20  ;;  %v1365_v34 = vcombine.high %v1343_v62, %v1343_v62  ;;  %v11355_v50 = vld [vmem:[#allocation38_spill] sm:$0xff]  ;;  %v10241_v61 = vld [vmem:[#allocation6 + $0x18] sm:$0xff] }
 0x35d   : > { %7037 = vst.sshfl [vmem:[#allocation5 + $0x8] sm:$0x1 pattern:$0x73625140] %v1335_v54  ;;  %8279 = vmatprep.subr.mxu1 %v9843_v2  ;;  %v1417_v10 = vcombine.high %v1413_v55, %v1413_v55  ;;  %1445 = vst [vmem:[#allocation5 + $0x58] sm:$0x1] %v1416_v13  ;;  %8295 = vmatpush3.msra.mxu0 %v9877_v12 }
 0x35e   : > { %7038 = vst.sshfl [vmem:[#allocation5 + $0x20] sm:$0x1 pattern:$0x73625140] %v1334_v53  ;;  %1448 = vst [vmem:[#allocation5 + $0x70] sm:$0x1] %v1415_v35  ;;  %8280 = vmatpush3.msra.mxu1 %v9843_v2  ;;  %v1364_v1 = vrot.slane %v1336_v63, %v10147_v20  ;;  %v1366_v23 = vcombine.high %v1350_v40, %v1350_v40  ;;  %v1367_v41 = vcombine.high %v1357_v28, %v1357_v28 }
 0x35f   : > { %1436 = vst [vmem:[#allocation5 + $0x10] sm:$0x1] %v1365_v34  ;;  %7039 = vst.sshfl [vmem:[#allocation5 + $0x28] sm:$0x1 pattern:$0x73625140] %v1336_v63  ;;  %8282 = vmatmul.mubr.msk.f32.vlgmr.msra.gmra.mxu1 %vm701_vm3, %v1924_v22  ;;  %8319 = vmatprep.subr.mxu1 %v9864_v8 }
 0x360   : > { %1449 = vst [vmem:[#allocation5 + $0x78] sm:$0x1] %v1417_v10  ;;  %8320 = vmatpush3.msra.mxu1 %v9864_v8  ;;  %8296 = vmatprep.subr.mxu0 %v9887_v14  ;;  %v1368_v59 = vcombine.high %v1364_v1, %v1364_v1  ;;  %1437 = vst [vmem:[#allocation5 + $0x18] sm:$0x1] %v1367_v41  ;;  %v11336_v2 = vld [vmem:[#allocation19_spill] sm:$0xff]  ;;  %v11337_v8 = vld [vmem:[#allocation22_spill] sm:$0xff] }
 0x361   : > { %1440 = vst [vmem:[#allocation5 + $0x30] sm:$0x1] %v1366_v23  ;;  %8321 = vmatprep.subr.mxu1 %v9866_v9  ;;  %8297 = vmatpush3.msra.mxu0 %v9887_v14  ;;  %v11339_v12 = vld [vmem:[#allocation23_spill] sm:$0xff]  ;;  %v11340_v14 = vld [vmem:[#allocation21_spill] sm:$0xff]  ;;  %v2486_v51 = vld [vmem:[#allocation2] sm:$0xff] }
 0x362   : > { %8322 = vmatpush3.msra.mxu1 %v9866_v9  ;;  %8298 = vmatprep.subr.mxu0 %v9895_v25  ;;  %1441 = vst [vmem:[#allocation5 + $0x38] sm:$0x1] %v1368_v59  ;;  %v11338_v9 = vld [vmem:[#allocation20_spill] sm:$0xff]  ;;  %v7106_v7 = vld [vmem:[%s11192_s0 + $0x30] sm:$0xff]  ;;  %v10248_v53 = vld [vmem:[#allocation2 + $0x8] sm:$0xff] }
 0x363   : > { %8323 = vmatprep.subr.mxu1 %v9874_v11  ;;  %8299 = vmatpush3.msra.mxu0 %v9895_v25  ;;  %v11342_v25 = vld [vmem:[#allocation24_spill] sm:$0xff]  ;;  %3513 = vst.msk [vmem:[#allocation2 - $0x1] sm:$0x2] %vm415_vm1, %v7106_v7  ;;  %v2491_v62 = vld [vmem:[#allocation2 + $0x9] sm:$0xff]  ;;  %v7107_v35 = vld [vmem:[%s11192_s0 + $0x38] sm:$0xff] }
 0x364   : > { %8324 = vmatpush3.msra.mxu1 %v9874_v11  ;;  %8300 = vmatprep.subr.mxu0 %v9903_v27  ;;  %v11341_v11 = vld [vmem:[#allocation25_spill] sm:$0xff] }
 0x365   : > { %8325 = vmatprep.subr.mxu1 %v11336_v2  ;;  %8301 = vmatpush3.msra.mxu0 %v9903_v27  ;;  %v11343_v27 = vld [vmem:[#allocation27_spill] sm:$0xff]  ;;  %v2490_v37 = vld [vmem:[#allocation2 + $0x1] sm:$0xff]  ;;  %v10253_v55 = vld [vmem:[#allocation2 + $0xa] sm:$0xff] }
 0x366   : > { %8326 = vmatpush3.msra.mxu1 %v11336_v2  ;;  %8302 = vmatprep.subr.mxu0 %v11337_v8  ;;  %v10250_v54 = vld [vmem:[#allocation2 + $0x2] sm:$0xff]  ;;  %3514 = vst.msk [vmem:[#allocation2 + $0xb] sm:$0x40] %vm417_vm2, %v7107_v35 }
 0x367   : > { %8327 = vmatprep.subr.mxu1 %v11338_v9  ;;  %8303 = vmatpush3.msra.mxu0 %v11337_v8  ;;  %3511 = vst.msk [vmem:[#allocation2 + $0x1] sm:$0xff] %vm412_vm0, %v7106_v7  ;;  %3512 = vst.msk [vmem:[#allocation2 + $0x9] sm:$0xff] %vm412_vm0, %v7107_v35 }
 0x368   : > { %8328 = vmatpush3.msra.mxu1 %v11338_v9  ;;  %8304 = vmatprep.subr.mxu0 %v11339_v12 }
 0x369   : > { %8329 = vmatprep.subr.mxu1 %v11340_v14  ;;  %8305 = vmatpush3.msra.mxu0 %v11339_v12 }
 0x36a   : > { %8330 = vmatpush3.msra.mxu1 %v11340_v14  ;;  %8306 = vmatprep.subr.mxu0 %v11341_v11 }
 0x36b   : > { %8331 = vmatprep.subr.mxu1 %v11342_v25  ;;  %8307 = vmatpush3.msra.mxu0 %v11341_v11 }
 0x36c   : > { %8332 = vmatpush3.msra.mxu1 %v11342_v25  ;;  %8308 = vmatprep.subr.mxu0 %v11343_v27 }
 0x36d   : > { %8333 = vmatprep.subr.mxu1 %v11344_v57  ;;  %8309 = vmatpush3.msra.mxu0 %v11343_v27 }
 0x36e   : > { %8334 = vmatpush3.msra.mxu1 %v11344_v57  ;;  %8310 = vmatprep.subr.mxu0 %v11345_v21  ;;  %v10366_v57 = vld [vmem:[#allocation8 + $0x10] sm:$0xff] }
 0x36f   : > { %8335 = vmatprep.subr.mxu1 %v11346_v56  ;;  %8311 = vmatpush3.msra.mxu0 %v11345_v21  ;;  %v10370_v21 = vld [vmem:[#allocation8 + $0x48] sm:$0xff] }
 0x370   : > { %8336 = vmatpush3.msra.mxu1 %v11346_v56  ;;  %8312 = vmatprep.subr.mxu0 %v11347_v31  ;;  %v10374_v56 = vld [vmem:[#allocation8 + $0x8] sm:$0xff] }
 0x371   : > { %8337 = vmatprep.subr.mxu1 %v11348_v4  ;;  %8313 = vmatpush3.msra.mxu0 %v11347_v31  ;;  %v10382_v31 = vld [vmem:[#allocation8 + $0x40] sm:$0xff] }
 0x372   : > { %8338 = vmatpush3.msra.mxu1 %v11348_v4  ;;  %8314 = vmatprep.subr.mxu0 %v11349_v58  ;;  %v10386_v4 = vld [vmem:[#allocation8] sm:$0xff] }
 0x373   : > { %8339 = vmatprep.subr.mxu1 %v11350_v24  ;;  %8315 = vmatpush3.msra.mxu0 %v11349_v58  ;;  %v10391_v58 = vld [vmem:[#allocation8 + $0xb8] sm:$0xff] }
 0x374   : > { %8340 = vmatpush3.msra.mxu1 %v11350_v24  ;;  %8354 = vmatprep.subr.mxu0 %v9960_v44 }
 0x375   : > { %8341 = vmatprep.subr.mxu1 %v11351_v60 }
 0x376   : > { %8342 = vmatpush3.msra.mxu1 %v11351_v60 }
 0x377   : > { %8343 = vmatprep.subr.mxu1 %v11352_v5 }
 0x378   : > { %8344 = vmatpush3.msra.mxu1 %v11352_v5 }
 0x379   : > { %8345 = vmatprep.subr.mxu1 %v11353_v48 }
 0x37a   : > { %8346 = vmatpush3.msra.mxu1 %v11353_v48 }
 0x37b   : > { %8347 = vmatprep.subr.mxu1 %v11354_v6 }
 0x37c   : > { %8348 = vmatpush3.msra.mxu1 %v11354_v6 }
 0x37d   : > { %8349 = vmatprep.subr.mxu1 %v11355_v50 }
 0x37e   : > { %8350 = vmatpush3.msra.mxu1 %v11355_v50 }
 0x37f   : > { %8389 = vmatprep.subr.mxu1 %v10241_v61 }
 0x40e   : > { %v8245_v13 = vpop.f32.mrf.mxu1 }
 0x40f   : > { %v8264_v63 = vpop.f32.mrf.mxu0 }
 0x410   : > { %v1833_v40 = vpop.f32.mrf.mxu1  ;;  %v1920_v34 = vadd.f32 %v8264_v63, %v8245_v13  ;;  %v10397_v13 = vld [vmem:[#allocation11 + $0x1] ss:$0 sm:$0xff] }
 0x411   : > { %v1914_v28 = vpop.f32.mrf.mxu0 }
 0x412   : > { %v1915_v22 = vadd.f32 %v1914_v28, %v1833_v40  ;;  %v10400_v28 = vld [vmem:[#allocation11 + $0x2] ss:$0 sm:$0xff] }
 0x41f   : > { %v8283_v10 = vpop.f32.mrf.mxu1 }
 0x420   : > { %v2015_v1 = vadd.f32 %v8283_v10, %v1920_v34 }
 0x421   : > { %v2005_v23 = vpop.f32.mrf.mxu1 }
 0x422   : > { %v2024_v41 = vadd.f32 %v10000_v36, %v2015_v1  ;;  %v2014_v59 = vadd.f32 %v2005_v23, %v1915_v22 }
 0x424   : > { %v2026_v2 = vmax.f32 %v2024_v41, 0.0  ;;  %v2023_v8 = vadd.f32 %v10000_v36, %v2014_v59 }
 0x426   : > { %v2032_v9 = vmul.f32 %v10003_v26, %v2026_v2  ;;  %v2025_v12 = vmax.f32 %v2023_v8, 0.0 }
 0x428   : > { %v2038_v14 = vadd.f32 %v10006_v0, %v2032_v9  ;;  %v2031_v11 = vmul.f32 %v10003_v26, %v2025_v12 }
 0x42a   : > { %2040 = vst [vmem:[#allocation4 + $0x9] sm:$0xff] %v2038_v14  ;;  %2042 = vst [vmem:[#allocation4 + $0xb] sm:$0x40] %v2038_v14  ;;  %v2037_v25 = vadd.f32 %v10006_v0, %v2031_v11  ;;  %v10272_v0 = vld [vmem:[#allocation6 + $0x10] sm:$0xff] }
 0x42c   : > { %2039 = vst [vmem:[#allocation4 + $0x1] sm:$0xff] %v2037_v25  ;;  %2041 = vst [vmem:[#allocation4 - $0x1] sm:$0x2] %v2037_v25  ;;  %8316 = vmatprep.mubr.f32.mxu0 %v2037_v25 }
 0x42d   : > { %8317 = vmatmul.mubr.f32.vlgmr.msra.gmra.mxu0 %v2038_v14 }
 0x42e   : > { %8355 = vmatpush3.msra.mxu0 %v9960_v44  ;;  %v10277_v44 = vld [vmem:[#allocation6 + $0x8] sm:$0xff] }
 0x42f   : > { %8356 = vmatprep.subr.mxu0 %v10012_v33 }
 0x430   : > { %8357 = vmatpush3.msra.mxu0 %v10012_v33  ;;  %v10282_v33 = vld [vmem:[#allocation6] sm:$0xff] }
 0x431   : > { %8358 = vmatprep.subr.mxu0 %v10015_v30 }
 0x432   : > { %8359 = vmatpush3.msra.mxu0 %v10015_v30  ;;  %v10289_v30 = vld [vmem:[#allocation6 + $0x28] sm:$0xff] }
 0x433   : > { %v2043_v36 = vld [vmem:[#allocation4] sm:$0xff]  ;;  %v2044_v26 = vld [vmem:[#allocation4 + $0x8] sm:$0xff]  ;;  %8360 = vmatprep.subr.mxu0 %v10019_v15 }
 0x434   : > { %v2229_v27 = vld [vmem:[#allocation4 + $0x2] sm:$0xff]  ;;  %8351 = vmatprep.mubr.f32.mxu1 %v2043_v36  ;;  %8361 = vmatpush3.msra.mxu0 %v10019_v15  ;;  %v10294_v15 = vld [vmem:[#allocation6 + $0x20] sm:$0xff] }
 0x435   : > { %8386 = vmatprep.mubr.f32.mxu0 %v2229_v27  ;;  %8352 = vmatmul.mubr.f32.vlgmr.msra.gmra.mxu1 %v2044_v26 }
 0x436   : > { %8390 = vmatpush3.msra.mxu1 %v10241_v61  ;;  %8393 = vmatprep.mubr.msk.f32.mxu1 %vm412_vm0, %v2490_v37  ;;  %v10394_v37 = vld [vmem:[#allocation11] ss:$0 sm:$0xff] }
 0x437   : > { %8391 = vmatprep.subr.mxu1 %v10272_v0  ;;  %8362 = vmatprep.subr.mxu0 %v10024_v32 }
 0x438   : > { %8392 = vmatpush3.msra.mxu1 %v10272_v0  ;;  %8363 = vmatpush3.msra.mxu0 %v10024_v32  ;;  %v2230_v32 = vld [vmem:[#allocation4 + $0xa] sm:$0xff] }
 0x439   : > { %8396 = vmatprep.subr.mxu1 %v10277_v44  ;;  %8394 = vmatmul.mubr.msk.f32.vlgmr.msra.gmra.mxu1 %vm412_vm0, %v2491_v62 }
 0x43a   : > { %8397 = vmatpush3.msra.mxu1 %v10277_v44  ;;  %8400 = vmatprep.mubr.msk.f32.mxu1 %vm412_vm0, %v2486_v51 }
 0x43b   : > { %8398 = vmatprep.subr.mxu1 %v10282_v33  ;;  %8364 = vmatprep.subr.mxu0 %v10030_v39 }
 0x43c   : > { %8399 = vmatpush3.msra.mxu1 %v10282_v33  ;;  %8365 = vmatpush3.msra.mxu0 %v10030_v39  ;;  %v10327_v39 = vld [vmem:[#allocation8 + $0x78] sm:$0xff] }
 0x43d   : > { %8403 = vmatprep.subr.mxu1 %v10289_v30  ;;  %8401 = vmatmul.mubr.msk.f32.vlgmr.msra.gmra.mxu1 %vm412_vm0, %v10248_v53 }
 0x43e   : > { %8404 = vmatpush3.msra.mxu1 %v10289_v30  ;;  %8366 = vmatprep.subr.mxu0 %v10036_v3 }
 0x43f   : > { %8405 = vmatprep.subr.mxu1 %v10294_v15  ;;  %8407 = vmatprep.mubr.msk.f32.mxu1 %vm412_vm0, %v10250_v54 }
 0x440   : > { %8406 = vmatpush3.msra.mxu1 %v10294_v15  ;;  %8367 = vmatpush3.msra.mxu0 %v10036_v3  ;;  %v10330_v3 = vld [vmem:[#allocation8 + $0x38] sm:$0xff] }
 0x441   : > { %8408 = vmatmul.mubr.msk.f32.vlgmr.msra.gmra.mxu1 %vm412_vm0, %v10253_v55  ;;  %8368 = vmatprep.subr.mxu0 %v10042_v47 }
 0x442   : > { %8369 = vmatpush3.msra.mxu0 %v10042_v47  ;;  %8410 = vmatprep.subr.mxu1 %v10327_v39  ;;  %v10334_v47 = vld [vmem:[#allocation8 + $0x70] sm:$0xff] }
 0x443   : > { %8370 = vmatprep.subr.mxu0 %v10047_v49  ;;  %8411 = vmatpush3.msra.mxu1 %v10327_v39 }
 0x444   : > { %8371 = vmatpush3.msra.mxu0 %v10047_v49  ;;  %v10336_v49 = vld [vmem:[#allocation8 + $0x30] sm:$0xff]  ;;  %8412 = vmatprep.subr.mxu1 %v10334_v47 }
 0x445   : > { %8372 = vmatprep.subr.mxu0 %v10053_v46  ;;  %8413 = vmatpush3.msra.mxu1 %v10334_v47 }
 0x446   : > { %8373 = vmatpush3.msra.mxu0 %v10053_v46  ;;  %v10338_v46 = vld [vmem:[#allocation8 + $0x68] sm:$0xff] }
 0x447   : > { %8374 = vmatprep.subr.mxu0 %v10059_v45  ;;  %8414 = vmatprep.subr.mxu1 %v10338_v46 }
 0x448   : > { %8375 = vmatpush3.msra.mxu0 %v10059_v45  ;;  %v10342_v45 = vld [vmem:[#allocation8 + $0x28] sm:$0xff]  ;;  %8415 = vmatpush3.msra.mxu1 %v10338_v46 }
 0x449   : > { %8376 = vmatprep.subr.mxu0 %v10065_v43 }
 0x44a   : > { %8377 = vmatpush3.msra.mxu0 %v10065_v43  ;;  %v10346_v43 = vld [vmem:[#allocation8 + $0x60] sm:$0xff] }
 0x44b   : > { %8378 = vmatprep.subr.mxu0 %v10071_v16  ;;  %8416 = vmatprep.subr.mxu1 %v10346_v43 }
 0x44c   : > { %8379 = vmatpush3.msra.mxu0 %v10071_v16  ;;  %v10350_v16 = vld [vmem:[#allocation8 + $0x20] sm:$0xff]  ;;  %8417 = vmatpush3.msra.mxu1 %v10346_v43 }
 0x44d   : > { %8380 = vmatprep.subr.mxu0 %v10077_v17 }
 0x44e   : > { %8381 = vmatpush3.msra.mxu0 %v10077_v17  ;;  %v10354_v17 = vld [vmem:[#allocation8 + $0x58] sm:$0xff] }
 0x44f   : > { %8382 = vmatprep.subr.mxu0 %v10083_v18  ;;  %8418 = vmatprep.subr.mxu1 %v10354_v17 }
 0x450   : > { %8383 = vmatpush3.msra.mxu0 %v10083_v18  ;;  %v10358_v18 = vld [vmem:[#allocation8 + $0x18] sm:$0xff]  ;;  %8419 = vmatpush3.msra.mxu1 %v10354_v17 }
 0x451   : > { %8384 = vmatprep.subr.mxu0 %v10089_v19 }
 0x452   : > { %8385 = vmatpush3.msra.mxu0 %v10089_v19  ;;  %v10362_v19 = vld [vmem:[#allocation8 + $0x50] sm:$0xff] }
 0x453   : > { %8387 = vmatmul.mubr.f32.vlgmr.msra.gmra.mxu0 %v2230_v32  ;;  %8429 = vmatprep.subr.mxu0 %v10330_v3 }
 0x454   : > { %8430 = vmatpush3.msra.mxu0 %v10330_v3  ;;  %8420 = vmatprep.subr.mxu1 %v10362_v19 }
 0x455   : > { %8431 = vmatprep.subr.mxu0 %v10336_v49  ;;  %8421 = vmatpush3.msra.mxu1 %v10362_v19 }
 0x456   : > { %8432 = vmatpush3.msra.mxu0 %v10336_v49  ;;  %8422 = vmatprep.subr.mxu1 %v10370_v21 }
 0x457   : > { %8433 = vmatprep.subr.mxu0 %v10342_v45  ;;  %8423 = vmatpush3.msra.mxu1 %v10370_v21 }
 0x458   : > { %8434 = vmatpush3.msra.mxu0 %v10342_v45  ;;  %8424 = vmatprep.subr.mxu1 %v10382_v31 }
 0x459   : > { %8435 = vmatprep.subr.mxu0 %v10350_v16  ;;  %8425 = vmatpush3.msra.mxu1 %v10382_v31 }
 0x45a   : > { %8436 = vmatpush3.msra.mxu0 %v10350_v16  ;;  %8448 = vmatprep.subr.mxu1 %v10391_v58 }
 0x45b   : > { %8437 = vmatprep.subr.mxu0 %v10358_v18 }
 0x45c   : > { %8438 = vmatpush3.msra.mxu0 %v10358_v18 }
 0x45d   : > { %8439 = vmatprep.subr.mxu0 %v10366_v57 }
 0x45e   : > { %8440 = vmatpush3.msra.mxu0 %v10366_v57 }
 0x45f   : > { %8441 = vmatprep.subr.mxu0 %v10374_v56 }
 0x460   : > { %8442 = vmatpush3.msra.mxu0 %v10374_v56 }
 0x461   : > { %8443 = vmatprep.subr.mxu0 %v10386_v4 }
 0x462   : > { %8444 = vmatpush3.msra.mxu0 %v10386_v4 }
 0x4ed   : > { %v8318_v41 = vpop.f32.mrf.mxu0 }
 0x4ef   : > { %v2145_v59 = vpop.f32.mrf.mxu0 }
 0x4f5   : > { %v8353_v24 = vpop.f32.mrf.mxu1 }
 0x4f6   : > { %v2226_v2 = vadd.f32 %v8353_v24, %v8318_v41 }
 0x4f7   : > { %v2220_v60 = vpop.f32.mrf.mxu1 }
 0x4f8   : > { %v2221_v9 = vadd.f32 %v2220_v60, %v2145_v59 }
 0x4f9   : > { %v8395_v5 = vpop.f32.mrf.mxu1 }
 0x4fb   : > { %v2566_v48 = vpop.f32.mrf.mxu1 }
 0x4fd   : > { %v8402_v6 = vpop.f32.mrf.mxu1 }
 0x4fe   : > { %v2653_v51 = vadd.f32 %v8402_v6, %v8395_v5  ;;  %v10413_v5 = vld [vmem:[#allocation8 + $0xb0] sm:$0xff]  ;;  %v10420_v6 = vld [vmem:[#allocation8 + $0xa8] sm:$0xff] }
 0x4ff   : > { %v2647_v50 = vpop.f32.mrf.mxu1 }
 0x500   : > { %v2648_v53 = vadd.f32 %v2647_v50, %v2566_v48 }
 0x501   : > { %v8409_v7 = vpop.f32.mrf.mxu1 }
 0x502   : > { %v2742_v54 = vadd.f32 %v8409_v7, %v2653_v51  ;;  %v10425_v7 = vld [vmem:[#allocation8 + $0xa0] sm:$0xff] }
 0x503   : > { %v2732_v62 = vpop.f32.mrf.mxu1 }
 0x504   : > { %v2751_v55 = vadd.f32 %v10394_v37, %v2742_v54  ;;  %v2741_v35 = vadd.f32 %v2732_v62, %v2648_v53  ;;  %v10431_v54 = vld [vmem:[#allocation8 + $0x98] sm:$0xff] }
 0x506   : > { %v2753_v63 = vmax.f32 %v2751_v55, 0.0  ;;  %v2750_v40 = vadd.f32 %v10394_v37, %v2741_v35 }
 0x508   : > { %v2759_v34 = vmul.f32 %v10397_v13, %v2753_v63  ;;  %v2752_v10 = vmax.f32 %v2750_v40, 0.0  ;;  %v10437_v63 = vld [vmem:[#allocation8 + $0x90] sm:$0xff] }
 0x50a   : > { %v2765_v22 = vadd.f32 %v10400_v28, %v2759_v34  ;;  %v2758_v1 = vmul.f32 %v10397_v13, %v2752_v10 }
 0x50c   : > { %2769 = vst.msk [vmem:[#allocation3 + $0xb] sm:$0x40] %vm706_vm4, %v2765_v22  ;;  %v2764_v23 = vadd.f32 %v10400_v28, %v2758_v1 }
 0x50d   : > { %2767 = vst.msk [vmem:[#allocation3 + $0x9] sm:$0xff] %vm701_vm3, %v2765_v22  ;;  %v10443_v22 = vld [vmem:[#allocation8 + $0x88] sm:$0xff] }
 0x50e   : > { %2768 = vst.msk [vmem:[#allocation3 - $0x1] sm:$0x2] %vm704_vm5, %v2764_v23 }
 0x50f   : > { %2766 = vst.msk [vmem:[#allocation3 + $0x1] sm:$0xff] %vm701_vm3, %v2764_v23 }
 0x513   : > { %v8388_v8 = vpop.f32.mrf.mxu0 }
 0x514   : > { %v2323_v12 = vadd.f32 %v8388_v8, %v2226_v2  ;;  %v2781_v32 = vld [vmem:[#allocation3 + $0x9] sm:$0xff]  ;;  %v10450_v2 = vld [vmem:[#allocation8 + $0x80] sm:$0xff] }
 0x515   : > { %v2313_v14 = vpop.f32.mrf.mxu0 }
 0x516   : > { %v2780_v11 = vld [vmem:[#allocation3 + $0x1] sm:$0xff]  ;;  %v2332_v26 = vadd.f32 %v10127_v52, %v2323_v12  ;;  %v2322_v27 = vadd.f32 %v2313_v14, %v2221_v9 }
 0x517   : > { %v2770_v25 = vld [vmem:[#allocation3] sm:$0xff]  ;;  %v2771_v36 = vld [vmem:[#allocation3 + $0x8] sm:$0xff]  ;;  %8426 = vmatprep.mubr.msk.f32.mxu1 %vm701_vm3, %v2780_v11 }
 0x518   : > { %8445 = vmatprep.mubr.msk.f32.mxu0 %vm701_vm3, %v2770_v25  ;;  %8427 = vmatmul.mubr.msk.f32.vlgmr.msra.gmra.mxu1 %vm701_vm3, %v2781_v32  ;;  %v2952_v24 = vld [vmem:[#allocation3 + $0x2] sm:$0xff]  ;;  %v2334_v60 = vmax.f32 %v2332_v26, 0.0  ;;  %v2331_v48 = vadd.f32 %v10127_v52, %v2322_v27 }
 0x519   : > { %8446 = vmatmul.mubr.msk.f32.vlgmr.msra.gmra.mxu0 %vm701_vm3, %v2771_v36  ;;  %8449 = vmatpush3.msra.mxu1 %v10391_v58 }
 0x51a   : > { %8464 = vmatprep.mubr.msk.f32.mxu1 %vm701_vm3, %v2952_v24  ;;  %8450 = vmatprep.subr.mxu1 %v10413_v5  ;;  %v2340_v50 = vmul.f32 %v10134_v38, %v2334_v60  ;;  %v2333_v51 = vmax.f32 %v2331_v48, 0.0  ;;  %v2953_v60 = vld [vmem:[#allocation3 + $0xa] sm:$0xff] }
 0x51b   : > { %8451 = vmatpush3.msra.mxu1 %v10413_v5 }
 0x51c   : > { %8452 = vmatprep.subr.mxu1 %v10420_v6  ;;  %v2346_v53 = vadd.f32 %v10141_v42, %v2340_v50  ;;  %v2339_v52 = vmul.f32 %v10134_v38, %v2333_v51 }
 0x51d   : > { %8453 = vmatpush3.msra.mxu1 %v10420_v6 }
 0x51e   : > { %8454 = vmatprep.subr.mxu1 %v10425_v7  ;;  %v2398_v62 = vcombine.high %v2346_v53, %v2346_v53  ;;  %v2405_v55 = vrot.slane %v2346_v53, %v10147_v20  ;;  %v2345_v35 = vadd.f32 %v10141_v42, %v2339_v52  ;;  %v10463_v52 = vld [vmem:[#allocation10 + $0xf8] sm:$0xff] }
 0x51f   : > { %8455 = vmatpush3.msra.mxu1 %v10425_v7  ;;  %8467 = vmatprep.subr.mxu0 %v10463_v52 }
 0x520   : > { %8456 = vmatprep.subr.mxu1 %v10431_v54  ;;  %v2412_v40 = vrot.slane %v2398_v62, %v10147_v20  ;;  %v2413_v38 = vcombine.high %v2405_v55, %v2405_v55  ;;  %v2421_v34 = vrot.slane %v2405_v55, %v10147_v20  ;;  %7071 = vst.sshfl [vmem:[#allocation5 + $0x41] sm:$0x1 pattern:$0x73625140] %v2405_v55  ;;  %v10465_v62 = vld [vmem:[#allocation10 + $0x78] sm:$0xff]  ;;  %v10467_v55 = vld [vmem:[#allocation10 + $0xf0] sm:$0xff] }
 0x521   : > { %v2349_v10 = vcombine.high %v2345_v35, %v2345_v35  ;;  %8457 = vmatpush3.msra.mxu1 %v10431_v54  ;;  %v2356_v1 = vrot.slane %v2345_v35, %v10147_v20  ;;  %v10471_v35 = vld [vmem:[#allocation10 + $0x70] sm:$0xff]  ;;  %8468 = vmatpush3.msra.mxu0 %v10463_v52 }
 0x522   : > { %8458 = vmatprep.subr.mxu1 %v10437_v63  ;;  %v2414_v42 = vcombine.high %v2412_v40, %v2412_v40  ;;  %v2428_v23 = vrot.slane %v2412_v40, %v10147_v20  ;;  %v2435_v41 = vrot.slane %v2413_v38, %v10147_v20  ;;  %v2443_v59 = vcombine.high %v2421_v34, %v2421_v34  ;;  %v10483_v34 = vld [vmem:[#allocation10 + $0xe0] sm:$0xff] }
 0x523   : > { %7072 = vst.sshfl [vmem:[#allocation5 + $0x49] sm:$0x1 pattern:$0x73625140] %v2413_v38  ;;  %8459 = vmatpush3.msra.mxu1 %v10437_v63  ;;  %v2363_v8 = vrot.slane %v2349_v10, %v10147_v20  ;;  %v2364_v9 = vcombine.high %v2356_v1, %v2356_v1  ;;  %v2372_v12 = vrot.slane %v2356_v1, %v10147_v20  ;;  %v10477_v38 = vld [vmem:[#allocation10 + $0x68] sm:$0xff]  ;;  %v10485_v10 = vld [vmem:[#allocation10 + $0x60] sm:$0xff] }
 0x524   : > { %7073 = vst.sshfl [vmem:[#allocation5 + $0x61] sm:$0x1 pattern:$0x73625140] %v2412_v40  ;;  %8460 = vmatprep.subr.mxu1 %v10443_v22  ;;  %v2442_v14 = vrot.slane %v2414_v42, %v10147_v20  ;;  %v2444_v11 = vcombine.high %v2428_v23, %v2428_v23  ;;  %v2445_v25 = vcombine.high %v2435_v41, %v2435_v41  ;;  %2473 = vst [vmem:[#allocation5 + $0x51] sm:$0x1] %v2443_v59 }
 0x525   : > { %7067 = vst.sshfl [vmem:[#allocation5 + $0x1] sm:$0x1 pattern:$0x73625140] %v2356_v1  ;;  %8461 = vmatpush3.msra.mxu1 %v10443_v22  ;;  %v2365_v36 = vcombine.high %v2363_v8, %v2363_v8  ;;  %v2379_v26 = vrot.slane %v2363_v8, %v10147_v20  ;;  %v2386_v27 = vrot.slane %v2364_v9, %v10147_v20  ;;  %v10475_v40 = vld [vmem:[#allocation10 + $0xe8] sm:$0xff]  ;;  %11356 = vst [vmem:[#allocation19_spill] sm:$0xff] %v10485_v10 }
 0x526   : > { %7074 = vst.sshfl [vmem:[#allocation5 + $0x69] sm:$0x1 pattern:$0x73625140] %v2414_v42  ;;  %v2394_v32 = vcombine.high %v2372_v12, %v2372_v12  ;;  %8462 = vmatprep.subr.mxu1 %v10450_v2  ;;  %v2446_v24 = vcombine.high %v2442_v14, %v2442_v14  ;;  %2474 = vst [vmem:[#allocation5 + $0x59] sm:$0x1] %v2445_v25  ;;  %8469 = vmatprep.subr.mxu0 %v10467_v55 }
 0x527   : > { %7068 = vst.sshfl [vmem:[#allocation5 + $0x9] sm:$0x1 pattern:$0x73625140] %v2364_v9  ;;  %2477 = vst [vmem:[#allocation5 + $0x71] sm:$0x1] %v2444_v11  ;;  %8463 = vmatpush3.msra.mxu1 %v10450_v2  ;;  %v2393_v48 = vrot.slane %v2365_v36, %v10147_v20  ;;  %v2395_v50 = vcombine.high %v2379_v26, %v2379_v26  ;;  %v2396_v51 = vcombine.high %v2386_v27, %v2386_v27 }
 0x528   : > { %7069 = vst.sshfl [vmem:[#allocation5 + $0x21] sm:$0x1 pattern:$0x73625140] %v2363_v8  ;;  %2465 = vst [vmem:[#allocation5 + $0x11] sm:$0x1] %v2394_v32  ;;  %8465 = vmatmul.mubr.msk.f32.vlgmr.msra.gmra.mxu1 %vm701_vm3, %v2953_v60  ;;  %8502 = vmatprep.subr.mxu1 %v10465_v62 }
 0x529   : > { %7070 = vst.sshfl [vmem:[#allocation5 + $0x29] sm:$0x1 pattern:$0x73625140] %v2365_v36  ;;  %2478 = vst [vmem:[#allocation5 + $0x79] sm:$0x1] %v2446_v24  ;;  %v2397_v53 = vcombine.high %v2393_v48, %v2393_v48  ;;  %8503 = vmatpush3.msra.mxu1 %v10465_v62  ;;  %8470 = vmatpush3.msra.mxu0 %v10467_v55 }
 0x52a   : > { %2466 = vst [vmem:[#allocation5 + $0x19] sm:$0x1] %v2396_v51  ;;  %2469 = vst [vmem:[#allocation5 + $0x31] sm:$0x1] %v2395_v50  ;;  %8504 = vmatprep.subr.mxu1 %v10471_v35  ;;  %8471 = vmatprep.subr.mxu0 %v10475_v40  ;;  %v10491_v1 = vld [vmem:[#allocation10 + $0xd8] sm:$0xff]  ;;  %v10499_v23 = vld [vmem:[#allocation10 + $0xd0] sm:$0xff] }
 0x52b   : > { %2470 = vst [vmem:[#allocation5 + $0x39] sm:$0x1] %v2397_v53  ;;  %8505 = vmatpush3.msra.mxu1 %v10471_v35  ;;  %8472 = vmatpush3.msra.mxu0 %v10475_v40  ;;  %v10493_v42 = vld [vmem:[#allocation10 + $0x58] sm:$0xff]  ;;  %v10501_v41 = vld [vmem:[#allocation10 + $0x50] sm:$0xff]  ;;  %v10511_v59 = vld [vmem:[#allocation10 + $0xc8] sm:$0xff] }
 0x52c   : > { %8506 = vmatprep.subr.mxu1 %v10477_v38  ;;  %11357 = vst [vmem:[#allocation22_spill] sm:$0xff] %v10493_v42  ;;  %8473 = vmatprep.subr.mxu0 %v10483_v34  ;;  %11358 = vst [vmem:[#allocation20_spill] sm:$0xff] %v10501_v41  ;;  %v10515_v8 = vld [vmem:[#allocation10 + $0xc0] sm:$0xff]  ;;  %v10518_v9 = vld [vmem:[#allocation10 + $0xb8] sm:$0xff] }
 0x52d   : > { %8507 = vmatpush3.msra.mxu1 %v10477_v38  ;;  %8474 = vmatpush3.msra.mxu0 %v10483_v34  ;;  %11359 = vst [vmem:[#allocation23_spill] sm:$0xff] %v10518_v9  ;;  %v10522_v12 = vld [vmem:[#allocation10 + $0xb0] sm:$0xff]  ;;  %v10526_v14 = vld [vmem:[#allocation10 + $0xa8] sm:$0xff]  ;;  %v10533_v25 = vld [vmem:[#allocation10 + $0xa0] sm:$0xff] }
 0x52e   : > { %8508 = vmatprep.subr.mxu1 %v10485_v10  ;;  %8475 = vmatprep.subr.mxu0 %v10491_v1  ;;  %11360 = vst [vmem:[#allocation21_spill] sm:$0xff] %v10522_v12  ;;  %11361 = vst [vmem:[#allocation25_spill] sm:$0xff] %v10526_v14  ;;  %v10528_v11 = vld [vmem:[#allocation10 + $0x48] sm:$0xff]  ;;  %v10536_v36 = vld [vmem:[#allocation10 + $0x40] sm:$0xff] }
 0x52f   : > { %8509 = vmatpush3.msra.mxu1 %v10485_v10  ;;  %8476 = vmatpush3.msra.mxu0 %v10491_v1  ;;  %11362 = vst [vmem:[#allocation24_spill] sm:$0xff] %v10528_v11  ;;  %11363 = vst [vmem:[#allocation27_spill] sm:$0xff] %v10533_v25  ;;  %v10541_v26 = vld [vmem:[#allocation10 + $0x98] sm:$0xff]  ;;  %v10548_v32 = vld [vmem:[#allocation10 + $0x30] sm:$0xff] }
 0x530   : > { %8510 = vmatprep.subr.mxu1 %v10493_v42  ;;  %8477 = vmatprep.subr.mxu0 %v10499_v23  ;;  %11364 = vst [vmem:[#allocation26_spill] sm:$0xff] %v10536_v36  ;;  %11365 = vst [vmem:[#allocation29_spill] sm:$0xff] %v10541_v26  ;;  %v10544_v27 = vld [vmem:[#allocation10 + $0x38] sm:$0xff]  ;;  %v10552_v24 = vld [vmem:[#allocation10 + $0x28] sm:$0xff] }
 0x531   : > { %8511 = vmatpush3.msra.mxu1 %v10493_v42  ;;  %8478 = vmatpush3.msra.mxu0 %v10499_v23  ;;  %11366 = vst [vmem:[#allocation28_spill] sm:$0xff] %v10544_v27  ;;  %11367 = vst [vmem:[#allocation31_spill] sm:$0xff] %v10548_v32  ;;  %v10555_v60 = vld [vmem:[#allocation10 + $0x90] sm:$0xff]  ;;  %v10559_v48 = vld [vmem:[#allocation10 + $0x88] sm:$0xff] }
 0x532   : > { %8512 = vmatprep.subr.mxu1 %v10501_v41  ;;  %8479 = vmatprep.subr.mxu0 %v10511_v59  ;;  %11368 = vst [vmem:[#allocation30_spill] sm:$0xff] %v10552_v24  ;;  %11369 = vst [vmem:[#allocation33_spill] sm:$0xff] %v10555_v60  ;;  %v10562_v50 = vld [vmem:[#allocation10 + $0x20] sm:$0xff]  ;;  %v10570_v53 = vld [vmem:[#allocation10 + $0x18] sm:$0xff] }
 0x533   : > { %8513 = vmatpush3.msra.mxu1 %v10501_v41  ;;  %8480 = vmatpush3.msra.mxu0 %v10511_v59  ;;  %11370 = vst [vmem:[#allocation32_spill] sm:$0xff] %v10559_v48  ;;  %11371 = vst [vmem:[#allocation34_spill] sm:$0xff] %v10562_v50  ;;  %v10565_v51 = vld [vmem:[#allocation10 + $0x80] sm:$0xff] }
 0x534   : > { %8481 = vmatprep.subr.mxu0 %v10515_v8  ;;  %8514 = vmatprep.subr.mxu1 %v10528_v11  ;;  %11372 = vst [vmem:[#allocation35_spill] sm:$0xff] %v10565_v51  ;;  %11373 = vst [vmem:[#allocation36_spill] sm:$0xff] %v10570_v53 }
 0x535   : > { %8482 = vmatpush3.msra.mxu0 %v10515_v8  ;;  %8515 = vmatpush3.msra.mxu1 %v10528_v11 }
 0x536   : > { %8483 = vmatprep.subr.mxu0 %v10518_v9  ;;  %8516 = vmatprep.subr.mxu1 %v10536_v36 }
 0x537   : > { %8484 = vmatpush3.msra.mxu0 %v10518_v9  ;;  %8517 = vmatpush3.msra.mxu1 %v10536_v36 }
 0x538   : > { %8485 = vmatprep.subr.mxu0 %v10522_v12  ;;  %8518 = vmatprep.subr.mxu1 %v10544_v27 }
 0x539   : > { %8486 = vmatpush3.msra.mxu0 %v10522_v12  ;;  %8519 = vmatpush3.msra.mxu1 %v10544_v27  ;;  %v10601_v12 = vld [vmem:[#allocation11 + $0x5] ss:$0 sm:$0xff] }
 0x53a   : > { %8487 = vmatprep.subr.mxu0 %v10526_v14  ;;  %8520 = vmatprep.subr.mxu1 %v10548_v32 }
 0x53b   : > { %8488 = vmatpush3.msra.mxu0 %v10526_v14  ;;  %8521 = vmatpush3.msra.mxu1 %v10548_v32  ;;  %v10578_v32 = vld [vmem:[#allocation10 + $0x10] sm:$0xff]  ;;  %v10598_v14 = vld [vmem:[#allocation11 + $0x4] ss:$0 sm:$0xff] }
 0x53c   : > { %8489 = vmatprep.subr.mxu0 %v10533_v25  ;;  %8522 = vmatprep.subr.mxu1 %v10552_v24  ;;  %11374 = vst [vmem:[#allocation37_spill] sm:$0xff] %v10578_v32 }
 0x53d   : > { %8490 = vmatpush3.msra.mxu0 %v10533_v25  ;;  %8523 = vmatpush3.msra.mxu1 %v10552_v24  ;;  %v10584_v24 = vld [vmem:[#allocation10 + $0x8] sm:$0xff] }
 0x53e   : > { %8491 = vmatprep.subr.mxu0 %v10541_v26  ;;  %8524 = vmatprep.subr.mxu1 %v10562_v50  ;;  %11375 = vst [vmem:[#allocation38_spill] sm:$0xff] %v10584_v24 }
 0x53f   : > { %8492 = vmatpush3.msra.mxu0 %v10541_v26  ;;  %8525 = vmatpush3.msra.mxu1 %v10562_v50  ;;  %v10595_v26 = vld [vmem:[#allocation11 + $0x3] ss:$0 sm:$0xff] }
 0x540   : > { %8493 = vmatprep.subr.mxu0 %v10555_v60  ;;  %8526 = vmatprep.subr.mxu1 %v10570_v53 }
 0x541   : > { %8494 = vmatpush3.msra.mxu0 %v10555_v60  ;;  %8527 = vmatpush3.msra.mxu1 %v10570_v53 }
 0x542   : > { %8495 = vmatprep.subr.mxu0 %v10559_v48  ;;  %8528 = vmatprep.subr.mxu1 %v10578_v32 }
 0x543   : > { %8496 = vmatpush3.msra.mxu0 %v10559_v48  ;;  %8529 = vmatpush3.msra.mxu1 %v10578_v32  ;;  %v10588_v48 = vld [vmem:[#allocation10] sm:$0xff] }
 0x544   : > { %8497 = vmatprep.subr.mxu0 %v10565_v51  ;;  %11376 = vst [vmem:[#allocation40_spill] sm:$0xff] %v10588_v48  ;;  %8530 = vmatprep.subr.mxu1 %v10584_v24 }
 0x545   : > { %8498 = vmatpush3.msra.mxu0 %v10565_v51  ;;  %8531 = vmatpush3.msra.mxu1 %v10584_v24 }
 0x546   : > { %8537 = vmatprep.subr.mxu0 %v10575_v29  ;;  %8532 = vmatprep.subr.mxu1 %v10588_v48 }
 0x547   : > { %8533 = vmatpush3.msra.mxu1 %v10588_v48 }
 0x548   : > { %8572 = vmatprep.subr.mxu1 %v10241_v61 }
 0x5d8   : > { %v8428_v50 = vpop.f32.mrf.mxu1 }
 0x5d9   : > { %v8447_v53 = vpop.f32.mrf.mxu0 }
 0x5da   : > { %v2862_v51 = vpop.f32.mrf.mxu1  ;;  %v2949_v60 = vadd.f32 %v8447_v53, %v8428_v50 }
 0x5db   : > { %v2943_v27 = vpop.f32.mrf.mxu0 }
 0x5dc   : > { %v2944_v32 = vadd.f32 %v2943_v27, %v2862_v51  ;;  %v10636_v51 = vld [vmem:[#allocation10 + $0x148] sm:$0xff] }
 0x5e8   : > { %v8466_v36 = vpop.f32.mrf.mxu1 }
 0x5e9   : > { %v3044_v11 = vadd.f32 %v8466_v36, %v2949_v60  ;;  %v3515_v60 = vld [vmem:[#allocation2] sm:$0xff] }
 0x5ea   : > { %v3034_v25 = vpop.f32.mrf.mxu1 }
 0x5eb   : > { %v3053_v41 = vadd.f32 %v10595_v26, %v3044_v11  ;;  %v3043_v24 = vadd.f32 %v3034_v25, %v2944_v32  ;;  %v10607_v11 = vld [vmem:[#allocation10 + $0x170] sm:$0xff]  ;;  %v10619_v32 = vld [vmem:[#allocation10 + $0x158] sm:$0xff] }
 0x5ed   : > { %v3055_v42 = vmax.f32 %v3053_v41, 0.0  ;;  %v3052_v48 = vadd.f32 %v10595_v26, %v3043_v24  ;;  %v10610_v41 = vld [vmem:[#allocation10 + $0x168] sm:$0xff]  ;;  %v3520_v24 = vld [vmem:[#allocation2 + $0x9] sm:$0xff] }
 0x5ef   : > { %v3061_v10 = vmul.f32 %v10598_v14, %v3055_v42  ;;  %v3054_v9 = vmax.f32 %v3052_v48, 0.0  ;;  %v3519_v42 = vld [vmem:[#allocation2 + $0x1] sm:$0xff] }
 0x5f0   : > { %v10628_v48 = vld [vmem:[#allocation10 + $0x150] sm:$0xff] }
 0x5f1   : > { %v3067_v50 = vadd.f32 %v10601_v12, %v3061_v10  ;;  %v3060_v53 = vmul.f32 %v10598_v14, %v3054_v9  ;;  %v10614_v10 = vld [vmem:[#allocation10 + $0x160] sm:$0xff] }
 0x5f3   : > { %3071 = vst [vmem:[#allocation4 + $0xb] sm:$0x40] %v3067_v50  ;;  %3069 = vst [vmem:[#allocation4 + $0x9] sm:$0xff] %v3067_v50  ;;  %v3066_v36 = vadd.f32 %v10601_v12, %v3060_v53  ;;  %v10667_v53 = vld [vmem:[#allocation10 + $0x120] sm:$0xff] }
 0x5f5   : > { %3070 = vst [vmem:[#allocation4 - $0x1] sm:$0x2] %v3066_v36  ;;  %3068 = vst [vmem:[#allocation4 + $0x1] sm:$0xff] %v3066_v36  ;;  %8499 = vmatprep.mubr.f32.mxu0 %v3066_v36 }
 0x5f6   : > { %8500 = vmatmul.mubr.f32.vlgmr.msra.gmra.mxu0 %v3067_v50  ;;  %v10644_v50 = vld [vmem:[#allocation10 + $0x140] sm:$0xff] }
 0x5f7   : > { %8538 = vmatpush3.msra.mxu0 %v10575_v29 }
 0x5f8   : > { %8539 = vmatprep.subr.mxu0 %v10607_v11 }
 0x5f9   : > { %8540 = vmatpush3.msra.mxu0 %v10607_v11 }
 0x5fa   : > { %8541 = vmatprep.subr.mxu0 %v10610_v41 }
 0x5fb   : > { %8542 = vmatpush3.msra.mxu0 %v10610_v41 }
 0x5fc   : > { %v3072_v9 = vld [vmem:[#allocation4] sm:$0xff]  ;;  %v3073_v25 = vld [vmem:[#allocation4 + $0x8] sm:$0xff]  ;;  %8543 = vmatprep.subr.mxu0 %v10614_v10 }
 0x5fd   : > { %v3258_v27 = vld [vmem:[#allocation4 + $0x2] sm:$0xff]  ;;  %8534 = vmatprep.mubr.f32.mxu1 %v3072_v9  ;;  %8544 = vmatpush3.msra.mxu0 %v10614_v10 }
 0x5fe   : > { %8569 = vmatprep.mubr.f32.mxu0 %v3258_v27  ;;  %8535 = vmatmul.mubr.f32.vlgmr.msra.gmra.mxu1 %v3073_v25 }
 0x5ff   : > { %8573 = vmatpush3.msra.mxu1 %v10241_v61  ;;  %8576 = vmatprep.mubr.msk.f32.mxu1 %vm412_vm0, %v3519_v42  ;;  %v3516_v61 = vld [vmem:[#allocation2 + $0x8] sm:$0xff] }
 0x600   : > { %8574 = vmatprep.subr.mxu1 %v10272_v0  ;;  %8545 = vmatprep.subr.mxu0 %v10619_v32 }
 0x601   : > { %8575 = vmatpush3.msra.mxu1 %v10272_v0  ;;  %8546 = vmatpush3.msra.mxu0 %v10619_v32  ;;  %v3685_v0 = vld [vmem:[#allocation2 + $0x2] sm:$0xff] }
 0x602   : > { %8579 = vmatprep.subr.mxu1 %v10277_v44  ;;  %8577 = vmatmul.mubr.msk.f32.vlgmr.msra.gmra.mxu1 %vm412_vm0, %v3520_v24 }
 0x603   : > { %8580 = vmatpush3.msra.mxu1 %v10277_v44  ;;  %8583 = vmatprep.mubr.msk.f32.mxu1 %vm412_vm0, %v3515_v60  ;;  %v3686_v44 = vld [vmem:[#allocation2 + $0xa] sm:$0xff] }
 0x604   : > { %8581 = vmatprep.subr.mxu1 %v10282_v33  ;;  %8547 = vmatprep.subr.mxu0 %v10628_v48 }
 0x605   : > { %8582 = vmatpush3.msra.mxu1 %v10282_v33  ;;  %8548 = vmatpush3.msra.mxu0 %v10628_v48  ;;  %v10650_v33 = vld [vmem:[#allocation10 + $0x138] sm:$0xff] }
 0x606   : > { %8586 = vmatprep.subr.mxu1 %v10289_v30  ;;  %8584 = vmatmul.mubr.msk.f32.vlgmr.msra.gmra.mxu1 %vm412_vm0, %v3516_v61 }
 0x607   : > { %8587 = vmatpush3.msra.mxu1 %v10289_v30  ;;  %8549 = vmatprep.subr.mxu0 %v10636_v51  ;;  %v10655_v30 = vld [vmem:[#allocation10 + $0x130] sm:$0xff] }
 0x608   : > { %8588 = vmatprep.subr.mxu1 %v10294_v15  ;;  %8590 = vmatprep.mubr.msk.f32.mxu1 %vm412_vm0, %v3685_v0 }
 0x609   : > { %8589 = vmatpush3.msra.mxu1 %v10294_v15  ;;  %8550 = vmatpush3.msra.mxu0 %v10636_v51  ;;  %v10661_v15 = vld [vmem:[#allocation10 + $0x128] sm:$0xff] }
 0x60a   : > { %8591 = vmatmul.mubr.msk.f32.vlgmr.msra.gmra.mxu1 %vm412_vm0, %v3686_v44  ;;  %8551 = vmatprep.subr.mxu0 %v10644_v50 }
 0x60b   : > { %8552 = vmatpush3.msra.mxu0 %v10644_v50  ;;  %8593 = vmatprep.subr.mxu1 %v10327_v39 }
 0x60c   : > { %8553 = vmatprep.subr.mxu0 %v10650_v33  ;;  %8594 = vmatpush3.msra.mxu1 %v10327_v39  ;;  %v10673_v39 = vld [vmem:[#allocation10 + $0x118] sm:$0xff] }
 0x60d   : > { %8554 = vmatpush3.msra.mxu0 %v10650_v33  ;;  %8595 = vmatprep.subr.mxu1 %v10334_v47 }
 0x60e   : > { %8555 = vmatprep.subr.mxu0 %v10655_v30  ;;  %8596 = vmatpush3.msra.mxu1 %v10334_v47  ;;  %v10679_v47 = vld [vmem:[#allocation10 + $0x110] sm:$0xff] }
 0x60f   : > { %8556 = vmatpush3.msra.mxu0 %v10655_v30  ;;  %8597 = vmatprep.subr.mxu1 %v10338_v46 }
 0x610   : > { %8557 = vmatprep.subr.mxu0 %v10661_v15  ;;  %8598 = vmatpush3.msra.mxu1 %v10338_v46  ;;  %v10685_v46 = vld [vmem:[#allocation10 + $0x108] sm:$0xff] }
 0x611   : > { %8558 = vmatpush3.msra.mxu0 %v10661_v15  ;;  %8599 = vmatprep.subr.mxu1 %v10346_v43 }
 0x612   : > { %8559 = vmatprep.subr.mxu0 %v10667_v53  ;;  %8600 = vmatpush3.msra.mxu1 %v10346_v43  ;;  %v10691_v43 = vld [vmem:[#allocation10 + $0x100] sm:$0xff] }
 0x613   : > { %8560 = vmatpush3.msra.mxu0 %v10667_v53  ;;  %8601 = vmatprep.subr.mxu1 %v10354_v17 }
 0x614   : > { %8561 = vmatprep.subr.mxu0 %v10673_v39  ;;  %8602 = vmatpush3.msra.mxu1 %v10354_v17  ;;  %v3259_v17 = vld [vmem:[#allocation4 + $0xa] sm:$0xff] }
 0x615   : > { %8562 = vmatpush3.msra.mxu0 %v10673_v39  ;;  %8603 = vmatprep.subr.mxu1 %v10362_v19 }
 0x616   : > { %8563 = vmatprep.subr.mxu0 %v10679_v47  ;;  %8604 = vmatpush3.msra.mxu1 %v10362_v19 }
 0x617   : > { %8564 = vmatpush3.msra.mxu0 %v10679_v47  ;;  %8605 = vmatprep.subr.mxu1 %v10370_v21 }
 0x618   : > { %8565 = vmatprep.subr.mxu0 %v10685_v46  ;;  %8606 = vmatpush3.msra.mxu1 %v10370_v21 }
 0x619   : > { %8566 = vmatpush3.msra.mxu0 %v10685_v46  ;;  %8607 = vmatprep.subr.mxu1 %v10382_v31 }
 0x61a   : > { %8567 = vmatprep.subr.mxu0 %v10691_v43  ;;  %8608 = vmatpush3.msra.mxu1 %v10382_v31 }
 0x61b   : > { %8568 = vmatpush3.msra.mxu0 %v10691_v43  ;;  %8631 = vmatprep.subr.mxu1 %v10391_v58 }
 0x61c   : > { %8570 = vmatmul.mubr.f32.vlgmr.msra.gmra.mxu0 %v3259_v17  ;;  %8612 = vmatprep.subr.mxu0 %v10330_v3 }
 0x61d   : > { %8613 = vmatpush3.msra.mxu0 %v10330_v3 }
 0x61e   : > { %8614 = vmatprep.subr.mxu0 %v10336_v49 }
 0x61f   : > { %8615 = vmatpush3.msra.mxu0 %v10336_v49 }
 0x620   : > { %8616 = vmatprep.subr.mxu0 %v10342_v45 }
 0x621   : > { %8617 = vmatpush3.msra.mxu0 %v10342_v45 }
 0x622   : > { %8618 = vmatprep.subr.mxu0 %v10350_v16 }
 0x623   : > { %8619 = vmatpush3.msra.mxu0 %v10350_v16 }
 0x624   : > { %8620 = vmatprep.subr.mxu0 %v10358_v18 }
 0x625   : > { %8621 = vmatpush3.msra.mxu0 %v10358_v18 }
 0x626   : > { %8622 = vmatprep.subr.mxu0 %v10366_v57 }
 0x627   : > { %8623 = vmatpush3.msra.mxu0 %v10366_v57 }
 0x628   : > { %8624 = vmatprep.subr.mxu0 %v10374_v56 }
 0x629   : > { %8625 = vmatpush3.msra.mxu0 %v10374_v56 }
 0x62a   : > { %8626 = vmatprep.subr.mxu0 %v10386_v4 }
 0x62b   : > { %8627 = vmatpush3.msra.mxu0 %v10386_v4 }
 0x62c   : > { %8650 = vmatprep.subr.mxu0 %v10463_v52 }
 0x6b6   : > { %v8501_v44 = vpop.f32.mrf.mxu0 }
 0x6b8   : > { %v3174_v17 = vpop.f32.mrf.mxu0 }
 0x6be   : > { %v8536_v3 = vpop.f32.mrf.mxu1 }
 0x6c0   : > { %v3249_v49 = vpop.f32.mrf.mxu1 }
 0x6c2   : > { %v8578_v45 = vpop.f32.mrf.mxu1 }
 0x6c4   : > { %v3595_v16 = vpop.f32.mrf.mxu1 }
 0x6c6   : > { %v8585_v19 = vpop.f32.mrf.mxu1 }
 0x6c7   : > { %v3682_v21 = vadd.f32 %v8585_v19, %v8578_v45  ;;  %v3250_v19 = vadd.f32 %v3249_v49, %v3174_v17 }
 0x6c8   : > { %v3676_v18 = vpop.f32.mrf.mxu1 }
 0x6c9   : > { %v3677_v36 = vadd.f32 %v3676_v18, %v3595_v16  ;;  %v10729_v16 = vld [vmem:[#allocation11 + $0x6] ss:$0 sm:$0xff] }
 0x6ca   : > { %v8592_v31 = vpop.f32.mrf.mxu1 }
 0x6cb   : > { %v3771_v57 = vadd.f32 %v8592_v31, %v3682_v21 }
 0x6cc   : > { %v3761_v42 = vpop.f32.mrf.mxu1 }
 0x6cd   : > { %v3780_v9 = vadd.f32 %v10394_v37, %v3771_v57  ;;  %v3770_v56 = vadd.f32 %v3761_v42, %v3677_v36 }
 0x6cf   : > { %v3782_v25 = vmax.f32 %v3780_v9, 0.0  ;;  %v3779_v27 = vadd.f32 %v10394_v37, %v3770_v56  ;;  %v3255_v37 = vadd.f32 %v8536_v3, %v8501_v44  ;;  %v10734_v9 = vld [vmem:[#allocation11 + $0x7] ss:$0 sm:$0xff] }
 0x6d1   : > { %v3788_v4 = vmul.f32 %v10397_v13, %v3782_v25  ;;  %v3781_v24 = vmax.f32 %v3779_v27, 0.0  ;;  %v10741_v25 = vld [vmem:[#allocation11 + $0x8] ss:$0 sm:$0xff] }
 0x6d3   : > { %v3794_v60 = vadd.f32 %v10400_v28, %v3788_v4  ;;  %v3787_v61 = vmul.f32 %v10397_v13, %v3781_v24 }
 0x6d5   : > { %3798 = vst.msk [vmem:[#allocation3 + $0xb] sm:$0x40] %vm706_vm4, %v3794_v60  ;;  %v3793_v0 = vadd.f32 %v10400_v28, %v3787_v61 }
 0x6d6   : > { %3796 = vst.msk [vmem:[#allocation3 + $0x9] sm:$0xff] %vm701_vm3, %v3794_v60 }
 0x6d7   : > { %3797 = vst.msk [vmem:[#allocation3 - $0x1] sm:$0x2] %vm704_vm5, %v3793_v0 }
 0x6d8   : > { %3795 = vst.msk [vmem:[#allocation3 + $0x1] sm:$0xff] %vm701_vm3, %v3793_v0 }
 0x6dc   : > { %v8571_v45 = vpop.f32.mrf.mxu0 }
 0x6dd   : > { %v3352_v18 = vadd.f32 %v8571_v45, %v3255_v37  ;;  %v3810_v28 = vld [vmem:[#allocation3 + $0x9] sm:$0xff] }
 0x6de   : > { %v3342_v21 = vpop.f32.mrf.mxu0 }
 0x6df   : > { %v3809_v13 = vld [vmem:[#allocation3 + $0x1] sm:$0xff]  ;;  %v3361_v57 = vadd.f32 %v10729_v16, %v3352_v18  ;;  %v3351_v42 = vadd.f32 %v3342_v21, %v3250_v19 }
 0x6e0   : > { %v3799_v31 = vld [vmem:[#allocation3] sm:$0xff]  ;;  %v3800_v36 = vld [vmem:[#allocation3 + $0x8] sm:$0xff]  ;;  %8609 = vmatprep.mubr.msk.f32.mxu1 %vm701_vm3, %v3809_v13 }
 0x6e1   : > { %8628 = vmatprep.mubr.msk.f32.mxu0 %vm701_vm3, %v3799_v31  ;;  %8610 = vmatmul.mubr.msk.f32.vlgmr.msra.gmra.mxu1 %vm701_vm3, %v3810_v28  ;;  %v3981_v3 = vld [vmem:[#allocation3 + $0x2] sm:$0xff]  ;;  %v3363_v49 = vmax.f32 %v3361_v57, 0.0  ;;  %v3360_v56 = vadd.f32 %v10729_v16, %v3351_v42  ;;  %v3982_v57 = vld [vmem:[#allocation3 + $0xa] sm:$0xff] }
 0x6e2   : > { %8629 = vmatmul.mubr.msk.f32.vlgmr.msra.gmra.mxu0 %vm701_vm3, %v3800_v36  ;;  %8632 = vmatpush3.msra.mxu1 %v10391_v58 }
 0x6e3   : > { %8647 = vmatprep.mubr.msk.f32.mxu1 %vm701_vm3, %v3981_v3  ;;  %8633 = vmatprep.subr.mxu1 %v10413_v5  ;;  %v3369_v27 = vmul.f32 %v10734_v9, %v3363_v49  ;;  %v3362_v4 = vmax.f32 %v3360_v56, 0.0  ;;  %v11384_v49 = vld [vmem:[#allocation24_spill] sm:$0xff]  ;;  %v11385_v56 = vld [vmem:[#allocation29_spill] sm:$0xff] }
 0x6e4   : > { %8651 = vmatpush3.msra.mxu0 %v10463_v52  ;;  %8634 = vmatpush3.msra.mxu1 %v10413_v5 }
 0x6e5   : > { %8652 = vmatprep.subr.mxu0 %v10467_v55  ;;  %8635 = vmatprep.subr.mxu1 %v10420_v6  ;;  %v3375_v58 = vadd.f32 %v10741_v25, %v3369_v27  ;;  %v3368_v24 = vmul.f32 %v10734_v9, %v3362_v4  ;;  %v11386_v27 = vld [vmem:[#allocation26_spill] sm:$0xff]  ;;  %v11387_v4 = vld [vmem:[#allocation33_spill] sm:$0xff] }
 0x6e6   : > { %8653 = vmatpush3.msra.mxu0 %v10467_v55  ;;  %8636 = vmatpush3.msra.mxu1 %v10420_v6 }
 0x6e7   : > { %8654 = vmatprep.subr.mxu0 %v10475_v40  ;;  %8637 = vmatprep.subr.mxu1 %v10425_v7  ;;  %v3427_v52 = vcombine.high %v3375_v58, %v3375_v58  ;;  %v3434_v5 = vrot.slane %v3375_v58, %v10147_v20  ;;  %v3374_v60 = vadd.f32 %v10741_v25, %v3368_v24  ;;  %v11388_v58 = vld [vmem:[#allocation28_spill] sm:$0xff] }
 0x6e8   : > { %8655 = vmatpush3.msra.mxu0 %v10475_v40  ;;  %8638 = vmatpush3.msra.mxu1 %v10425_v7  ;;  %v11389_v24 = vld [vmem:[#allocation32_spill] sm:$0xff] }
 0x6e9   : > { %8656 = vmatprep.subr.mxu0 %v10483_v34  ;;  %8639 = vmatprep.subr.mxu1 %v10431_v54  ;;  %v3441_v6 = vrot.slane %v3427_v52, %v10147_v20  ;;  %v3442_v55 = vcombine.high %v3434_v5, %v3434_v5  ;;  %v3450_v61 = vrot.slane %v3434_v5, %v10147_v20  ;;  %v11390_v52 = vld [vmem:[#allocation31_spill] sm:$0xff] }
 0x6ea   : > { %8657 = vmatpush3.msra.mxu0 %v10483_v34  ;;  %7102 = vst.sshfl [vmem:[#allocation5 + $0x42] sm:$0x1 pattern:$0x73625140] %v3434_v5  ;;  %v3378_v40 = vcombine.high %v3374_v60, %v3374_v60  ;;  %8640 = vmatpush3.msra.mxu1 %v10431_v54  ;;  %v3385_v0 = vrot.slane %v3374_v60, %v10147_v20  ;;  %v11391_v5 = vld [vmem:[#allocation35_spill] sm:$0xff]  ;;  %v11392_v60 = vld [vmem:[#allocation30_spill] sm:$0xff] }
 0x6eb   : > { %8641 = vmatprep.subr.mxu1 %v10437_v63  ;;  %8658 = vmatprep.subr.mxu0 %v10491_v1  ;;  %v3443_v7 = vcombine.high %v3441_v6, %v3441_v6  ;;  %v3457_v44 = vrot.slane %v3441_v6, %v10147_v20  ;;  %v3464_v34 = vrot.slane %v3442_v55, %v10147_v20 }
 0x6ec   : > { %v3472_v17 = vcombine.high %v3450_v61, %v3450_v61  ;;  %7103 = vst.sshfl [vmem:[#allocation5 + $0x4a] sm:$0x1 pattern:$0x73625140] %v3442_v55  ;;  %8642 = vmatpush3.msra.mxu1 %v10437_v63  ;;  %v3392_v37 = vrot.slane %v3378_v40, %v10147_v20  ;;  %v3393_v45 = vcombine.high %v3385_v0, %v3385_v0  ;;  %v11394_v55 = vld [vmem:[#allocation36_spill] sm:$0xff]  ;;  %v11395_v61 = vld [vmem:[#allocation37_spill] sm:$0xff] }
 0x6ed   : > { %7104 = vst.sshfl [vmem:[#allocation5 + $0x62] sm:$0x1 pattern:$0x73625140] %v3441_v6  ;;  %v3401_v54 = vrot.slane %v3385_v0, %v10147_v20  ;;  %8643 = vmatprep.subr.mxu1 %v10443_v22  ;;  %8659 = vmatpush3.msra.mxu0 %v10491_v1  ;;  %v3471_v19 = vrot.slane %v3443_v7, %v10147_v20  ;;  %v11393_v6 = vld [vmem:[#allocation34_spill] sm:$0xff] }
 0x6ee   : > { %7098 = vst.sshfl [vmem:[#allocation5 + $0x2] sm:$0x1 pattern:$0x73625140] %v3385_v0  ;;  %v3473_v18 = vcombine.high %v3457_v44, %v3457_v44  ;;  %v3474_v21 = vcombine.high %v3464_v34, %v3464_v34  ;;  %3502 = vst [vmem:[#allocation5 + $0x52] sm:$0x1] %v3472_v17  ;;  %8644 = vmatpush3.msra.mxu1 %v10443_v22  ;;  %8660 = vmatprep.subr.mxu0 %v10499_v23 }
 0x6ef   : > { %7105 = vst.sshfl [vmem:[#allocation5 + $0x6a] sm:$0x1 pattern:$0x73625140] %v3443_v7  ;;  %v3394_v63 = vcombine.high %v3392_v37, %v3392_v37  ;;  %v3408_v13 = vrot.slane %v3392_v37, %v10147_v20  ;;  %v3415_v31 = vrot.slane %v3393_v45, %v10147_v20  ;;  %v3423_v36 = vcombine.high %v3401_v54, %v3401_v54  ;;  %v11396_v40 = vld [vmem:[#allocation38_spill] sm:$0xff]  ;;  %v11397_v0 = vld [vmem:[#allocation40_spill] sm:$0xff] }
 0x6f0   : > { %7099 = vst.sshfl [vmem:[#allocation5 + $0xa] sm:$0x1 pattern:$0x73625140] %v3393_v45  ;;  %8645 = vmatprep.subr.mxu1 %v10450_v2  ;;  %v3475_v1 = vcombine.high %v3471_v19, %v3471_v19  ;;  %3503 = vst [vmem:[#allocation5 + $0x5a] sm:$0x1] %v3474_v21  ;;  %8661 = vmatpush3.msra.mxu0 %v10499_v23 }
 0x6f1   : > { %7100 = vst.sshfl [vmem:[#allocation5 + $0x22] sm:$0x1 pattern:$0x73625140] %v3392_v37  ;;  %3506 = vst [vmem:[#allocation5 + $0x72] sm:$0x1] %v3473_v18  ;;  %8646 = vmatpush3.msra.mxu1 %v10450_v2  ;;  %v3422_v22 = vrot.slane %v3394_v63, %v10147_v20  ;;  %v3424_v42 = vcombine.high %v3408_v13, %v3408_v13  ;;  %v3425_v28 = vcombine.high %v3415_v31, %v3415_v31 }
 0x6f2   : > { %3494 = vst [vmem:[#allocation5 + $0x12] sm:$0x1] %v3423_v36  ;;  %7101 = vst.sshfl [vmem:[#allocation5 + $0x2a] sm:$0x1 pattern:$0x73625140] %v3394_v63  ;;  %8648 = vmatmul.mubr.msk.f32.vlgmr.msra.gmra.mxu1 %vm701_vm3, %v3982_v57  ;;  %8685 = vmatprep.subr.mxu1 %v10465_v62 }
 0x6f3   : > { %3507 = vst [vmem:[#allocation5 + $0x7a] sm:$0x1] %v3475_v1  ;;  %8686 = vmatpush3.msra.mxu1 %v10465_v62  ;;  %8662 = vmatprep.subr.mxu0 %v10511_v59  ;;  %v3426_v3 = vcombine.high %v3422_v22, %v3422_v22  ;;  %3495 = vst [vmem:[#allocation5 + $0x1a] sm:$0x1] %v3425_v28  ;;  %v11377_v2 = vld [vmem:[#allocation23_spill] sm:$0xff]  ;;  %v11379_v23 = vld [vmem:[#allocation21_spill] sm:$0xff] }
 0x6f4   : > { %3498 = vst [vmem:[#allocation5 + $0x32] sm:$0x1] %v3424_v42  ;;  %8687 = vmatprep.subr.mxu1 %v10471_v35  ;;  %8663 = vmatpush3.msra.mxu0 %v10511_v59  ;;  %v11378_v62 = vld [vmem:[#allocation19_spill] sm:$0xff]  ;;  %v11381_v59 = vld [vmem:[#allocation25_spill] sm:$0xff] }
 0x6f5   : > { %8688 = vmatpush3.msra.mxu1 %v10471_v35  ;;  %8664 = vmatprep.subr.mxu0 %v10515_v8  ;;  %3499 = vst [vmem:[#allocation5 + $0x3a] sm:$0x1] %v3426_v3  ;;  %v11380_v35 = vld [vmem:[#allocation22_spill] sm:$0xff]  ;;  %v8872_v3 = vld [vmem:[%s9696_s21 + $0x34] ss:$8 sps:$4 sm:$0xff]  }
 0x6f6   : > { %8689 = vmatprep.subr.mxu1 %v10477_v38  ;;  %8665 = vmatpush3.msra.mxu0 %v10515_v8  ;;  %v11382_v8 = vld [vmem:[#allocation20_spill] sm:$0xff] }
 0x6f7   : > { %8690 = vmatpush3.msra.mxu1 %v10477_v38  ;;  %8666 = vmatprep.subr.mxu0 %v11377_v2  ;;  %v11383_v38 = vld [vmem:[#allocation27_spill] sm:$0xff] }
 0x6f8   : > { %8691 = vmatprep.subr.mxu1 %v11378_v62  ;;  %8667 = vmatpush3.msra.mxu0 %v11377_v2  ;;  %v8870_v2 = vld [vmem:[%s9696_s21 + $0x30] ss:$8 sps:$4 sm:$0xff]  }
 0x6f9   : > { %8692 = vmatpush3.msra.mxu1 %v11378_v62  ;;  %8668 = vmatprep.subr.mxu0 %v11379_v23  ;;  %v8875_v62 = vld [vmem:[%s9696_s21 + $0xb4] ss:$8 sps:$4 sm:$0xff]  }
 0x6fa   : > { %8693 = vmatprep.subr.mxu1 %v11380_v35  ;;  %8669 = vmatpush3.msra.mxu0 %v11379_v23  ;;  %v8873_v23 = vld [vmem:[%s9696_s21 + $0xb0] ss:$8 sps:$4 sm:$0xff]  }
 0x6fb   : > { %8694 = vmatpush3.msra.mxu1 %v11380_v35  ;;  %8670 = vmatprep.subr.mxu0 %v11381_v59  ;;  %v8878_v35 = vld [vmem:[%s9696_s21 + $0x24] ss:$8 sps:$4 sm:$0xff]  }
 0x6fc   : > { %8695 = vmatprep.subr.mxu1 %v11382_v8  ;;  %8671 = vmatpush3.msra.mxu0 %v11381_v59  ;;  %v8876_v59 = vld [vmem:[%s9696_s21 + $0x20] ss:$8 sps:$4 sm:$0xff]  }
 0x6fd   : > { %8696 = vmatpush3.msra.mxu1 %v11382_v8  ;;  %8672 = vmatprep.subr.mxu0 %v11383_v38  ;;  %v8881_v8 = vld [vmem:[%s9696_s21 + $0xa4] ss:$8 sps:$4 sm:$0xff]  }
 0x6fe   : > { %8697 = vmatprep.subr.mxu1 %v11384_v49  ;;  %8673 = vmatpush3.msra.mxu0 %v11383_v38  ;;  %v8879_v38 = vld [vmem:[%s9696_s21 + $0xa0] ss:$8 sps:$4 sm:$0xff]  }
 0x6ff   : > { %8698 = vmatpush3.msra.mxu1 %v11384_v49  ;;  %8674 = vmatprep.subr.mxu0 %v11385_v56  ;;  %v8884_v49 = vld [vmem:[%s9696_s21 + $0x14] ss:$8 sps:$4 sm:$0xff]  }
 0x700   : > { %8699 = vmatprep.subr.mxu1 %v11386_v27  ;;  %8675 = vmatpush3.msra.mxu0 %v11385_v56  ;;  %v8882_v56 = vld [vmem:[%s9696_s21 + $0x10] ss:$8 sps:$4 sm:$0xff]  }
 0x701   : > { %8700 = vmatpush3.msra.mxu1 %v11386_v27  ;;  %8676 = vmatprep.subr.mxu0 %v11387_v4  ;;  %v8887_v27 = vld [vmem:[%s9696_s21 + $0x94] ss:$8 sps:$4 sm:$0xff]  }
 0x702   : > { %8701 = vmatprep.subr.mxu1 %v11388_v58  ;;  %8677 = vmatpush3.msra.mxu0 %v11387_v4  ;;  %v8885_v4 = vld [vmem:[%s9696_s21 + $0x90] ss:$8 sps:$4 sm:$0xff]  }
 0x703   : > { %8702 = vmatpush3.msra.mxu1 %v11388_v58  ;;  %8678 = vmatprep.subr.mxu0 %v11389_v24  ;;  %v8890_v58 = vld [vmem:[%s9696_s21 + $0x4] ss:$8 sps:$4 sm:$0xff]  }
 0x704   : > { %8703 = vmatprep.subr.mxu1 %v11390_v52  ;;  %8679 = vmatpush3.msra.mxu0 %v11389_v24  ;;  %v8888_v24 = vld [vmem:[%s9696_s21] ss:$8 sps:$4 sm:$0xff]  }
 0x705   : > { %8704 = vmatpush3.msra.mxu1 %v11390_v52  ;;  %8680 = vmatprep.subr.mxu0 %v11391_v5  ;;  %v8891_v52 = vld [vmem:[%s9696_s21 + $0x80] ss:$8 sps:$4 sm:$0xff]  }
 0x706   : > { %8705 = vmatprep.subr.mxu1 %v11392_v60  ;;  %8681 = vmatpush3.msra.mxu0 %v11391_v5  ;;  %v8893_v5 = vld [vmem:[%s9696_s21 + $0x84] ss:$8 sps:$4 sm:$0xff]  }
 0x707   : > { %8706 = vmatpush3.msra.mxu1 %v11392_v60  ;;  %8720 = vmatprep.subr.mxu0 %v10575_v29  ;;  %v8896_v60 = vld [vmem:[%s9696_s21 + $0x1f4] ss:$8 sps:$4 sm:$0xff]  }
 0x708   : > { %8707 = vmatprep.subr.mxu1 %v11393_v6 }
 0x709   : > { %8708 = vmatpush3.msra.mxu1 %v11393_v6  ;;  %v9455_v6 = vmov 0  }
 0x70a   : > { %8709 = vmatprep.subr.mxu1 %v11394_v55 }
 0x70b   : > { %8710 = vmatpush3.msra.mxu1 %v11394_v55  ;;  %v8899_v55 = vld [vmem:[%s9696_s21 + $0x174] ss:$8 sps:$4 sm:$0xff]  }
 0x70c   : > { %8711 = vmatprep.subr.mxu1 %v11395_v61 }
 0x70d   : > { %8712 = vmatpush3.msra.mxu1 %v11395_v61 }
 0x70e   : > { %8713 = vmatprep.subr.mxu1 %v11396_v40 }
 0x70f   : > { %8714 = vmatpush3.msra.mxu1 %v11396_v40 }
 0x710   : > { %8715 = vmatprep.subr.mxu1 %v11397_v0 }
 0x711   : > { %8716 = vmatpush3.msra.mxu1 %v11397_v0 }
 0x7a1   : > { %v8611_v7 = vpop.f32.mrf.mxu1 }
 0x7a2   : > { %v8630_v44 = vpop.f32.mrf.mxu0 }
 0x7a3   : > { %v3891_v34 = vpop.f32.mrf.mxu1  ;;  %v3978_v37 = vadd.f32 %v8630_v44, %v8611_v7 }
 0x7a4   : > { %v3972_v17 = vpop.f32.mrf.mxu0 }
 0x7a5   : > { %v3973_v54 = vadd.f32 %v3972_v17, %v3891_v34 }
 0x7b2   : > { %v8649_v45 = vpop.f32.mrf.mxu1 }
 0x7b3   : > { %v4073_v19 = vadd.f32 %v8649_v45, %v3978_v37 }
 0x7b4   : > { %v4063_v18 = vpop.f32.mrf.mxu1 }
 0x7b5   : > { %v4082_v21 = vadd.f32 %v10595_v26, %v4073_v19  ;;  %v4072_v63 = vadd.f32 %v4063_v18, %v3973_v54 }
 0x7b7   : > { %v4084_v13 = vmax.f32 %v4082_v21, 0.0  ;;  %v4081_v31 = vadd.f32 %v10595_v26, %v4072_v63 }
 0x7b9   : > { %v4090_v36 = vmul.f32 %v10598_v14, %v4084_v13  ;;  %v4083_v1 = vmax.f32 %v4081_v31, 0.0 }
 0x7bb   : > { %v4096_v57 = vadd.f32 %v10601_v12, %v4090_v36  ;;  %v4089_v22 = vmul.f32 %v10598_v14, %v4083_v1 }
 0x7bd   : > { %4100 = vst [vmem:[#allocation4 + $0xb] sm:$0x40] %v4096_v57  ;;  %4098 = vst [vmem:[#allocation4 + $0x9] sm:$0xff] %v4096_v57  ;;  %v4095_v42 = vadd.f32 %v10601_v12, %v4089_v22  ;;  %v8846_v12 = vld [vmem:[%s9696_s21 + $0x70] ss:$8 sps:$4 sm:$0xff]  }
 0x7bf   : > { %4099 = vst [vmem:[#allocation4 - $0x1] sm:$0x2] %v4095_v42  ;;  %4097 = vst [vmem:[#allocation4 + $0x1] sm:$0xff] %v4095_v42  ;;  %8682 = vmatprep.mubr.f32.mxu0 %v4095_v42 }
 0x7c0   : > { %8683 = vmatmul.mubr.f32.vlgmr.msra.gmra.mxu0 %v4096_v57 }
 0x7c1   : > { %8721 = vmatpush3.msra.mxu0 %v10575_v29 }
 0x7c2   : > { %8722 = vmatprep.subr.mxu0 %v10607_v11 }
 0x7c3   : > { %8723 = vmatpush3.msra.mxu0 %v10607_v11  ;;  %v8848_v11 = vld [vmem:[%s9696_s21 + $0x74] ss:$8 sps:$4 sm:$0xff]  }
 0x7c4   : > { %8724 = vmatprep.subr.mxu0 %v10610_v41  ;;  %v4288_v29 = vld [vmem:[#allocation4 + $0xa] sm:$0xff] }
 0x7c5   : > { %8725 = vmatpush3.msra.mxu0 %v10610_v41  ;;  %v8849_v41 = vld [vmem:[%s9696_s21 + $0xf0] ss:$8 sps:$4 sm:$0xff]  }
 0x7c6   : > { %v4101_v26 = vld [vmem:[#allocation4] sm:$0xff]  ;;  %v4102_v14 = vld [vmem:[#allocation4 + $0x8] sm:$0xff]  ;;  %8726 = vmatprep.subr.mxu0 %v10614_v10 }
 0x7c7   : > { %v4287_v28 = vld [vmem:[#allocation4 + $0x2] sm:$0xff]  ;;  %8717 = vmatprep.mubr.f32.mxu1 %v4101_v26  ;;  %8727 = vmatpush3.msra.mxu0 %v10614_v10  ;;  %v8851_v10 = vld [vmem:[%s9696_s21 + $0xf4] ss:$8 sps:$4 sm:$0xff]  }
 0x7c8   : > { %8752 = vmatprep.mubr.f32.mxu0 %v4287_v28  ;;  %8718 = vmatmul.mubr.f32.vlgmr.msra.gmra.mxu1 %v4102_v14 }
 0x7c9   : > { %8728 = vmatprep.subr.mxu0 %v10619_v32  ;;  %4655 = vmatprep.subr.bf16.mxu1 %v8851_v10 }
 0x7ca   : > { %8729 = vmatpush3.msra.mxu0 %v10619_v32  ;;  %v8854_v32 = vld [vmem:[%s9696_s21 + $0x64] ss:$8 sps:$4 sm:$0xff]   ;;  %4656 = vmatpush1.bf16.msra.mxu1 %v8849_v41 }
 0x7cb   : > { %8730 = vmatprep.subr.mxu0 %v10628_v48  ;;  %4687 = vmatprep.mubr.bf16.mxu1 %v9455_v6 }
 0x7cc   : > { %8731 = vmatpush3.msra.mxu0 %v10628_v48  ;;  %v8857_v48 = vld [vmem:[%s9696_s21 + $0xe4] ss:$8 sps:$4 sm:$0xff]  }
 0x7cd   : > { %8732 = vmatprep.subr.mxu0 %v10636_v51  ;;  %4657 = vmatprep.subr.bf16.mxu1 %v8857_v48 }
 0x7ce   : > { %8733 = vmatpush3.msra.mxu0 %v10636_v51  ;;  %v8852_v51 = vld [vmem:[%s9696_s21 + $0x60] ss:$8 sps:$4 sm:$0xff]  }
 0x7cf   : > { %8734 = vmatprep.subr.mxu0 %v10644_v50 }
 0x7d0   : > { %8735 = vmatpush3.msra.mxu0 %v10644_v50  ;;  %v8855_v50 = vld [vmem:[%s9696_s21 + $0xe0] ss:$8 sps:$4 sm:$0xff]  }
 0x7d1   : > { %8736 = vmatprep.subr.mxu0 %v10650_v33  ;;  %4658 = vmatpush1.bf16.msra.mxu1 %v8855_v50 }
 0x7d2   : > { %8737 = vmatpush3.msra.mxu0 %v10650_v33  ;;  %v8860_v33 = vld [vmem:[%s9696_s21 + $0x54] ss:$8 sps:$4 sm:$0xff]  }
 0x7d3   : > { %8738 = vmatprep.subr.mxu0 %v10655_v30 }
 0x7d4   : > { %8739 = vmatpush3.msra.mxu0 %v10655_v30  ;;  %v8858_v30 = vld [vmem:[%s9696_s21 + $0x50] ss:$8 sps:$4 sm:$0xff]  }
 0x7d5   : > { %8740 = vmatprep.subr.mxu0 %v10661_v15 }
 0x7d6   : > { %8741 = vmatpush3.msra.mxu0 %v10661_v15  ;;  %v8863_v15 = vld [vmem:[%s9696_s21 + $0xd4] ss:$8 sps:$4 sm:$0xff]  }
 0x7d7   : > { %8742 = vmatprep.subr.mxu0 %v10667_v53  ;;  %4659 = vmatprep.subr.bf16.mxu1 %v8863_v15 }
 0x7d8   : > { %8743 = vmatpush3.msra.mxu0 %v10667_v53  ;;  %v8861_v53 = vld [vmem:[%s9696_s21 + $0xd0] ss:$8 sps:$4 sm:$0xff]  }
 0x7d9   : > { %8744 = vmatprep.subr.mxu0 %v10673_v39  ;;  %4660 = vmatpush1.bf16.msra.mxu1 %v8861_v53 }
 0x7da   : > { %8745 = vmatpush3.msra.mxu0 %v10673_v39  ;;  %v8866_v39 = vld [vmem:[%s9696_s21 + $0x44] ss:$8 sps:$4 sm:$0xff]  }
 0x7db   : > { %8746 = vmatprep.subr.mxu0 %v10679_v47 }
 0x7dc   : > { %8747 = vmatpush3.msra.mxu0 %v10679_v47  ;;  %v8864_v47 = vld [vmem:[%s9696_s21 + $0x40] ss:$8 sps:$4 sm:$0xff]  }
 0x7dd   : > { %8748 = vmatprep.subr.mxu0 %v10685_v46 }
 0x7de   : > { %8749 = vmatpush3.msra.mxu0 %v10685_v46  ;;  %v8869_v46 = vld [vmem:[%s9696_s21 + $0xc4] ss:$8 sps:$4 sm:$0xff]  }
 0x7df   : > { %8750 = vmatprep.subr.mxu0 %v10691_v43  ;;  %4661 = vmatprep.subr.bf16.mxu1 %v8869_v46 }
 0x7e0   : > { %8751 = vmatpush3.msra.mxu0 %v10691_v43  ;;  %v8867_v43 = vld [vmem:[%s9696_s21 + $0xc0] ss:$8 sps:$4 sm:$0xff]  }
 0x7e1   : > { %8753 = vmatmul.mubr.f32.vlgmr.msra.gmra.mxu0 %v4288_v29  ;;  %4776 = vmatprep.subr.bf16.mxu0 %v8848_v11 }
 0x7e2   : > { %4777 = vmatpush1.bf16.msra.mxu0 %v8846_v12  ;;  %4662 = vmatpush1.bf16.msra.mxu1 %v8867_v43 }
 0x7e3   : > { %4778 = vmatprep.subr.bf16.mxu0 %v8854_v32  ;;  %4663 = vmatprep.subr.bf16.mxu1 %v8875_v62 }
 0x7e4   : > { %4808 = vmatprep.mubr.bf16.mxu0 %v9455_v6 }
 0x7e6   : > { %4779 = vmatpush1.bf16.msra.mxu0 %v8852_v51  ;;  %4664 = vmatpush1.bf16.msra.mxu1 %v8873_v23  ;;  %v8902_v23 = vld [vmem:[%s9696_s21 + $0x1e4] ss:$8 sps:$4 sm:$0xff]  }
 0x7e7   : > { %4780 = vmatprep.subr.bf16.mxu0 %v8860_v33  ;;  %4665 = vmatprep.subr.bf16.mxu1 %v8881_v8  ;;  %v8905_v8 = vld [vmem:[%s9696_s21 + $0x164] ss:$8 sps:$4 sm:$0xff]  }
 0x7ea   : > { %4781 = vmatpush1.bf16.msra.mxu0 %v8858_v30  ;;  %4666 = vmatpush1.bf16.msra.mxu1 %v8879_v38  ;;  %v8900_v38 = vld [vmem:[%s9696_s21 + $0x1e0] ss:$8 sps:$4 sm:$0xff]  }
 0x7eb   : > { %4782 = vmatprep.subr.bf16.mxu0 %v8866_v39  ;;  %4667 = vmatprep.subr.bf16.mxu1 %v8887_v27  ;;  %v8911_v27 = vld [vmem:[%s9696_s21 + $0x154] ss:$8 sps:$4 sm:$0xff]  }
 0x7ee   : > { %4783 = vmatpush1.bf16.msra.mxu0 %v8864_v47  ;;  %4668 = vmatpush1.bf16.msra.mxu1 %v8885_v4  ;;  %v8906_v4 = vld [vmem:[%s9696_s21 + $0x1d0] ss:$8 sps:$4 sm:$0xff]  }
 0x7ef   : > { %4784 = vmatprep.subr.bf16.mxu0 %v8872_v3  ;;  %4669 = vmatprep.subr.bf16.mxu1 %v8893_v5  ;;  %v8894_v3 = vld [vmem:[%s9696_s21 + $0x1f0] ss:$8 sps:$4 sm:$0xff]   ;;  %v8912_v5 = vld [vmem:[%s9696_s21 + $0x1c0] ss:$8 sps:$4 sm:$0xff]  }
 0x7f2   : > { %4785 = vmatpush1.bf16.msra.mxu0 %v8870_v2  ;;  %4670 = vmatpush1.bf16.msra.mxu1 %v8891_v52  ;;  %v8917_v52 = vld [vmem:[%s9696_s21 + $0x144] ss:$8 sps:$4 sm:$0xff]  }
 0x7f3   : > { %4786 = vmatprep.subr.bf16.mxu0 %v8878_v35  ;;  %4917 = vmatprep.subr.bf16.mxu1 %v8899_v55  ;;  %v8897_v35 = vld [vmem:[%s9696_s21 + $0x170] ss:$8 sps:$4 sm:$0xff]   ;;  %v8915_v55 = vld [vmem:[%s9696_s21 + $0x140] ss:$8 sps:$4 sm:$0xff]  }
 0x7f6   : > { %4787 = vmatpush1.bf16.msra.mxu0 %v8876_v59 }
 0x7f7   : > { %4788 = vmatprep.subr.bf16.mxu0 %v8884_v49  ;;  %v8908_v49 = vld [vmem:[%s9696_s21 + $0x1d4] ss:$8 sps:$4 sm:$0xff]  }
 0x7fa   : > { %4789 = vmatpush1.bf16.msra.mxu0 %v8882_v56  ;;  %v8903_v56 = vld [vmem:[%s9696_s21 + $0x160] ss:$8 sps:$4 sm:$0xff]  }
 0x7fb   : > { %4790 = vmatprep.subr.bf16.mxu0 %v8890_v58  ;;  %v8914_v58 = vld [vmem:[%s9696_s21 + $0x1c4] ss:$8 sps:$4 sm:$0xff]  }
 0x7fe   : > { %4791 = vmatpush1.bf16.msra.mxu0 %v8888_v24  ;;  %v8909_v24 = vld [vmem:[%s9696_s21 + $0x150] ss:$8 sps:$4 sm:$0xff]  }
 0x7ff   : > { %5060 = vmatprep.subr.bf16.mxu0 %v8896_v60  ;;  %v8920_v60 = vld [vmem:[%s9696_s21 + $0x1b4] ss:$8 sps:$4 sm:$0xff]  }
 0x880   : > { %v8684_v61 = vpop.f32.mrf.mxu0 }
 0x882   : > { %v4203_v0 = vpop.f32.mrf.mxu0 }
 0x888   : > { %v8719_v40 = vpop.f32.mrf.mxu1 }
 0x889   : > { %v4284_v44 = vadd.f32 %v8719_v40, %v8684_v61  ;;  %v8923_v61 = vld [vmem:[%s9696_s21 + $0x134] ss:$8 sps:$4 sm:$0xff]   ;;  %v8918_v40 = vld [vmem:[%s9696_s21 + $0x1b0] ss:$8 sps:$4 sm:$0xff]  }
 0x88a   : > { %v4278_v7 = vpop.f32.mrf.mxu1 }
 0x88b   : > { %v4279_v17 = vadd.f32 %v4278_v7, %v4203_v0  ;;  %v8926_v0 = vld [vmem:[%s9696_s21 + $0x1a4] ss:$8 sps:$4 sm:$0xff]   ;;  %v8921_v7 = vld [vmem:[%s9696_s21 + $0x130] ss:$8 sps:$4 sm:$0xff]  }
 0x8a1   : > { %v8754_v34 = vpop.f32.mrf.mxu0 }
 0x8a2   : > { %v4381_v37 = vadd.f32 %v8754_v34, %v4284_v44  ;;  %v8929_v44 = vld [vmem:[%s9696_s21 + $0x124] ss:$8 sps:$4 sm:$0xff]   ;;  %v8924_v34 = vld [vmem:[%s9696_s21 + $0x1a0] ss:$8 sps:$4 sm:$0xff]  }
 0x8a3   : > { %v4371_v45 = vpop.f32.mrf.mxu0 }
 0x8a4   : > { %v4390_v54 = vadd.f32 %v10729_v16, %v4381_v37  ;;  %v4380_v19 = vadd.f32 %v4371_v45, %v4279_v17  ;;  %v8932_v17 = vld [vmem:[%s9696_s21 + $0x194] ss:$8 sps:$4 sm:$0xff]   ;;  %v8927_v37 = vld [vmem:[%s9696_s21 + $0x120] ss:$8 sps:$4 sm:$0xff]  }
 0x8a5   : > { %v8935_v45 = vld [vmem:[%s9696_s21 + $0x114] ss:$8 sps:$4 sm:$0xff]  }
 0x8a6   : > { %v4392_v18 = vmax.f32 %v4390_v54, 0.0  ;;  %v4389_v21 = vadd.f32 %v10729_v16, %v4380_v19  ;;  %v8930_v54 = vld [vmem:[%s9696_s21 + $0x190] ss:$8 sps:$4 sm:$0xff]   ;;  %v8938_v19 = vld [vmem:[%s9696_s21 + $0x184] ss:$8 sps:$4 sm:$0xff]  }
 0x8a8   : > { %v4398_v63 = vmul.f32 %v10734_v9, %v4392_v18  ;;  %v4391_v13 = vmax.f32 %v4389_v21, 0.0  ;;  %v8933_v18 = vld [vmem:[%s9696_s21 + $0x110] ss:$8 sps:$4 sm:$0xff]   ;;  %v8941_v21 = vld [vmem:[%s9696_s21 + $0x104] ss:$8 sps:$4 sm:$0xff]  }
 0x8aa   : > { %v4404_v31 = vadd.f32 %v10741_v25, %v4398_v63  ;;  %v4397_v36 = vmul.f32 %v10734_v9, %v4391_v13  ;;  %v8936_v63 = vld [vmem:[%s9696_s21 + $0x180] ss:$8 sps:$4 sm:$0xff]   ;;  %v8944_v13 = vld [vmem:[%s9696_s21 + $0x2f4] ss:$8 sps:$4 sm:$0xff]  }
 0x8ac   : > { %v4456_v1 = vcombine.high %v4404_v31, %v4404_v31  ;;  %v4463_v57 = vrot.slane %v4404_v31, %v10147_v20  ;;  %v4403_v22 = vadd.f32 %v10741_v25, %v4397_v36  ;;  %v8939_v31 = vld [vmem:[%s9696_s21 + $0x100] ss:$8 sps:$4 sm:$0xff]  }
 0x8ae   : > { %v4470_v42 = vrot.slane %v4456_v1, %v10147_v20  ;;  %v4471_v26 = vcombine.high %v4463_v57, %v4463_v57  ;;  %v4479_v14 = vrot.slane %v4463_v57, %v10147_v20  ;;  %7133 = vst.sshfl [vmem:[#allocation5 + $0x43] sm:$0x1 pattern:$0x73625140] %v4463_v57  ;;  %v4407_v28 = vcombine.high %v4403_v22, %v4403_v22  ;;  %v8947_v1 = vld [vmem:[%s9696_s21 + $0x274] ss:$8 sps:$4 sm:$0xff]  }
 0x8af   : > { %v4414_v16 = vrot.slane %v4403_v22, %v10147_v20  ;;  %v8942_v57 = vld [vmem:[%s9696_s21 + $0x2f0] ss:$8 sps:$4 sm:$0xff]  }
 0x8b0   : > { %v4472_v29 = vcombine.high %v4470_v42, %v4470_v42  ;;  %v4486_v12 = vrot.slane %v4470_v42, %v10147_v20  ;;  %v4493_v11 = vrot.slane %v4471_v26, %v10147_v20  ;;  %v4501_v9 = vcombine.high %v4479_v14, %v4479_v14  ;;  %7134 = vst.sshfl [vmem:[#allocation5 + $0x4b] sm:$0x1 pattern:$0x73625140] %v4471_v26  ;;  %v8950_v26 = vld [vmem:[%s9696_s21 + $0x2e4] ss:$8 sps:$4 sm:$0xff]  }
 0x8b1   : > { %7135 = vst.sshfl [vmem:[#allocation5 + $0x63] sm:$0x1 pattern:$0x73625140] %v4470_v42  ;;  %v4421_v41 = vrot.slane %v4407_v28, %v10147_v20  ;;  %v4422_v25 = vcombine.high %v4414_v16, %v4414_v16  ;;  %v4430_v10 = vrot.slane %v4414_v16, %v10147_v20  ;;  %v8945_v14 = vld [vmem:[%s9696_s21 + $0x270] ss:$8 sps:$4 sm:$0xff]  }
 0x8b2   : > { %7129 = vst.sshfl [vmem:[#allocation5 + $0x3] sm:$0x1 pattern:$0x73625140] %v4414_v16  ;;  %v4500_v32 = vrot.slane %v4472_v29, %v10147_v20  ;;  %v4502_v48 = vcombine.high %v4486_v12, %v4486_v12  ;;  %v4503_v51 = vcombine.high %v4493_v11, %v4493_v11  ;;  %4531 = vst [vmem:[#allocation5 + $0x53] sm:$0x1] %v4501_v9 }
 0x8b3   : > { %7136 = vst.sshfl [vmem:[#allocation5 + $0x6b] sm:$0x1 pattern:$0x73625140] %v4472_v29  ;;  %v4423_v50 = vcombine.high %v4421_v41, %v4421_v41  ;;  %v4437_v33 = vrot.slane %v4421_v41, %v10147_v20  ;;  %v4444_v30 = vrot.slane %v4422_v25, %v10147_v20  ;;  %v4452_v15 = vcombine.high %v4430_v10, %v4430_v10  ;;  %v8953_v16 = vld [vmem:[%s9696_s21 + $0x264] ss:$8 sps:$4 sm:$0xff]  }
 0x8b4   : > { %7130 = vst.sshfl [vmem:[#allocation5 + $0xb] sm:$0x1 pattern:$0x73625140] %v4422_v25  ;;  %v4504_v53 = vcombine.high %v4500_v32, %v4500_v32  ;;  %4532 = vst [vmem:[#allocation5 + $0x5b] sm:$0x1] %v4503_v51 }
 0x8b5   : > { %7131 = vst.sshfl [vmem:[#allocation5 + $0x23] sm:$0x1 pattern:$0x73625140] %v4421_v41  ;;  %4535 = vst [vmem:[#allocation5 + $0x73] sm:$0x1] %v4502_v48  ;;  %v4451_v39 = vrot.slane %v4423_v50, %v10147_v20  ;;  %v4453_v47 = vcombine.high %v4437_v33, %v4437_v33  ;;  %v4454_v46 = vcombine.high %v4444_v30, %v4444_v30 }
 0x8b6   : > { %4523 = vst [vmem:[#allocation5 + $0x13] sm:$0x1] %v4452_v15  ;;  %7132 = vst.sshfl [vmem:[#allocation5 + $0x2b] sm:$0x1 pattern:$0x73625140] %v4423_v50 }
 0x8b7   : > { %4536 = vst [vmem:[#allocation5 + $0x7b] sm:$0x1] %v4504_v53  ;;  %v4455_v43 = vcombine.high %v4451_v39, %v4451_v39  ;;  %4524 = vst [vmem:[#allocation5 + $0x1b] sm:$0x1] %v4454_v46  ;;  %v8948_v29 = vld [vmem:[%s9696_s21 + $0x2e0] ss:$8 sps:$4 sm:$0xff]  }
 0x8b8   : > { %4527 = vst [vmem:[#allocation5 + $0x33] sm:$0x1] %v4453_v47  ;;  %v8956_v12 = vld [vmem:[%s9696_s21 + $0x2d4] ss:$8 sps:$4 sm:$0xff]   ;;  %v8951_v11 = vld [vmem:[%s9696_s21 + $0x260] ss:$8 sps:$4 sm:$0xff]  }
 0x8b9   : > { %v4537_v2 = vld [vmem:[#allocation5] sm:$0xff]  ;;  %4528 = vst [vmem:[#allocation5 + $0x3b] sm:$0x1] %v4455_v43  ;;  %v8959_v9 = vld [vmem:[%s9696_s21 + $0x254] ss:$8 sps:$4 sm:$0xff]  }
 0x8ba   : > { %v4538_v62 = vpack.c.bf16 %v4537_v2, %v4537_v2  ;;  %v8954_v41 = vld [vmem:[%s9696_s21 + $0x2d0] ss:$8 sps:$4 sm:$0xff]   ;;  %v8962_v25 = vld [vmem:[%s9696_s21 + $0x2c4] ss:$8 sps:$4 sm:$0xff]   ;;  %v8960_v48 = vld [vmem:[%s9696_s21 + $0x2c0] ss:$8 sps:$4 sm:$0xff]  }
 0x8bb   : > { %v4556_v20 = vld [vmem:[#allocation5 + $0x8] sm:$0xff]  ;;  %v8957_v10 = vld [vmem:[%s9696_s21 + $0x250] ss:$8 sps:$4 sm:$0xff]   ;;  %v8968_v51 = vld [vmem:[%s9696_s21 + $0x2b4] ss:$8 sps:$4 sm:$0xff]  }
 0x8bc   : > { %4809 = vmatmul.mubr.bf16.vlgmr.msra.gmra.mxu0 %v4538_v62  ;;  %v4557_v59 = vpack.c.bf16 %v4556_v20, %v4556_v20  ;;  %v8965_v32 = vld [vmem:[%s9696_s21 + $0x244] ss:$8 sps:$4 sm:$0xff]   ;;  %v8963_v50 = vld [vmem:[%s9696_s21 + $0x240] ss:$8 sps:$4 sm:$0xff]   ;;  %v8971_v33 = vld [vmem:[%s9696_s21 + $0x234] ss:$8 sps:$4 sm:$0xff]  }
 0x8bd   : > { %5061 = vmatpush1.bf16.msra.mxu0 %v8894_v3  ;;  %5092 = vmatprep.mubr.bf16.mxu0 %v9455_v6  ;;  %v4818_v22 = vld [vmem:[#allocation5 + $0x10] sm:$0xff]  ;;  %v8974_v15 = vld [vmem:[%s9696_s21 + $0x2a4] ss:$8 sps:$4 sm:$0xff]   ;;  %v8972_v47 = vld [vmem:[%s9696_s21 + $0x2a0] ss:$8 sps:$4 sm:$0xff]  }
 0x8be   : > { %4688 = vmatmul.mubr.bf16.vlgmr.msra.gmra.mxu1 %v4557_v59  ;;  %5062 = vmatprep.subr.bf16.mxu0 %v8902_v23  ;;  %v4961_v36 = vld [vmem:[#allocation5 + $0x18] sm:$0xff]  ;;  %v4819_v28 = vpack.c.bf16 %v4818_v22, %v4818_v22  ;;  %v8977_v39 = vld [vmem:[%s9696_s21 + $0x224] ss:$8 sps:$4 sm:$0xff]   ;;  %v8975_v43 = vld [vmem:[%s9696_s21 + $0x220] ss:$8 sps:$4 sm:$0xff]  }
 0x8bf   : > { %4918 = vmatpush1.bf16.msra.mxu1 %v8897_v35  ;;  %4949 = vmatprep.mubr.bf16.mxu1 %v9455_v6  ;;  %v4962_v42 = vpack.c.bf16 %v4961_v36, %v4961_v36  ;;  %v8966_v30 = vld [vmem:[%s9696_s21 + $0x2b0] ss:$8 sps:$4 sm:$0xff]   ;;  %v8980_v46 = vld [vmem:[%s9696_s21 + $0x294] ss:$8 sps:$4 sm:$0xff]   ;;  %v8986_v62 = vld [vmem:[%s9696_s21 + $0x284] ss:$8 sps:$4 sm:$0xff]  }
 0x8c0   : > { %4919 = vmatprep.subr.bf16.mxu1 %v8905_v8  ;;  %v8969_v53 = vld [vmem:[%s9696_s21 + $0x230] ss:$8 sps:$4 sm:$0xff]   ;;  %v8983_v3 = vld [vmem:[%s9696_s21 + $0x214] ss:$8 sps:$4 sm:$0xff]   ;;  %v8989_v35 = vld [vmem:[%s9696_s21 + $0x204] ss:$8 sps:$4 sm:$0xff]  }
 0x8c1   : > { %5063 = vmatpush1.bf16.msra.mxu0 %v8900_v38  ;;  %v8978_v2 = vld [vmem:[%s9696_s21 + $0x290] ss:$8 sps:$4 sm:$0xff]   ;;  %v8984_v20 = vld [vmem:[%s9696_s21 + $0x280] ss:$8 sps:$4 sm:$0xff]   ;;  %v8992_v59 = vld [vmem:[%s9696_s21 + $0x3f4] ss:$8 sps:$4 sm:$0xff]  }
 0x8c2   : > { %5064 = vmatprep.subr.bf16.mxu0 %v8908_v49  ;;  %v8981_v23 = vld [vmem:[%s9696_s21 + $0x210] ss:$8 sps:$4 sm:$0xff]   ;;  %v8987_v8 = vld [vmem:[%s9696_s21 + $0x200] ss:$8 sps:$4 sm:$0xff]   ;;  %v8995_v49 = vld [vmem:[%s9696_s21 + $0x374] ss:$8 sps:$4 sm:$0xff]  }
 0x8c3   : > { %4920 = vmatpush1.bf16.msra.mxu1 %v8903_v56  ;;  %v5247_v38 = vld [vmem:[#allocation5 + $0x28] sm:$0xff]  ;;  %v8990_v56 = vld [vmem:[%s9696_s21 + $0x3f0] ss:$8 sps:$4 sm:$0xff]  }
 0x8c4   : > { %4921 = vmatprep.subr.bf16.mxu1 %v8911_v27  ;;  %v5104_v27 = vld [vmem:[#allocation5 + $0x20] sm:$0xff] }
 0x8c5   : > { %5065 = vmatpush1.bf16.msra.mxu0 %v8906_v4  ;;  %v5248_v4 = vpack.c.bf16 %v5247_v38, %v5247_v38  ;;  %v9023_v36 = vld [vmem:[%s9696_s21 + $0x320] ss:$8 sps:$4 sm:$0xff]   ;;  %v9034_v22 = vld [vmem:[%s9696_s21 + $0x384] ss:$8 sps:$4 sm:$0xff]  }
 0x8c6   : > { %5066 = vmatprep.subr.bf16.mxu0 %v8914_v58  ;;  %v8998_v58 = vld [vmem:[%s9696_s21 + $0x3e4] ss:$8 sps:$4 sm:$0xff]   ;;  %v9071_v38 = vld [vmem:[%s9696_s21 + $0x420] ss:$8 sps:$4 sm:$0xff]  }
 0x8c7   : > { %4922 = vmatpush1.bf16.msra.mxu1 %v8909_v24  ;;  %v8993_v24 = vld [vmem:[%s9696_s21 + $0x370] ss:$8 sps:$4 sm:$0xff]  }
 0x8c8   : > { %4923 = vmatprep.subr.bf16.mxu1 %v8917_v52  ;;  %v5105_v52 = vpack.c.bf16 %v5104_v27, %v5104_v27  ;;  %v9082_v27 = vld [vmem:[%s9696_s21 + $0x484] ss:$8 sps:$4 sm:$0xff]  }
 0x8c9   : > { %5067 = vmatpush1.bf16.msra.mxu0 %v8912_v5  ;;  %v9001_v5 = vld [vmem:[%s9696_s21 + $0x364] ss:$8 sps:$4 sm:$0xff]  }
 0x8ca   : > { %5068 = vmatprep.subr.bf16.mxu0 %v8920_v60  ;;  %v8996_v60 = vld [vmem:[%s9696_s21 + $0x3e0] ss:$8 sps:$4 sm:$0xff]  }
 0x8cb   : > { %4924 = vmatpush1.bf16.msra.mxu1 %v8915_v55  ;;  %v9004_v55 = vld [vmem:[%s9696_s21 + $0x3d4] ss:$8 sps:$4 sm:$0xff]  }
 0x8cc   : > { %4925 = vmatprep.subr.bf16.mxu1 %v8923_v61  ;;  %v8999_v61 = vld [vmem:[%s9696_s21 + $0x360] ss:$8 sps:$4 sm:$0xff]  }
 0x8cd   : > { %5069 = vmatpush1.bf16.msra.mxu0 %v8918_v40  ;;  %v9007_v40 = vld [vmem:[%s9696_s21 + $0x354] ss:$8 sps:$4 sm:$0xff]  }
 0x8ce   : > { %5070 = vmatprep.subr.bf16.mxu0 %v8926_v0  ;;  %v9002_v0 = vld [vmem:[%s9696_s21 + $0x3d0] ss:$8 sps:$4 sm:$0xff]  }
 0x8cf   : > { %4926 = vmatpush1.bf16.msra.mxu1 %v8921_v7  ;;  %v9010_v7 = vld [vmem:[%s9696_s21 + $0x3c4] ss:$8 sps:$4 sm:$0xff]  }
 0x8d0   : > { %4927 = vmatprep.subr.bf16.mxu1 %v8929_v44  ;;  %v9005_v44 = vld [vmem:[%s9696_s21 + $0x350] ss:$8 sps:$4 sm:$0xff]  }
 0x8d1   : > { %5071 = vmatpush1.bf16.msra.mxu0 %v8924_v34  ;;  %v9013_v34 = vld [vmem:[%s9696_s21 + $0x344] ss:$8 sps:$4 sm:$0xff]  }
 0x8d2   : > { %5072 = vmatprep.subr.bf16.mxu0 %v8932_v17  ;;  %v9008_v17 = vld [vmem:[%s9696_s21 + $0x3c0] ss:$8 sps:$4 sm:$0xff]  }
 0x8d3   : > { %4928 = vmatpush1.bf16.msra.mxu1 %v8927_v37  ;;  %v9016_v37 = vld [vmem:[%s9696_s21 + $0x3b4] ss:$8 sps:$4 sm:$0xff]  }
 0x8d4   : > { %4929 = vmatprep.subr.bf16.mxu1 %v8935_v45  ;;  %v9011_v45 = vld [vmem:[%s9696_s21 + $0x340] ss:$8 sps:$4 sm:$0xff]  }
 0x8d5   : > { %5073 = vmatpush1.bf16.msra.mxu0 %v8930_v54  ;;  %v9019_v54 = vld [vmem:[%s9696_s21 + $0x334] ss:$8 sps:$4 sm:$0xff]  }
 0x8d6   : > { %5074 = vmatprep.subr.bf16.mxu0 %v8938_v19  ;;  %v9014_v19 = vld [vmem:[%s9696_s21 + $0x3b0] ss:$8 sps:$4 sm:$0xff]  }
 0x8d7   : > { %4930 = vmatpush1.bf16.msra.mxu1 %v8933_v18  ;;  %v9022_v18 = vld [vmem:[%s9696_s21 + $0x3a4] ss:$8 sps:$4 sm:$0xff]  }
 0x8d8   : > { %4931 = vmatprep.subr.bf16.mxu1 %v8941_v21  ;;  %v9017_v21 = vld [vmem:[%s9696_s21 + $0x330] ss:$8 sps:$4 sm:$0xff]  }
 0x8d9   : > { %5075 = vmatpush1.bf16.msra.mxu0 %v8936_v63  ;;  %v9025_v63 = vld [vmem:[%s9696_s21 + $0x324] ss:$8 sps:$4 sm:$0xff]  }
 0x8da   : > { %5346 = vmatprep.subr.bf16.mxu0 %v8944_v13  ;;  %v9020_v13 = vld [vmem:[%s9696_s21 + $0x3a0] ss:$8 sps:$4 sm:$0xff]  }
 0x8db   : > { %4932 = vmatpush1.bf16.msra.mxu1 %v8939_v31  ;;  %v9028_v31 = vld [vmem:[%s9696_s21 + $0x394] ss:$8 sps:$4 sm:$0xff]  }
 0x8dc   : > { %5093 = vmatmul.mubr.bf16.vlgmr.msra.gmra.mxu0 %v4962_v42  ;;  %5203 = vmatprep.subr.bf16.mxu1 %v8947_v1  ;;  %v9031_v1 = vld [vmem:[%s9696_s21 + $0x314] ss:$8 sps:$4 sm:$0xff]   ;;  %v9029_v42 = vld [vmem:[%s9696_s21 + $0x310] ss:$8 sps:$4 sm:$0xff]  }
 0x8dd   : > { %5347 = vmatpush1.bf16.msra.mxu0 %v8942_v57  ;;  %5378 = vmatprep.mubr.bf16.mxu0 %v9455_v6  ;;  %v9026_v57 = vld [vmem:[%s9696_s21 + $0x390] ss:$8 sps:$4 sm:$0xff]  }
 0x8de   : > { %4950 = vmatmul.mubr.bf16.vlgmr.msra.gmra.mxu1 %v4819_v28  ;;  %5348 = vmatprep.subr.bf16.mxu0 %v8950_v26  ;;  %v9037_v26 = vld [vmem:[%s9696_s21 + $0x304] ss:$8 sps:$4 sm:$0xff]   ;;  %v9040_v28 = vld [vmem:[%s9696_s21 + $0x4f4] ss:$8 sps:$4 sm:$0xff]  }
 0x8df   : > { %5204 = vmatpush1.bf16.msra.mxu1 %v8945_v14  ;;  %5235 = vmatprep.mubr.bf16.mxu1 %v9455_v6  ;;  %v9032_v14 = vld [vmem:[%s9696_s21 + $0x380] ss:$8 sps:$4 sm:$0xff]  }
 0x8e0   : > { %5205 = vmatprep.subr.bf16.mxu1 %v8953_v16  ;;  %v9035_v16 = vld [vmem:[%s9696_s21 + $0x300] ss:$8 sps:$4 sm:$0xff]  }
 0x8e1   : > { %5349 = vmatpush1.bf16.msra.mxu0 %v8948_v29  ;;  %v5533_v29 = vld [vmem:[#allocation5 + $0x38] sm:$0xff] }
 0x8e2   : > { %5350 = vmatprep.subr.bf16.mxu0 %v8956_v12  ;;  %v9043_v12 = vld [vmem:[%s9696_s21 + $0x474] ss:$8 sps:$4 sm:$0xff]  }
 0x8e3   : > { %5206 = vmatpush1.bf16.msra.mxu1 %v8951_v11  ;;  %v9038_v11 = vld [vmem:[%s9696_s21 + $0x4f0] ss:$8 sps:$4 sm:$0xff]  }
 0x8e4   : > { %5207 = vmatprep.subr.bf16.mxu1 %v8959_v9  ;;  %v5390_v9 = vld [vmem:[#allocation5 + $0x30] sm:$0xff] }
 0x8e5   : > { %5351 = vmatpush1.bf16.msra.mxu0 %v8954_v41  ;;  %v5534_v41 = vpack.c.bf16 %v5533_v29, %v5533_v29  ;;  %v9119_v29 = vld [vmem:[%s9696_s21 + $0x520] ss:$8 sps:$4 sm:$0xff]  }
 0x8e6   : > { %5352 = vmatprep.subr.bf16.mxu0 %v8962_v25  ;;  %v9046_v25 = vld [vmem:[%s9696_s21 + $0x4e4] ss:$8 sps:$4 sm:$0xff]  }
 0x8e7   : > { %5208 = vmatpush1.bf16.msra.mxu1 %v8957_v10  ;;  %v9041_v10 = vld [vmem:[%s9696_s21 + $0x470] ss:$8 sps:$4 sm:$0xff]  }
 0x8e8   : > { %5209 = vmatprep.subr.bf16.mxu1 %v8965_v32  ;;  %v5391_v32 = vpack.c.bf16 %v5390_v9, %v5390_v9  ;;  %v9130_v9 = vld [vmem:[%s9696_s21 + $0x584] ss:$8 sps:$4 sm:$0xff]  }
 0x8e9   : > { %5353 = vmatpush1.bf16.msra.mxu0 %v8960_v48  ;;  %v9049_v48 = vld [vmem:[%s9696_s21 + $0x464] ss:$8 sps:$4 sm:$0xff]  }
 0x8ea   : > { %5354 = vmatprep.subr.bf16.mxu0 %v8968_v51  ;;  %v9044_v51 = vld [vmem:[%s9696_s21 + $0x4e0] ss:$8 sps:$4 sm:$0xff]  }
 0x8eb   : > { %5210 = vmatpush1.bf16.msra.mxu1 %v8963_v50  ;;  %v9052_v50 = vld [vmem:[%s9696_s21 + $0x4d4] ss:$8 sps:$4 sm:$0xff]  }
 0x8ec   : > { %5211 = vmatprep.subr.bf16.mxu1 %v8971_v33  ;;  %v9047_v33 = vld [vmem:[%s9696_s21 + $0x460] ss:$8 sps:$4 sm:$0xff]  }
 0x8ed   : > { %5355 = vmatpush1.bf16.msra.mxu0 %v8966_v30  ;;  %v9055_v30 = vld [vmem:[%s9696_s21 + $0x454] ss:$8 sps:$4 sm:$0xff]  }
 0x8ee   : > { %5356 = vmatprep.subr.bf16.mxu0 %v8974_v15  ;;  %v9050_v15 = vld [vmem:[%s9696_s21 + $0x4d0] ss:$8 sps:$4 sm:$0xff]  }
 0x8ef   : > { %5212 = vmatpush1.bf16.msra.mxu1 %v8969_v53  ;;  %v9058_v53 = vld [vmem:[%s9696_s21 + $0x4c4] ss:$8 sps:$4 sm:$0xff]  }
 0x8f0   : > { %5213 = vmatprep.subr.bf16.mxu1 %v8977_v39  ;;  %v9053_v39 = vld [vmem:[%s9696_s21 + $0x450] ss:$8 sps:$4 sm:$0xff]  }
 0x8f1   : > { %5357 = vmatpush1.bf16.msra.mxu0 %v8972_v47  ;;  %v9061_v47 = vld [vmem:[%s9696_s21 + $0x444] ss:$8 sps:$4 sm:$0xff]  }
 0x8f2   : > { %5358 = vmatprep.subr.bf16.mxu0 %v8980_v46  ;;  %v9056_v46 = vld [vmem:[%s9696_s21 + $0x4c0] ss:$8 sps:$4 sm:$0xff]  }
 0x8f3   : > { %5214 = vmatpush1.bf16.msra.mxu1 %v8975_v43  ;;  %v9064_v43 = vld [vmem:[%s9696_s21 + $0x4b4] ss:$8 sps:$4 sm:$0xff]  }
 0x8f4   : > { %5215 = vmatprep.subr.bf16.mxu1 %v8983_v3  ;;  %v9059_v3 = vld [vmem:[%s9696_s21 + $0x440] ss:$8 sps:$4 sm:$0xff]  }
 0x8f5   : > { %5359 = vmatpush1.bf16.msra.mxu0 %v8978_v2  ;;  %v9067_v2 = vld [vmem:[%s9696_s21 + $0x434] ss:$8 sps:$4 sm:$0xff]  }
 0x8f6   : > { %5360 = vmatprep.subr.bf16.mxu0 %v8986_v62  ;;  %v9062_v62 = vld [vmem:[%s9696_s21 + $0x4b0] ss:$8 sps:$4 sm:$0xff]  }
 0x8f7   : > { %5216 = vmatpush1.bf16.msra.mxu1 %v8981_v23  ;;  %v9070_v23 = vld [vmem:[%s9696_s21 + $0x4a4] ss:$8 sps:$4 sm:$0xff]  }
 0x8f8   : > { %5217 = vmatprep.subr.bf16.mxu1 %v8989_v35  ;;  %v9065_v35 = vld [vmem:[%s9696_s21 + $0x430] ss:$8 sps:$4 sm:$0xff]  }
 0x8f9   : > { %5361 = vmatpush1.bf16.msra.mxu0 %v8984_v20  ;;  %v9073_v20 = vld [vmem:[%s9696_s21 + $0x424] ss:$8 sps:$4 sm:$0xff]  }
 0x8fa   : > { %5632 = vmatprep.subr.bf16.mxu0 %v8992_v59  ;;  %v9068_v59 = vld [vmem:[%s9696_s21 + $0x4a0] ss:$8 sps:$4 sm:$0xff]  }
 0x8fb   : > { %5218 = vmatpush1.bf16.msra.mxu1 %v8987_v8  ;;  %v9076_v8 = vld [vmem:[%s9696_s21 + $0x494] ss:$8 sps:$4 sm:$0xff]  }
 0x8fc   : > { %5379 = vmatmul.mubr.bf16.vlgmr.msra.gmra.mxu0 %v5248_v4  ;;  %5489 = vmatprep.subr.bf16.mxu1 %v8995_v49  ;;  %v9079_v49 = vld [vmem:[%s9696_s21 + $0x414] ss:$8 sps:$4 sm:$0xff]   ;;  %v9077_v4 = vld [vmem:[%s9696_s21 + $0x410] ss:$8 sps:$4 sm:$0xff]  }
 0x8fd   : > { %5633 = vmatpush1.bf16.msra.mxu0 %v8990_v56  ;;  %5664 = vmatprep.mubr.bf16.mxu0 %v9455_v6  ;;  %v9074_v56 = vld [vmem:[%s9696_s21 + $0x490] ss:$8 sps:$4 sm:$0xff]  }
 0x8fe   : > { %5236 = vmatmul.mubr.bf16.vlgmr.msra.gmra.mxu1 %v5105_v52  ;;  %5634 = vmatprep.subr.bf16.mxu0 %v8998_v58  ;;  %v9085_v58 = vld [vmem:[%s9696_s21 + $0x404] ss:$8 sps:$4 sm:$0xff]   ;;  %v9088_v52 = vld [vmem:[%s9696_s21 + $0x5f4] ss:$8 sps:$4 sm:$0xff]  }
 0x8ff   : > { %5490 = vmatpush1.bf16.msra.mxu1 %v8993_v24  ;;  %5521 = vmatprep.mubr.bf16.mxu1 %v9455_v6  ;;  %v9080_v24 = vld [vmem:[%s9696_s21 + $0x480] ss:$8 sps:$4 sm:$0xff]  }
 0x900   : > { %5491 = vmatprep.subr.bf16.mxu1 %v9001_v5  ;;  %v9083_v5 = vld [vmem:[%s9696_s21 + $0x400] ss:$8 sps:$4 sm:$0xff]  }
 0x901   : > { %5635 = vmatpush1.bf16.msra.mxu0 %v8996_v60  ;;  %v5819_v60 = vld [vmem:[#allocation5 + $0x48] sm:$0xff] }
 0x902   : > { %5636 = vmatprep.subr.bf16.mxu0 %v9004_v55  ;;  %v9091_v55 = vld [vmem:[%s9696_s21 + $0x574] ss:$8 sps:$4 sm:$0xff]  }
 0x903   : > { %5492 = vmatpush1.bf16.msra.mxu1 %v8999_v61  ;;  %v9086_v61 = vld [vmem:[%s9696_s21 + $0x5f0] ss:$8 sps:$4 sm:$0xff]  }
 0x904   : > { %5493 = vmatprep.subr.bf16.mxu1 %v9007_v40  ;;  %v5676_v40 = vld [vmem:[#allocation5 + $0x40] sm:$0xff] }
 0x905   : > { %5637 = vmatpush1.bf16.msra.mxu0 %v9002_v0  ;;  %v5820_v0 = vpack.c.bf16 %v5819_v60, %v5819_v60  ;;  %v9167_v60 = vld [vmem:[%s9696_s21 + $0x620] ss:$8 sps:$4 sm:$0xff]  }
 0x906   : > { %5638 = vmatprep.subr.bf16.mxu0 %v9010_v7  ;;  %v9094_v7 = vld [vmem:[%s9696_s21 + $0x5e4] ss:$8 sps:$4 sm:$0xff]  }
 0x907   : > { %5494 = vmatpush1.bf16.msra.mxu1 %v9005_v44  ;;  %v9089_v44 = vld [vmem:[%s9696_s21 + $0x570] ss:$8 sps:$4 sm:$0xff]  }
 0x908   : > { %5495 = vmatprep.subr.bf16.mxu1 %v9013_v34  ;;  %v5677_v34 = vpack.c.bf16 %v5676_v40, %v5676_v40  ;;  %v9178_v40 = vld [vmem:[%s9696_s21 + $0x684] ss:$8 sps:$4 sm:$0xff]  }
 0x909   : > { %5639 = vmatpush1.bf16.msra.mxu0 %v9008_v17  ;;  %v9097_v17 = vld [vmem:[%s9696_s21 + $0x564] ss:$8 sps:$4 sm:$0xff]  }
 0x90a   : > { %5640 = vmatprep.subr.bf16.mxu0 %v9016_v37  ;;  %v9092_v37 = vld [vmem:[%s9696_s21 + $0x5e0] ss:$8 sps:$4 sm:$0xff]  }
 0x90b   : > { %5496 = vmatpush1.bf16.msra.mxu1 %v9011_v45  ;;  %v9100_v45 = vld [vmem:[%s9696_s21 + $0x5d4] ss:$8 sps:$4 sm:$0xff]  }
 0x90c   : > { %5497 = vmatprep.subr.bf16.mxu1 %v9019_v54  ;;  %v9095_v54 = vld [vmem:[%s9696_s21 + $0x560] ss:$8 sps:$4 sm:$0xff]  }
 0x90d   : > { %5641 = vmatpush1.bf16.msra.mxu0 %v9014_v19  ;;  %v9103_v19 = vld [vmem:[%s9696_s21 + $0x554] ss:$8 sps:$4 sm:$0xff]  }
 0x90e   : > { %5642 = vmatprep.subr.bf16.mxu0 %v9022_v18  ;;  %v9098_v18 = vld [vmem:[%s9696_s21 + $0x5d0] ss:$8 sps:$4 sm:$0xff]  }
 0x90f   : > { %5498 = vmatpush1.bf16.msra.mxu1 %v9017_v21  ;;  %v9106_v21 = vld [vmem:[%s9696_s21 + $0x5c4] ss:$8 sps:$4 sm:$0xff]  }
 0x910   : > { %5499 = vmatprep.subr.bf16.mxu1 %v9025_v63  ;;  %v9101_v63 = vld [vmem:[%s9696_s21 + $0x550] ss:$8 sps:$4 sm:$0xff]  }
 0x911   : > { %5643 = vmatpush1.bf16.msra.mxu0 %v9020_v13  ;;  %v9109_v13 = vld [vmem:[%s9696_s21 + $0x544] ss:$8 sps:$4 sm:$0xff]  }
 0x912   : > { %5644 = vmatprep.subr.bf16.mxu0 %v9028_v31  ;;  %v9104_v31 = vld [vmem:[%s9696_s21 + $0x5c0] ss:$8 sps:$4 sm:$0xff]  }
 0x913   : > { %5500 = vmatpush1.bf16.msra.mxu1 %v9023_v36  ;;  %v9112_v36 = vld [vmem:[%s9696_s21 + $0x5b4] ss:$8 sps:$4 sm:$0xff]  }
 0x914   : > { %5501 = vmatprep.subr.bf16.mxu1 %v9031_v1  ;;  %v9107_v1 = vld [vmem:[%s9696_s21 + $0x540] ss:$8 sps:$4 sm:$0xff]  }
 0x915   : > { %5645 = vmatpush1.bf16.msra.mxu0 %v9026_v57  ;;  %v9115_v57 = vld [vmem:[%s9696_s21 + $0x534] ss:$8 sps:$4 sm:$0xff]  }
 0x916   : > { %5646 = vmatprep.subr.bf16.mxu0 %v9034_v22  ;;  %v9110_v22 = vld [vmem:[%s9696_s21 + $0x5b0] ss:$8 sps:$4 sm:$0xff]  }
 0x917   : > { %5502 = vmatpush1.bf16.msra.mxu1 %v9029_v42  ;;  %v9118_v42 = vld [vmem:[%s9696_s21 + $0x5a4] ss:$8 sps:$4 sm:$0xff]  }
 0x918   : > { %5503 = vmatprep.subr.bf16.mxu1 %v9037_v26  ;;  %v9113_v26 = vld [vmem:[%s9696_s21 + $0x530] ss:$8 sps:$4 sm:$0xff]  }
 0x919   : > { %5647 = vmatpush1.bf16.msra.mxu0 %v9032_v14  ;;  %v9121_v14 = vld [vmem:[%s9696_s21 + $0x524] ss:$8 sps:$4 sm:$0xff]  }
 0x91a   : > { %5918 = vmatprep.subr.bf16.mxu0 %v9040_v28  ;;  %v9116_v28 = vld [vmem:[%s9696_s21 + $0x5a0] ss:$8 sps:$4 sm:$0xff]  }
 0x91b   : > { %5504 = vmatpush1.bf16.msra.mxu1 %v9035_v16  ;;  %v9124_v16 = vld [vmem:[%s9696_s21 + $0x594] ss:$8 sps:$4 sm:$0xff]  }
 0x91c   : > { %5665 = vmatmul.mubr.bf16.vlgmr.msra.gmra.mxu0 %v5534_v41  ;;  %5775 = vmatprep.subr.bf16.mxu1 %v9043_v12  ;;  %v9127_v12 = vld [vmem:[%s9696_s21 + $0x514] ss:$8 sps:$4 sm:$0xff]   ;;  %v9125_v41 = vld [vmem:[%s9696_s21 + $0x510] ss:$8 sps:$4 sm:$0xff]  }
 0x91d   : > { %5919 = vmatpush1.bf16.msra.mxu0 %v9038_v11  ;;  %5950 = vmatprep.mubr.bf16.mxu0 %v9455_v6  ;;  %v9122_v11 = vld [vmem:[%s9696_s21 + $0x590] ss:$8 sps:$4 sm:$0xff]  }
 0x91e   : > { %5522 = vmatmul.mubr.bf16.vlgmr.msra.gmra.mxu1 %v5391_v32  ;;  %5920 = vmatprep.subr.bf16.mxu0 %v9046_v25  ;;  %v9133_v25 = vld [vmem:[%s9696_s21 + $0x504] ss:$8 sps:$4 sm:$0xff]   ;;  %v9136_v32 = vld [vmem:[%s9696_s21 + $0x6f4] ss:$8 sps:$4 sm:$0xff]  }
 0x91f   : > { %5776 = vmatpush1.bf16.msra.mxu1 %v9041_v10  ;;  %5807 = vmatprep.mubr.bf16.mxu1 %v9455_v6  ;;  %v9128_v10 = vld [vmem:[%s9696_s21 + $0x580] ss:$8 sps:$4 sm:$0xff]  }
 0x920   : > { %5777 = vmatprep.subr.bf16.mxu1 %v9049_v48  ;;  %v9131_v48 = vld [vmem:[%s9696_s21 + $0x500] ss:$8 sps:$4 sm:$0xff]  }
 0x921   : > { %5921 = vmatpush1.bf16.msra.mxu0 %v9044_v51  ;;  %v6105_v51 = vld [vmem:[#allocation5 + $0x58] sm:$0xff] }
 0x922   : > { %5922 = vmatprep.subr.bf16.mxu0 %v9052_v50  ;;  %v9139_v50 = vld [vmem:[%s9696_s21 + $0x674] ss:$8 sps:$4 sm:$0xff]  }
 0x923   : > { %5778 = vmatpush1.bf16.msra.mxu1 %v9047_v33  ;;  %v9134_v33 = vld [vmem:[%s9696_s21 + $0x6f0] ss:$8 sps:$4 sm:$0xff]  }
 0x924   : > { %5779 = vmatprep.subr.bf16.mxu1 %v9055_v30  ;;  %v5962_v30 = vld [vmem:[#allocation5 + $0x50] sm:$0xff] }
 0x925   : > { %5923 = vmatpush1.bf16.msra.mxu0 %v9050_v15  ;;  %v6106_v15 = vpack.c.bf16 %v6105_v51, %v6105_v51  ;;  %v9208_v51 = vld [vmem:[%s9696_s21 + $0x7b4] ss:$8 sps:$4 sm:$0xff]  }
 0x926   : > { %5924 = vmatprep.subr.bf16.mxu0 %v9058_v53  ;;  %v9142_v53 = vld [vmem:[%s9696_s21 + $0x6e4] ss:$8 sps:$4 sm:$0xff]  }
 0x927   : > { %5780 = vmatpush1.bf16.msra.mxu1 %v9053_v39  ;;  %v9137_v39 = vld [vmem:[%s9696_s21 + $0x670] ss:$8 sps:$4 sm:$0xff]  }
 0x928   : > { %5781 = vmatprep.subr.bf16.mxu1 %v9061_v47  ;;  %v5963_v47 = vpack.c.bf16 %v5962_v30, %v5962_v30  ;;  %v9206_v30 = vld [vmem:[%s9696_s21 + $0x7b0] ss:$8 sps:$4 sm:$0xff]  }
 0x929   : > { %5925 = vmatpush1.bf16.msra.mxu0 %v9056_v46  ;;  %v9145_v46 = vld [vmem:[%s9696_s21 + $0x664] ss:$8 sps:$4 sm:$0xff]  }
 0x92a   : > { %5926 = vmatprep.subr.bf16.mxu0 %v9064_v43  ;;  %v9140_v43 = vld [vmem:[%s9696_s21 + $0x6e0] ss:$8 sps:$4 sm:$0xff]  }
 0x92b   : > { %5782 = vmatpush1.bf16.msra.mxu1 %v9059_v3  ;;  %v9148_v3 = vld [vmem:[%s9696_s21 + $0x6d4] ss:$8 sps:$4 sm:$0xff]  }
 0x92c   : > { %5783 = vmatprep.subr.bf16.mxu1 %v9067_v2  ;;  %v9143_v2 = vld [vmem:[%s9696_s21 + $0x660] ss:$8 sps:$4 sm:$0xff]  }
 0x92d   : > { %5927 = vmatpush1.bf16.msra.mxu0 %v9062_v62  ;;  %v9151_v62 = vld [vmem:[%s9696_s21 + $0x654] ss:$8 sps:$4 sm:$0xff]  }
 0x92e   : > { %5928 = vmatprep.subr.bf16.mxu0 %v9070_v23  ;;  %v9146_v23 = vld [vmem:[%s9696_s21 + $0x6d0] ss:$8 sps:$4 sm:$0xff]  }
 0x92f   : > { %5784 = vmatpush1.bf16.msra.mxu1 %v9065_v35  ;;  %v9154_v35 = vld [vmem:[%s9696_s21 + $0x6c4] ss:$8 sps:$4 sm:$0xff]  }
 0x930   : > { %5785 = vmatprep.subr.bf16.mxu1 %v9073_v20  ;;  %v9149_v20 = vld [vmem:[%s9696_s21 + $0x650] ss:$8 sps:$4 sm:$0xff]  }
 0x931   : > { %5929 = vmatpush1.bf16.msra.mxu0 %v9068_v59  ;;  %v9157_v59 = vld [vmem:[%s9696_s21 + $0x644] ss:$8 sps:$4 sm:$0xff]  }
 0x932   : > { %5930 = vmatprep.subr.bf16.mxu0 %v9076_v8  ;;  %v9152_v8 = vld [vmem:[%s9696_s21 + $0x6c0] ss:$8 sps:$4 sm:$0xff]  }
 0x933   : > { %5786 = vmatpush1.bf16.msra.mxu1 %v9071_v38  ;;  %v9160_v38 = vld [vmem:[%s9696_s21 + $0x6b4] ss:$8 sps:$4 sm:$0xff]  }
 0x934   : > { %5787 = vmatprep.subr.bf16.mxu1 %v9079_v49  ;;  %v9155_v49 = vld [vmem:[%s9696_s21 + $0x640] ss:$8 sps:$4 sm:$0xff]  }
 0x935   : > { %5931 = vmatpush1.bf16.msra.mxu0 %v9074_v56  ;;  %v9163_v56 = vld [vmem:[%s9696_s21 + $0x634] ss:$8 sps:$4 sm:$0xff]  }
 0x936   : > { %5932 = vmatprep.subr.bf16.mxu0 %v9082_v27  ;;  %v9158_v27 = vld [vmem:[%s9696_s21 + $0x6b0] ss:$8 sps:$4 sm:$0xff]  }
 0x937   : > { %5788 = vmatpush1.bf16.msra.mxu1 %v9077_v4  ;;  %v9166_v4 = vld [vmem:[%s9696_s21 + $0x6a4] ss:$8 sps:$4 sm:$0xff]  }
 0x938   : > { %5789 = vmatprep.subr.bf16.mxu1 %v9085_v58  ;;  %v9161_v58 = vld [vmem:[%s9696_s21 + $0x630] ss:$8 sps:$4 sm:$0xff]  }
 0x939   : > { %5933 = vmatpush1.bf16.msra.mxu0 %v9080_v24  ;;  %v9169_v24 = vld [vmem:[%s9696_s21 + $0x624] ss:$8 sps:$4 sm:$0xff]  }
 0x93a   : > { %6204 = vmatprep.subr.bf16.mxu0 %v9088_v52  ;;  %v9164_v52 = vld [vmem:[%s9696_s21 + $0x6a0] ss:$8 sps:$4 sm:$0xff]  }
 0x93b   : > { %5790 = vmatpush1.bf16.msra.mxu1 %v9083_v5  ;;  %v9172_v5 = vld [vmem:[%s9696_s21 + $0x694] ss:$8 sps:$4 sm:$0xff]  }
 0x93c   : > { %5951 = vmatmul.mubr.bf16.vlgmr.msra.gmra.mxu0 %v5820_v0  ;;  %6061 = vmatprep.subr.bf16.mxu1 %v9091_v55  ;;  %v9175_v55 = vld [vmem:[%s9696_s21 + $0x614] ss:$8 sps:$4 sm:$0xff]   ;;  %v9173_v0 = vld [vmem:[%s9696_s21 + $0x610] ss:$8 sps:$4 sm:$0xff]  }
 0x93d   : > { %6205 = vmatpush1.bf16.msra.mxu0 %v9086_v61  ;;  %6236 = vmatprep.mubr.bf16.mxu0 %v9455_v6  ;;  %v9170_v61 = vld [vmem:[%s9696_s21 + $0x690] ss:$8 sps:$4 sm:$0xff]  }
 0x93e   : > { %5808 = vmatmul.mubr.bf16.vlgmr.msra.gmra.mxu1 %v5677_v34  ;;  %6206 = vmatprep.subr.bf16.mxu0 %v9094_v7  ;;  %v9181_v7 = vld [vmem:[%s9696_s21 + $0x604] ss:$8 sps:$4 sm:$0xff]   ;;  %v9184_v34 = vld [vmem:[%s9696_s21 + $0x7f4] ss:$8 sps:$4 sm:$0xff]  }
 0x93f   : > { %6062 = vmatpush1.bf16.msra.mxu1 %v9089_v44  ;;  %6093 = vmatprep.mubr.bf16.mxu1 %v9455_v6  ;;  %v9176_v44 = vld [vmem:[%s9696_s21 + $0x680] ss:$8 sps:$4 sm:$0xff]  }
 0x940   : > { %6063 = vmatprep.subr.bf16.mxu1 %v9097_v17  ;;  %v9179_v17 = vld [vmem:[%s9696_s21 + $0x600] ss:$8 sps:$4 sm:$0xff]  }
 0x941   : > { %6207 = vmatpush1.bf16.msra.mxu0 %v9092_v37  ;;  %v6391_v37 = vld [vmem:[#allocation5 + $0x68] sm:$0xff] }
 0x942   : > { %6208 = vmatprep.subr.bf16.mxu0 %v9100_v45  ;;  %v9187_v45 = vld [vmem:[%s9696_s21 + $0x774] ss:$8 sps:$4 sm:$0xff]  }
 0x943   : > { %6064 = vmatpush1.bf16.msra.mxu1 %v9095_v54  ;;  %v9182_v54 = vld [vmem:[%s9696_s21 + $0x7f0] ss:$8 sps:$4 sm:$0xff]  }
 0x944   : > { %6065 = vmatprep.subr.bf16.mxu1 %v9103_v19  ;;  %v6248_v19 = vld [vmem:[#allocation5 + $0x60] sm:$0xff] }
 0x945   : > { %6209 = vmatpush1.bf16.msra.mxu0 %v9098_v18  ;;  %v6392_v18 = vpack.c.bf16 %v6391_v37, %v6391_v37 }
 0x946   : > { %6210 = vmatprep.subr.bf16.mxu0 %v9106_v21  ;;  %v9190_v21 = vld [vmem:[%s9696_s21 + $0x7e4] ss:$8 sps:$4 sm:$0xff]  }
 0x947   : > { %6066 = vmatpush1.bf16.msra.mxu1 %v9101_v63  ;;  %v9185_v63 = vld [vmem:[%s9696_s21 + $0x770] ss:$8 sps:$4 sm:$0xff]  }
 0x948   : > { %6067 = vmatprep.subr.bf16.mxu1 %v9109_v13 }
 0x949   : > { %6211 = vmatpush1.bf16.msra.mxu0 %v9104_v31  ;;  %v6249_v31 = vpack.c.bf16 %v6248_v19, %v6248_v19 }
 0x94a   : > { %6212 = vmatprep.subr.bf16.mxu0 %v9112_v36  ;;  %v9193_v36 = vld [vmem:[%s9696_s21 + $0x764] ss:$8 sps:$4 sm:$0xff]  }
 0x94b   : > { %6068 = vmatpush1.bf16.msra.mxu1 %v9107_v1  ;;  %v9188_v1 = vld [vmem:[%s9696_s21 + $0x7e0] ss:$8 sps:$4 sm:$0xff]  }
 0x94c   : > { %6069 = vmatprep.subr.bf16.mxu1 %v9115_v57 }
 0x94d   : > { %6213 = vmatpush1.bf16.msra.mxu0 %v9110_v22 }
 0x94e   : > { %6214 = vmatprep.subr.bf16.mxu0 %v9118_v42  ;;  %v9196_v42 = vld [vmem:[%s9696_s21 + $0x7d4] ss:$8 sps:$4 sm:$0xff]  }
 0x94f   : > { %6070 = vmatpush1.bf16.msra.mxu1 %v9113_v26 }
 0x950   : > { %6071 = vmatprep.subr.bf16.mxu1 %v9121_v14  ;;  %v9191_v14 = vld [vmem:[%s9696_s21 + $0x760] ss:$8 sps:$4 sm:$0xff]  }
 0x951   : > { %6215 = vmatpush1.bf16.msra.mxu0 %v9116_v28 }
 0x952   : > { %6216 = vmatprep.subr.bf16.mxu0 %v9124_v16 }
 0x953   : > { %6072 = vmatpush1.bf16.msra.mxu1 %v9119_v29  ;;  %v9199_v29 = vld [vmem:[%s9696_s21 + $0x754] ss:$8 sps:$4 sm:$0xff]  }
 0x954   : > { %6073 = vmatprep.subr.bf16.mxu1 %v9127_v12 }
 0x955   : > { %6217 = vmatpush1.bf16.msra.mxu0 %v9122_v11  ;;  %v9194_v11 = vld [vmem:[%s9696_s21 + $0x7d0] ss:$8 sps:$4 sm:$0xff]  }
 0x956   : > { %6218 = vmatprep.subr.bf16.mxu0 %v9130_v9 }
 0x957   : > { %6074 = vmatpush1.bf16.msra.mxu1 %v9125_v41 }
 0x958   : > { %6075 = vmatprep.subr.bf16.mxu1 %v9133_v25  ;;  %v9202_v25 = vld [vmem:[%s9696_s21 + $0x7c4] ss:$8 sps:$4 sm:$0xff]  }
 0x959   : > { %6219 = vmatpush1.bf16.msra.mxu0 %v9128_v10 }
 0x95a   : > { %6490 = vmatprep.subr.bf16.mxu0 %v9136_v32  ;;  %v9205_v32 = vld [vmem:[%s9696_s21 + $0x744] ss:$8 sps:$4 sm:$0xff]  }
 0x95b   : > { %6076 = vmatpush1.bf16.msra.mxu1 %v9131_v48  ;;  %v9200_v48 = vld [vmem:[%s9696_s21 + $0x7c0] ss:$8 sps:$4 sm:$0xff]  }
 0x95c   : > { %6237 = vmatmul.mubr.bf16.vlgmr.msra.gmra.mxu0 %v6106_v15  ;;  %6347 = vmatprep.subr.bf16.mxu1 %v9139_v50  ;;  %v9203_v50 = vld [vmem:[%s9696_s21 + $0x740] ss:$8 sps:$4 sm:$0xff]   ;;  %v9214_v15 = vld [vmem:[%s9696_s21 + $0x7a4] ss:$8 sps:$4 sm:$0xff]  }
 0x95d   : > { %6491 = vmatpush1.bf16.msra.mxu0 %v9134_v33  ;;  %6522 = vmatprep.mubr.bf16.mxu0 %v9455_v6  ;;  %v9211_v33 = vld [vmem:[%s9696_s21 + $0x734] ss:$8 sps:$4 sm:$0xff]  }
 0x95e   : > { %6094 = vmatmul.mubr.bf16.vlgmr.msra.gmra.mxu1 %v5963_v47  ;;  %6492 = vmatprep.subr.bf16.mxu0 %v9142_v53  ;;  %v9209_v53 = vld [vmem:[%s9696_s21 + $0x730] ss:$8 sps:$4 sm:$0xff]   ;;  %v9212_v47 = vld [vmem:[%s9696_s21 + $0x7a0] ss:$8 sps:$4 sm:$0xff]  }
 0x95f   : > { %6348 = vmatpush1.bf16.msra.mxu1 %v9137_v39  ;;  %6379 = vmatprep.mubr.bf16.mxu1 %v9455_v6  ;;  %v9217_v39 = vld [vmem:[%s9696_s21 + $0x724] ss:$8 sps:$4 sm:$0xff]  }
 0x960   : > { %6349 = vmatprep.subr.bf16.mxu1 %v9145_v46  ;;  %v9220_v46 = vld [vmem:[%s9696_s21 + $0x794] ss:$8 sps:$4 sm:$0xff]  }
 0x961   : > { %6493 = vmatpush1.bf16.msra.mxu0 %v9140_v43  ;;  %v9215_v43 = vld [vmem:[%s9696_s21 + $0x720] ss:$8 sps:$4 sm:$0xff]  }
 0x962   : > { %6494 = vmatprep.subr.bf16.mxu0 %v9148_v3  ;;  %v9223_v3 = vld [vmem:[%s9696_s21 + $0x714] ss:$8 sps:$4 sm:$0xff]  }
 0x963   : > { %6350 = vmatpush1.bf16.msra.mxu1 %v9143_v2  ;;  %v9218_v2 = vld [vmem:[%s9696_s21 + $0x790] ss:$8 sps:$4 sm:$0xff]  }
 0x964   : > { %6351 = vmatprep.subr.bf16.mxu1 %v9151_v62  ;;  %v9226_v62 = vld [vmem:[%s9696_s21 + $0x784] ss:$8 sps:$4 sm:$0xff]  }
 0x965   : > { %6495 = vmatpush1.bf16.msra.mxu0 %v9146_v23  ;;  %v9221_v23 = vld [vmem:[%s9696_s21 + $0x710] ss:$8 sps:$4 sm:$0xff]  }
 0x966   : > { %6496 = vmatprep.subr.bf16.mxu0 %v9154_v35  ;;  %v9229_v35 = vld [vmem:[%s9696_s21 + $0x704] ss:$8 sps:$4 sm:$0xff]  }
 0x967   : > { %6352 = vmatpush1.bf16.msra.mxu1 %v9149_v20  ;;  %v9224_v20 = vld [vmem:[%s9696_s21 + $0x780] ss:$8 sps:$4 sm:$0xff]  }
 0x968   : > { %6353 = vmatprep.subr.bf16.mxu1 %v9157_v59  ;;  %v9227_v59 = vld [vmem:[%s9696_s21 + $0x700] ss:$8 sps:$4 sm:$0xff]  }
 0x969   : > { %6497 = vmatpush1.bf16.msra.mxu0 %v9152_v8  ;;  %v6677_v8 = vld [vmem:[#allocation5 + $0x78] sm:$0xff] }
 0x96a   : > { %6498 = vmatprep.subr.bf16.mxu0 %v9160_v38  ;;  %v6534_v38 = vld [vmem:[#allocation5 + $0x70] sm:$0xff] }
 0x96b   : > { %6354 = vmatpush1.bf16.msra.mxu1 %v9155_v49  ;;  %v6678_v49 = vpack.c.bf16 %v6677_v8, %v6677_v8 }
 0x96c   : > { %6355 = vmatprep.subr.bf16.mxu1 %v9163_v56 }
 0x96d   : > { %6499 = vmatpush1.bf16.msra.mxu0 %v9158_v27  ;;  %v6535_v27 = vpack.c.bf16 %v6534_v38, %v6534_v38 }
 0x96e   : > { %6500 = vmatprep.subr.bf16.mxu0 %v9166_v4 }
 0x96f   : > { %6356 = vmatpush1.bf16.msra.mxu1 %v9161_v58 }
 0x970   : > { %6357 = vmatprep.subr.bf16.mxu1 %v9169_v24 }
 0x971   : > { %6501 = vmatpush1.bf16.msra.mxu0 %v9164_v52 }
 0x972   : > { %6502 = vmatprep.subr.bf16.mxu0 %v9172_v5 }
 0x973   : > { %6358 = vmatpush1.bf16.msra.mxu1 %v9167_v60 }
 0x974   : > { %6359 = vmatprep.subr.bf16.mxu1 %v9175_v55 }
 0x975   : > { %6503 = vmatpush1.bf16.msra.mxu0 %v9170_v61 }
 0x976   : > { %6504 = vmatprep.subr.bf16.mxu0 %v9178_v40 }
 0x977   : > { %6360 = vmatpush1.bf16.msra.mxu1 %v9173_v0 }
 0x978   : > { %6361 = vmatprep.subr.bf16.mxu1 %v9181_v7 }
 0x979   : > { %6505 = vmatpush1.bf16.msra.mxu0 %v9176_v44 }
 0x97a   : > { %6776 = vmatprep.subr.bf16.mxu0 %v9184_v34 }
 0x97b   : > { %6362 = vmatpush1.bf16.msra.mxu1 %v9179_v17 }
 0x97c   : > { %6523 = vmatmul.mubr.bf16.vlgmr.msra.gmra.mxu0 %v6392_v18  ;;  %v4810_v13 = vpop.f32.mrf.mxu0  ;;  %6633 = vmatprep.subr.bf16.mxu1 %v9187_v45 }
 0x97d   : > { %6777 = vmatpush1.bf16.msra.mxu0 %v9182_v54  ;;  %6808 = vmatprep.mubr.bf16.mxu0 %v9455_v6 }
 0x97e   : > { %6380 = vmatmul.mubr.bf16.vlgmr.msra.gmra.mxu1 %v6249_v31  ;;  %v4689_v57 = vpop.f32.mrf.mxu1  ;;  %v4812_v22 = vpop.f32.mrf.mxu0  ;;  %6778 = vmatprep.subr.bf16.mxu0 %v9190_v21 }
 0x97f   : > { %v11140_v26 = vadd.f32 %v4810_v13, %v4689_v57  ;;  %6634 = vmatpush1.bf16.msra.mxu1 %v9185_v63  ;;  %6665 = vmatprep.mubr.bf16.mxu1 %v9455_v6  ;;  %v9197_v6 = vld [vmem:[%s9696_s21 + $0x750] ss:$8 sps:$4 sm:$0xff]   ;;  %s349_s21 = scalar_lea.vmem [#allocation14], %s7012_s17 }
 0x980   : > { %v4691_v28 = vpop.f32.mrf.mxu1  ;;  %v4814_v16 = vpop.f32.mrf.mxu0  ;;  %6635 = vmatprep.subr.bf16.mxu1 %v9193_v36 }
 0x981   : > { %v11145_v12 = vadd.f32 %v4812_v22, %v4691_v28  ;;  %6779 = vmatpush1.bf16.msra.mxu0 %v9188_v1 }
 0x982   : > { %v4693_v9 = vpop.f32.mrf.mxu1  ;;  %v4815_v41 = vpop.f32.mrf.mxu0  ;;  %6780 = vmatprep.subr.bf16.mxu0 %v9196_v42 }
 0x983   : > { %6636 = vmatpush1.bf16.msra.mxu1 %v9191_v14 }
 0x984   : > { %v4694_v10 = vpop.f32.mrf.mxu1  ;;  %6637 = vmatprep.subr.bf16.mxu1 %v9199_v29 }
 0x985   : > { %6781 = vmatpush1.bf16.msra.mxu0 %v9194_v11 }
 0x986   : > { %6782 = vmatprep.subr.bf16.mxu0 %v9202_v25 }
 0x987   : > { %6638 = vmatpush1.bf16.msra.mxu1 %v9197_v6 }
 0x988   : > { %6639 = vmatprep.subr.bf16.mxu1 %v9205_v32 }
 0x989   : > { %6783 = vmatpush1.bf16.msra.mxu0 %v9200_v48 }
 0x98a   : > { %6784 = vmatprep.subr.bf16.mxu0 %v9208_v51 }
 0x98b   : > { %6640 = vmatpush1.bf16.msra.mxu1 %v9203_v50 }
 0x98c   : > { %6641 = vmatprep.subr.bf16.mxu1 %v9211_v33 }
 0x98d   : > { %6785 = vmatpush1.bf16.msra.mxu0 %v9206_v30 }
 0x98e   : > { %6786 = vmatprep.subr.bf16.mxu0 %v9214_v15 }
 0x98f   : > { %6642 = vmatpush1.bf16.msra.mxu1 %v9209_v53 }
 0x990   : > { %6643 = vmatprep.subr.bf16.mxu1 %v9217_v39 }
 0x991   : > { %6787 = vmatpush1.bf16.msra.mxu0 %v9212_v47 }
 0x992   : > { %6788 = vmatprep.subr.bf16.mxu0 %v9220_v46 }
 0x993   : > { %6644 = vmatpush1.bf16.msra.mxu1 %v9215_v43 }
 0x994   : > { %6645 = vmatprep.subr.bf16.mxu1 %v9223_v3 }
 0x995   : > { %6789 = vmatpush1.bf16.msra.mxu0 %v9218_v2 }
 0x996   : > { %6790 = vmatprep.subr.bf16.mxu0 %v9226_v62 }
 0x997   : > { %6646 = vmatpush1.bf16.msra.mxu1 %v9221_v23 }
 0x998   : > { %6647 = vmatprep.subr.bf16.mxu1 %v9229_v35 }
 0x999   : > { %6791 = vmatpush1.bf16.msra.mxu0 %v9224_v20 }
 0x99b   : > { %6648 = vmatpush1.bf16.msra.mxu1 %v9227_v59 }
 0x99c   : > { %v5094_v56 = vpop.f32.mrf.mxu0  ;;  %6809 = vmatmul.mubr.bf16.vlgmr.msra.gmra.mxu0 %v6678_v49 }
 0x99e   : > { %v4951_v4 = vpop.f32.mrf.mxu1  ;;  %v5096_v58 = vpop.f32.mrf.mxu0  ;;  %6666 = vmatmul.mubr.bf16.vlgmr.msra.gmra.mxu1 %v6535_v27 }
 0x99f   : > { %v4958_v24 = vadd.f32 %v4951_v4, %v11140_v26 }
 0x9a0   : > { %v4953_v52 = vpop.f32.mrf.mxu1  ;;  %v5098_v5 = vpop.f32.mrf.mxu0 }
 0x9a1   : > { %v4959_v60 = vadd.f32 %v4953_v52, %v11145_v12  ;;  %v5101_v55 = vadd.f32 %v5094_v56, %v4958_v24 }
 0x9a2   : > { %v4955_v61 = vpop.f32.mrf.mxu1  ;;  %v5099_v40 = vpop.f32.mrf.mxu0 }
 0x9a3   : > { %v5102_v0 = vadd.f32 %v5096_v58, %v4959_v60  ;;  %v11398_v60 = vld [vmem:[#allocation39_spill] sm:$0xff]  ;;  %v6819_v40 = vld [vmem:[%s349_s21] ss:$4 sm:$0x3] }
 0x9a4   : > { %v4956_v7 = vpop.f32.mrf.mxu1 }
 0x9a5   : > { %v6831_v7 = vsub.s32 1, %v11398_v60 }
 0x9bc   : > { %v5380_v44 = vpop.f32.mrf.mxu0 }
 0x9be   : > { %v5237_v34 = vpop.f32.mrf.mxu1  ;;  %v5382_v17 = vpop.f32.mrf.mxu0 }
 0x9bf   : > { %v5244_v37 = vadd.f32 %v5237_v34, %v5101_v55  ;;  %v6827_v55 = vsub.s32 0, %v11398_v60 }
 0x9c0   : > { %v5239_v45 = vpop.f32.mrf.mxu1  ;;  %v5384_v54 = vpop.f32.mrf.mxu0 }
 0x9c1   : > { %v5245_v19 = vadd.f32 %v5239_v45, %v5102_v0  ;;  %v5387_v18 = vadd.f32 %v5380_v44, %v5244_v37  ;;  %v6828_v37 = vrot.slane %v6819_v40, %v6827_v55  ;;  %v7633_v54 = vld [vmem:[%s349_s21 + $0x1] ss:$4 sm:$0x3] }
 0x9c2   : > { %v5241_v21 = vpop.f32.mrf.mxu1  ;;  %v5385_v63 = vpop.f32.mrf.mxu0 }
 0x9c3   : > { %v5388_v13 = vadd.f32 %v5382_v17, %v5245_v19 }
 0x9c4   : > { %v5242_v31 = vpop.f32.mrf.mxu1 }
 0x9c5   : > { %v7634_v31 = vld [vmem:[%s349_s21 + $0x2] ss:$4 sm:$0x3] }
 0x9dc   : > { %v5666_v36 = vpop.f32.mrf.mxu0 }
 0x9de   : > { %v5523_v1 = vpop.f32.mrf.mxu1  ;;  %v5668_v57 = vpop.f32.mrf.mxu0 }
 0x9df   : > { %v5530_v22 = vadd.f32 %v5523_v1, %v5387_v18 }
 0x9e0   : > { %v5525_v42 = vpop.f32.mrf.mxu1  ;;  %v5670_v26 = vpop.f32.mrf.mxu0 }
 0x9e1   : > { %v5531_v14 = vadd.f32 %v5525_v42, %v5388_v13  ;;  %v5673_v28 = vadd.f32 %v5666_v36, %v5530_v22  ;;  %v6832_v13 = vrot.slane %v6819_v40, %v6831_v7  ;;  %v6843_v22 = vrot.slane %v7633_v54, %v6827_v55 }
 0x9e2   : > { %v5527_v16 = vpop.f32.mrf.mxu1  ;;  %v5671_v29 = vpop.f32.mrf.mxu0 }
 0x9e3   : > { %v5674_v12 = vadd.f32 %v5668_v57, %v5531_v14  ;;  %v6847_v29 = vrot.slane %v7633_v54, %v6831_v7 }
 0x9e4   : > { %v5528_v11 = vpop.f32.mrf.mxu1 }
 0x9fc   : > { %v5952_v9 = vpop.f32.mrf.mxu0 }
 0x9fe   : > { %v5809_v41 = vpop.f32.mrf.mxu1  ;;  %v5954_v25 = vpop.f32.mrf.mxu0 }
 0x9ff   : > { %v5816_v6 = vadd.f32 %v5809_v41, %v5673_v28  ;;  %v6856_v28 = vrot.slane %v7634_v31, %v6827_v55 }
 0xa00   : > { %v5811_v10 = vpop.f32.mrf.mxu1  ;;  %v5956_v32 = vpop.f32.mrf.mxu0 }
 0xa01   : > { %v5817_v48 = vadd.f32 %v5811_v10, %v5674_v12  ;;  %v5959_v51 = vadd.f32 %v5952_v9, %v5816_v6  ;;  %v6860_v9 = vrot.slane %v7634_v31, %v6831_v7 }
 0xa02   : > { %v5813_v50 = vpop.f32.mrf.mxu1  ;;  %v5957_v33 = vpop.f32.mrf.mxu0 }
 0xa03   : > { %v5960_v30 = vadd.f32 %v5954_v25, %v5817_v48 }
 0xa04   : > { %v5814_v15 = vpop.f32.mrf.mxu1 }
 0xa1c   : > { %v6238_v53 = vpop.f32.mrf.mxu0 }
 0xa1e   : > { %v6095_v39 = vpop.f32.mrf.mxu1  ;;  %v6240_v47 = vpop.f32.mrf.mxu0 }
 0xa1f   : > { %v6102_v27 = vadd.f32 %v6095_v39, %v5959_v51 }
 0xa20   : > { %v6097_v46 = vpop.f32.mrf.mxu1  ;;  %v6242_v43 = vpop.f32.mrf.mxu0 }
 0xa21   : > { %v6103_v4 = vadd.f32 %v6097_v46, %v5960_v30  ;;  %v6245_v58 = vadd.f32 %v6238_v53, %v6102_v27 }
 0xa22   : > { %v6099_v3 = vpop.f32.mrf.mxu1  ;;  %v6243_v2 = vpop.f32.mrf.mxu0 }
 0xa23   : > { %v6246_v52 = vadd.f32 %v6240_v47, %v6103_v4 }
 0xa24   : > { %v6100_v62 = vpop.f32.mrf.mxu1 }
 0xa3c   : > { %v6524_v23 = vpop.f32.mrf.mxu0 }
 0xa3e   : > { %v6381_v35 = vpop.f32.mrf.mxu1  ;;  %v6526_v20 = vpop.f32.mrf.mxu0 }
 0xa3f   : > { %v6388_v24 = vadd.f32 %v6381_v35, %v6245_v58 }
 0xa40   : > { %v6383_v59 = vpop.f32.mrf.mxu1  ;;  %v6528_v8 = vpop.f32.mrf.mxu0 }
 0xa41   : > { %v6389_v5 = vadd.f32 %v6383_v59, %v6246_v52  ;;  %v6531_v0 = vadd.f32 %v6524_v23, %v6388_v24 }
 0xa42   : > { %v6385_v38 = vpop.f32.mrf.mxu1  ;;  %v6529_v49 = vpop.f32.mrf.mxu0 }
 0xa43   : > { %v6532_v45 = vadd.f32 %v6526_v20, %v6389_v5 }
 0xa44   : > { %v6386_v56 = vpop.f32.mrf.mxu1 }
 0xa5c   : > { %v6810_v61 = vpop.f32.mrf.mxu0 }
 0xa5e   : > { %v6667_v44 = vpop.f32.mrf.mxu1  ;;  %v6812_v34 = vpop.f32.mrf.mxu0 }
 0xa5f   : > { %v6674_v17 = vadd.f32 %v6667_v44, %v6531_v0 }
 0xa60   : > { %v6669_v19 = vpop.f32.mrf.mxu1  ;;  %v6814_v18 = vpop.f32.mrf.mxu0 }
 0xa61   : > { %v6817_v21 = vadd.f32 %v6810_v61, %v6674_v17  ;;  %v6675_v63 = vadd.f32 %v6669_v19, %v6532_v45 }
 0xa62   : > { %v6671_v36 = vpop.f32.mrf.mxu1  ;;  %v6815_v1 = vpop.f32.mrf.mxu0 }
 0xa63   : > { %v6835_v57 = vadd.f32 %v6828_v37, %v6817_v21  ;;  %v6818_v42 = vadd.f32 %v6812_v34, %v6675_v63 }
 0xa64   : > { %v6672_v26 = vpop.f32.mrf.mxu1 }
 0xa65   : > { %v6837_v14 = vmax.f32 %v6835_v57, 0.0  ;;  %v6836_v16 = vadd.f32 %v6832_v13, %v6818_v42 }
 0xa67   : > { %v6850_v12 = vmul.f32 %v6843_v22, %v6837_v14  ;;  %v6838_v11 = vmax.f32 %v6836_v16, 0.0 }
 0xa69   : > { %v6863_v41 = vadd.f32 %v6856_v28, %v6850_v12  ;;  %v6851_v25 = vmul.f32 %v6847_v29, %v6838_v11 }
 0xa6b   : > { %6865 = vst [vmem:[%s391_s30] sm:$0xff] %v6863_v41  ;;  %v6864_v6 = vadd.f32 %v6860_v9, %v6851_v25 }
 0xa6d   : > { %6866 = vst [vmem:[%s391_s30 + $0x8] sm:$0xff] %v6864_v6 }
 0xa6e PF: > { %p17_p2 = scmp.ge.s32.totalorder %s9518_s29, 4   ;;  %s11399_s24 = smov %s9434_s25 }
 0xa6f   : > { %s11400_s25 = smov %s9438_s26  ;;  %s11401_s26 = smov %s9528_s9 }
 0xa70   : > { %s11402_s27 = smov %s9518_s29  ;;  %19 = sbr.rel (!%p17_p2) target bundleno = 7 (0x7), region = 155 }
 0xa75   :  { %6889 = vsyncpa [#allocation7], 1 }
 0xa76   :  { %6891 = vsyncpa [#allocation7 + $0x1], 1 }
 0xa77   :  { %6892 = vsyncpa [#allocation9], 1 }
 0xa78   :  { %6893 = vsyncpa [#allocation12], 1 }

</bundles_post_ra>
